<compile_context>
chip_gen: v7x
topology: tpu7x:2x2x1
jax: 0.10.0
libtpu: 0.0.40
codegen_flags: <defaults>
</compile_context>

<pallas_src>
import jax
import jax.numpy as jnp
from jax import lax
from jax.experimental import pallas as pl
from jax.experimental.pallas import tpu as pltpu
import numpy as np


def _bigru_kernel(x_ref, wi_ref, whbd_ref, bih_ref, bhn_ref,
                  out_ref, hid_ref, gi_scratch, h_scratch):
    # x_ref     : (2, C, B, I) bf16  chunk of inputs; dir 0 = forward time
    #                                 order, dir 1 = pre-reversed time order.
    # wi_ref    : (2, I, 3Hp)  bf16  per-direction input->gate weights, gate
    #                                 columns [r | z | n] (Hp each).
    # whbd_ref  : (2Hp, 6Hp)   f32   block-diagonal fused hidden weights;
    #                                 rows [fwd | bwd], cols gate-major /
    #                                 direction-minor: [r_f r_b|z_f z_b|n_f n_b].
    # bih_ref   : (1, 6Hp)     f32   b_i (all gates) + b_h (r,z) folded, same
    #                                 column layout as whbd.
    # bhn_ref   : (1, 2Hp)     f32   b_hn per direction [n_f | n_b].
    # out_ref   : (C, B, 2Hp)  f32   per-timestep hidden [h_f | h_b].
    # hid_ref   : (B, 2Hp)     f32   final hidden [h_f | h_b].
    # gi_scratch: VMEM (C, B, 6Hp)   this chunk's input projections (+biases).
    # h_scratch : VMEM (B, 2Hp)      hidden state carried across chunks.
    c = pl.program_id(0)
    C = x_ref.shape[1]
    B = x_ref.shape[2]
    Hp2 = h_scratch.shape[-1]          # 2 * Hp
    Hp = Hp2 // 2

    @pl.when(c == 0)
    def _():
        h_scratch[...] = jnp.zeros_like(h_scratch)

    # ---- Hoisted input projection for this chunk (both directions) ----------
    # bf16 MXU feed, f32 accumulation.  b_i (all gates) and b_h (r,z gates)
    # are pre-folded into bih, added once here, off the recurrence path.
    bih = bih_ref[...]                                          # (1, 6Hp)
    for d in range(2):
        xg = x_ref[d].reshape(C * B, x_ref.shape[3])            # (C*B, I) bf16
        gi = jnp.dot(xg, wi_ref[d],
                     preferred_element_type=jnp.float32)        # (C*B, 3Hp)
        gi = gi.reshape(C, B, 3 * Hp)
        for g in range(3):       # scatter into gate-major / dir-minor layout
            lo = g * 2 * Hp + d * Hp
            gi_scratch[:, :, lo:lo + Hp] = (
                gi[:, :, g * Hp:(g + 1) * Hp] + bih[:, lo:lo + Hp])

    # ---- Recurrence (both directions interleaved, one MXU push per step) ----
    whbd = whbd_ref[...]                                        # (2Hp, 6Hp)
    bhn = bhn_ref[...]                                          # (1, 2Hp)

    def step(t, h):
        gi_t = gi_scratch[t]                                    # (B, 6Hp)
        gh = jnp.dot(h, whbd, preferred_element_type=jnp.float32)  # (B, 6Hp)
        r = jax.nn.sigmoid(gi_t[:, :Hp2] + gh[:, :Hp2])
        z = jax.nn.sigmoid(gi_t[:, Hp2:2 * Hp2] + gh[:, Hp2:2 * Hp2])
        n = jnp.tanh(gi_t[:, 2 * Hp2:] + r * (gh[:, 2 * Hp2:] + bhn))
        h_new = (1.0 - z) * n + z * h                           # (B, 2Hp)
        out_ref[t] = h_new.astype(out_ref.dtype)                # lane-dense store
        return h_new

    h = h_scratch[...]
    if C <= 32:
        # Full static unroll lets the scheduler overlap step t's MXU push with
        # step t-1's sigmoid/tanh (EUP) and VPU tail.
        for t in range(C):
            h = step(t, h)
    else:
        h = lax.fori_loop(0, C, step, h, unroll=8)

    h_scratch[...] = h
    hid_ref[...] = h.astype(hid_ref.dtype)


def _round_up(x, m):
    return (x + m - 1) // m * m


def _pick_chunk(S, B, I, Hp, budget_bytes):
    """Largest time-chunk whose pipeline working set fits the VMEM budget."""
    # Per-timestep VMEM inside the chunk pipeline:
    #   x block  (2 dirs, bf16, double-buffered), out block (f32, 2 buffers),
    #   gi scratch (f32, single-buffered).
    per_t = 2 * (2 * B * I * 2) + 2 * (B * 2 * Hp * 4) + B * 6 * Hp * 4
    # Grid-invariant blocks: weights/biases (double-buffered inputs), final
    # hidden block, hidden carry scratch.
    fixed = 2 * (2 * I * 3 * Hp * 2 + 2 * Hp * 6 * Hp * 4
                 + 6 * Hp * 4 + 2 * Hp * 4) + 3 * (B * 2 * Hp * 4)
    avail = max(budget_bytes - fixed, per_t)
    max_chunk = max(1, int(avail // per_t))
    if S <= max_chunk:
        return S
    # Largest divisor of S that fits, so the grid tiles S exactly (padding the
    # time axis would perturb the backward recurrence).
    best = 1
    for d in range(1, max_chunk + 1):
        if S % d == 0:
            best = d
    return best


def encoder_forward(x, w_i, w_h, b_i, b_h):
    """Bidirectional single-layer GRU forward, matching torch.nn.GRU.

    x   : (B, S, I)   batch_first input
    w_i : (2, I, 3H)  per-direction fused input weights, gate columns [r|z|n]
    w_h : (2, H, 3H)  per-direction fused hidden weights, gate columns [r|z|n]
    b_i : (2, 3H),  b_h : (2, 3H)
    Returns (output (B, S, 2H), hidden (2, B, H)).
    """
    B, S, I = x.shape
    H = w_h.shape[1]
    Hp = _round_up(H, 128)             # lane-dense gate slices / output stores
    f32 = jnp.float32

    # ---- Pad & repack weights (zero padding keeps padded lanes at exactly 0).
    wi = jnp.zeros((2, I, 3, Hp), f32).at[:, :, :, :H].set(
        w_i.astype(f32).reshape(2, I, 3, H)).reshape(2, I, 3 * Hp)
    wh = jnp.zeros((2, H, 3, Hp), f32).at[:, :, :, :H].set(
        w_h.astype(f32).reshape(2, H, 3, H))
    wh = jnp.zeros((2, Hp, 3, Hp), f32).at[:, :H].set(wh)       # pad rows
    # Block-diagonal fused hidden weights: rows [h_f | h_b] (2Hp), columns
    # gate-major / direction-minor: [r_f r_b | z_f z_b | n_f n_b] (6Hp).
    whbd = jnp.zeros((2, Hp, 3, 2, Hp), f32)
    whbd = whbd.at[0, :, :, 0, :].set(wh[0]).at[1, :, :, 1, :].set(wh[1])
    whbd = whbd.reshape(2 * Hp, 6 * Hp)

    # ---- Biases: fold b_i (all gates) + b_h (r,z) into the projection bias;
    # b_hn must stay inside r*(W_hn h + b_hn) to match nn.GRU exactly.
    bi3 = b_i.astype(f32).reshape(2, 3, H)
    bh3 = b_h.astype(f32).reshape(2, 3, H)
    gate_mask = jnp.array([1.0, 1.0, 0.0], f32)[None, :, None]  # r, z only
    fold = bi3 + bh3 * gate_mask                                 # (2, 3, H)
    bih = jnp.zeros((3, 2, Hp), f32).at[:, :, :H].set(
        jnp.transpose(fold, (1, 0, 2))).reshape(1, 6 * Hp)
    bhn = jnp.zeros((2, Hp), f32).at[:, :H].set(bh3[:, 2, :]).reshape(1, 2 * Hp)

    # ---- Inputs: time-major; backward direction pre-reversed in the wrapper
    # so the kernel's step loop always walks forward.  bf16 feed for the MXU.
    x_tm = jnp.transpose(x, (1, 0, 2))                           # (S, B, I)
    x2 = jnp.stack([x_tm, jnp.flip(x_tm, axis=0)]).astype(jnp.bfloat16)
    wi = wi.astype(jnp.bfloat16)

    # ---- Chunk the time axis so VMEM stays bounded (fits v7x 64 MiB/TC).
    chunk = _pick_chunk(S, B, I, Hp, budget_bytes=40 * 1024 * 1024)
    num_chunks = S // chunk

    out, hid = pl.pallas_call(
        _bigru_kernel,
        out_shape=(
            jax.ShapeDtypeStruct((S, B, 2 * Hp), f32),   # per-step [h_f | h_b]
            jax.ShapeDtypeStruct((B, 2 * Hp), f32),      # final   [h_f | h_b]
        ),
        grid_spec=pltpu.PrefetchScalarGridSpec(
            num_scalar_prefetch=0,
            grid=(num_chunks,),
            in_specs=[
                pl.BlockSpec((2, chunk, B, I), lambda c: (0, c, 0, 0)),
                pl.BlockSpec((2, I, 3 * Hp), lambda c: (0, 0, 0)),
                pl.BlockSpec((2 * Hp, 6 * Hp), lambda c: (0, 0)),
                pl.BlockSpec((1, 6 * Hp), lambda c: (0, 0)),
                pl.BlockSpec((1, 2 * Hp), lambda c: (0, 0)),
            ],
            out_specs=[
                pl.BlockSpec((chunk, B, 2 * Hp), lambda c: (c, 0, 0)),
                pl.BlockSpec((B, 2 * Hp), lambda c: (0, 0)),
            ],
            scratch_shapes=[
                pltpu.VMEM((chunk, B, 6 * Hp), f32),   # chunk input projections
                pltpu.VMEM((B, 2 * Hp), f32),          # hidden carry (chunks)
            ],
        ),
        compiler_params=pltpu.CompilerParams(
            dimension_semantics=("arbitrary",),        # h carries chunk->chunk
            vmem_limit_bytes=64 * 1024 * 1024),
    )(x2, wi, whbd, bih, bhn)

    # out columns: [0:H] forward hidden (time order t), [Hp:Hp+H] backward
    # hidden (stored in reversed time order -> un-flip here).
    out_f = out[:, :, :H]                                        # (S, B, H)
    out_b = jnp.flip(out[:, :, Hp:Hp + H], axis=0)               # (S, B, H)
    output = jnp.transpose(jnp.concatenate([out_f, out_b], axis=-1), (1, 0, 2))
    hidden = jnp.stack([hid[:, :H], hid[:, Hp:Hp + H]], axis=0)  # (2, B, H)
    return output, hidden


def _gru_reference(x, w_i, w_h, b_i, b_h):
    """Pure-JAX reference (mirrors torch.nn.GRU math) for validation."""
    B, S, _ = x.shape
    H = w_h.shape[1]
    outs, hids = [], []
    for d in range(2):
        Wi, Wh = w_i[d], w_h[d]          # (I, 3H), (H, 3H)
        bi, bh = b_i[d], b_h[d]          # (3H,)
        h = jnp.zeros((B, H), jnp.float32)
        out_d = [None] * S
        order = range(S) if d == 0 else range(S - 1, -1, -1)
        for t in order:
            xt = x[:, t, :]
            gi = xt @ Wi + bi
            gh = h @ Wh + bh
            r = jax.nn.sigmoid(gi[:, 0:H] + gh[:, 0:H])
            z = jax.nn.sigmoid(gi[:, H:2 * H] + gh[:, H:2 * H])
            n = jnp.tanh(gi[:, 2 * H:] + r * gh[:, 2 * H:])
            h = (1.0 - z) * n + z * h
            out_d[t] = h
        outs.append(jnp.stack(out_d, axis=1))
        hids.append(h)
    return jnp.concatenate(outs, axis=-1), jnp.stack(hids, axis=0)


def _init_params(key, input_size, hidden_size):
    """Deterministic init mirroring the module: orthogonal weight matrices,
    uniform(-1/sqrt(H), 1/sqrt(H)) biases.  Weights are returned gate-fused:
    (dir, in, 3H) with columns ordered [r | z | n] (PyTorch's gate order)."""
    I, H = input_size, hidden_size
    k_wi, k_wh, k_bi, k_bh = jax.random.split(key, 4)
    ortho = jax.nn.initializers.orthogonal()

    def make_w(k, cols):
        w = ortho(k, (3 * H, cols), jnp.float32)   # PyTorch layout (3H, cols)
        return jnp.transpose(w)                    # (cols, 3H)

    w_i = jnp.stack([make_w(k, I) for k in jax.random.split(k_wi, 2)])
    w_h = jnp.stack([make_w(k, H) for k in jax.random.split(k_wh, 2)])

    bound = 1.0 / np.sqrt(H)
    b_i = jax.random.uniform(k_bi, (2, 3 * H), jnp.float32, -bound, bound)
    b_h = jax.random.uniform(k_bh, (2, 3 * H), jnp.float32, -bound, bound)
    return w_i, w_h, b_i, b_h


if __name__ == "__main__":
    B, S, I, H = 2, 8, 4, 32  # batch, seq, input_size, hidden_size

    key = jax.random.PRNGKey(0)
    k_x, k_p = jax.random.split(key)
    x = jax.random.normal(k_x, (B, S, I), jnp.float32)
    w_i, w_h, b_i, b_h = _init_params(k_p, I, H)

    output, hidden = jax.jit(encoder_forward)(x, w_i, w_h, b_i, b_h)
    output = jax.block_until_ready(output)
    hidden = jax.block_until_ready(hidden)

    assert output.shape == (B, S, 2 * H)
    assert hidden.shape == (2, B, H)

    ref_out, ref_hid = _gru_reference(x, w_i, w_h, b_i, b_h)
    # Tolerance loosened vs the all-f32 reference because the hoisted input
    # projection is fed with bf16 operands (f32 accumulation); the recurrence
    # itself stays f32.
    np.testing.assert_allclose(np.asarray(output), np.asarray(ref_out),
                               rtol=2e-2, atol=2e-2)
    np.testing.assert_allclose(np.asarray(hidden), np.asarray(ref_hid),
                               rtol=2e-2, atol=2e-2)

    print("KERNEL_OK")
</pallas_src>

<mosaic_0001>
module attributes {stable_mosaic.version = 11 : i64} {
  func.func @_bigru_kernel(%arg0: i32, %arg1: memref<2x8x2x4xbf16, #tpu.memory_space<vmem>>, %arg2: memref<2x4x384xbf16, #tpu.memory_space<vmem>>, %arg3: memref<256x768xf32, #tpu.memory_space<vmem>>, %arg4: memref<1x768xf32, #tpu.memory_space<vmem>>, %arg5: memref<1x256xf32, #tpu.memory_space<vmem>>, %arg6: memref<8x2x256xf32, #tpu.memory_space<vmem>>, %arg7: memref<2x256xf32, #tpu.memory_space<vmem>>, %arg8: memref<8x2x768xf32, #tpu.memory_space<vmem>>, %arg9: memref<2x256xf32, #tpu.memory_space<vmem>>) attributes {dimension_semantics = [#tpu.dimension_semantics<arbitrary>], iteration_bounds = array<i64: 1>, scalar_prefetch = 0 : i64, scratch_operands = 2 : i64, tpu.core_type = #tpu.core_type<tc>, window_params = [{transform_indices = @transform_0, window_bounds = array<i64: 2, 8, 2, 4>}, {pipeline_mode = #tpu.pipeline_mode<synchronous>, transform_indices = @transform_1, window_bounds = array<i64: 2, 4, 384>}, {pipeline_mode = #tpu.pipeline_mode<synchronous>, transform_indices = @transform_2, window_bounds = array<i64: 256, 768>}, {pipeline_mode = #tpu.pipeline_mode<synchronous>, transform_indices = @transform_3, window_bounds = array<i64: 1, 768>}, {pipeline_mode = #tpu.pipeline_mode<synchronous>, transform_indices = @transform_4, window_bounds = array<i64: 1, 256>}, {transform_indices = @transform_5, window_bounds = array<i64: 8, 2, 256>}, {pipeline_mode = #tpu.pipeline_mode<synchronous>, transform_indices = @transform_6, window_bounds = array<i64: 2, 256>}]} {
    %c0_i32 = arith.constant 0 : i32
    %0 = arith.cmpi eq, %arg0, %c0_i32 : i32
    %1 = arith.extui %0 : i1 to i32
    %c0_i32_0 = arith.constant 0 : i32
    %2 = arith.cmpi ne, %1, %c0_i32_0 : i32
    scf.if %2 {
      %cst_113 = arith.constant 0.000000e+00 : f32
      %331 = vector.broadcast %cst_113 : f32 to vector<2x256xf32>
      %c0_114 = arith.constant 0 : index
      %c0_115 = arith.constant 0 : index
      %332 = vector.load %arg9[%c0_114, %c0_115] : memref<2x256xf32, #tpu.memory_space<vmem>>, vector<2x256xf32>
      tpu.vector_store %arg9[%c0_114, %c0_115], %331 {strides = array<i32>} : memref<2x256xf32, #tpu.memory_space<vmem>>, vector<2x256xf32>,
    } else {
    }
    %c0 = arith.constant 0 : index
    %c0_1 = arith.constant 0 : index
    %3 = vector.load %arg4[%c0, %c0_1] : memref<1x768xf32, #tpu.memory_space<vmem>>, vector<1x768xf32>
    %c0_2 = arith.constant 0 : index
    %c0_3 = arith.constant 0 : index
    %c0_4 = arith.constant 0 : index
    %c0_5 = arith.constant 0 : index
    %4 = vector.load %arg1[%c0_2, %c0_3, %c0_4, %c0_5] : memref<2x8x2x4xbf16, #tpu.memory_space<vmem>>, vector<1x8x2x4xbf16>
    %5 = vector.shape_cast %4 : vector<1x8x2x4xbf16> to vector<8x2x4xbf16>
    %6 = vector.shape_cast %5 : vector<8x2x4xbf16> to vector<16x4xbf16>
    %c0_6 = arith.constant 0 : index
    %c0_7 = arith.constant 0 : index
    %c0_8 = arith.constant 0 : index
    %7 = vector.load %arg2[%c0_6, %c0_7, %c0_8] : memref<2x4x384xbf16, #tpu.memory_space<vmem>>, vector<1x4x384xbf16>
    %8 = vector.shape_cast %7 : vector<1x4x384xbf16> to vector<4x384xbf16>
    %cst = arith.constant dense<0.000000e+00> : vector<16x384xf32>
    %9 = tpu.matmul %6, %8, %cst {dimension_numbers = #tpu.dot_dimension_numbers<[1], [0], [0], [1], [0, 0, 1, 1], [], []>} : vector<16x4xbf16>, vector<4x384xbf16>, vector<16x384xf32> -> vector<16x384xf32>
    %10 = vector.shape_cast %9 : vector<16x384xf32> to vector<8x2x384xf32>
    %11 = vector.extract_strided_slice %10 {offsets = [0, 0, 0], sizes = [8, 2, 128], strides = [1, 1, 1]} : vector<8x2x384xf32> to vector<8x2x128xf32>
    %12 = vector.extract_strided_slice %3 {offsets = [0, 0], sizes = [1, 128], strides = [1, 1]} : vector<1x768xf32> to vector<1x128xf32>
    %13 = vector.shape_cast %12 : vector<1x128xf32> to vector<1x1x128xf32>
    %14 = vector.broadcast %13 : vector<1x1x128xf32> to vector<8x2x128xf32>
    %15 = arith.addf %11, %14 : vector<8x2x128xf32>
    %c0_9 = arith.constant 0 : index
    %c0_10 = arith.constant 0 : index
    %c0_11 = arith.constant 0 : index
    %16 = vector.load %arg8[%c0_9, %c0_10, %c0_11] : memref<8x2x768xf32, #tpu.memory_space<vmem>>, vector<8x2x128xf32>
    tpu.vector_store %arg8[%c0_9, %c0_10, %c0_11], %15 {strides = array<i32>} : memref<8x2x768xf32, #tpu.memory_space<vmem>>, vector<8x2x128xf32>,
    %17 = vector.extract_strided_slice %10 {offsets = [0, 0, 128], sizes = [8, 2, 128], strides = [1, 1, 1]} : vector<8x2x384xf32> to vector<8x2x128xf32>
    %18 = vector.extract_strided_slice %3 {offsets = [0, 256], sizes = [1, 128], strides = [1, 1]} : vector<1x768xf32> to vector<1x128xf32>
    %19 = vector.shape_cast %18 : vector<1x128xf32> to vector<1x1x128xf32>
    %20 = vector.broadcast %19 : vector<1x1x128xf32> to vector<8x2x128xf32>
    %21 = arith.addf %17, %20 : vector<8x2x128xf32>
    %c0_12 = arith.constant 0 : index
    %c0_13 = arith.constant 0 : index
    %c256 = arith.constant 256 : index
    %22 = vector.load %arg8[%c0_12, %c0_13, %c256] : memref<8x2x768xf32, #tpu.memory_space<vmem>>, vector<8x2x128xf32>
    tpu.vector_store %arg8[%c0_12, %c0_13, %c256], %21 {strides = array<i32>} : memref<8x2x768xf32, #tpu.memory_space<vmem>>, vector<8x2x128xf32>,
    %23 = vector.extract_strided_slice %10 {offsets = [0, 0, 256], sizes = [8, 2, 128], strides = [1, 1, 1]} : vector<8x2x384xf32> to vector<8x2x128xf32>
    %24 = vector.extract_strided_slice %3 {offsets = [0, 512], sizes = [1, 128], strides = [1, 1]} : vector<1x768xf32> to vector<1x128xf32>
    %25 = vector.shape_cast %24 : vector<1x128xf32> to vector<1x1x128xf32>
    %26 = vector.broadcast %25 : vector<1x1x128xf32> to vector<8x2x128xf32>
    %27 = arith.addf %23, %26 : vector<8x2x128xf32>
    %c0_14 = arith.constant 0 : index
    %c0_15 = arith.constant 0 : index
    %c512 = arith.constant 512 : index
    %28 = vector.load %arg8[%c0_14, %c0_15, %c512] : memref<8x2x768xf32, #tpu.memory_space<vmem>>, vector<8x2x128xf32>
    tpu.vector_store %arg8[%c0_14, %c0_15, %c512], %27 {strides = array<i32>} : memref<8x2x768xf32, #tpu.memory_space<vmem>>, vector<8x2x128xf32>,
    %c1 = arith.constant 1 : index
    %c0_16 = arith.constant 0 : index
    %c0_17 = arith.constant 0 : index
    %c0_18 = arith.constant 0 : index
    %29 = vector.load %arg1[%c1, %c0_16, %c0_17, %c0_18] : memref<2x8x2x4xbf16, #tpu.memory_space<vmem>>, vector<1x8x2x4xbf16>
    %30 = vector.shape_cast %29 : vector<1x8x2x4xbf16> to vector<8x2x4xbf16>
    %31 = vector.shape_cast %30 : vector<8x2x4xbf16> to vector<16x4xbf16>
    %c1_19 = arith.constant 1 : index
    %c0_20 = arith.constant 0 : index
    %c0_21 = arith.constant 0 : index
    %32 = vector.load %arg2[%c1_19, %c0_20, %c0_21] : memref<2x4x384xbf16, #tpu.memory_space<vmem>>, vector<1x4x384xbf16>
    %33 = vector.shape_cast %32 : vector<1x4x384xbf16> to vector<4x384xbf16>
    %cst_22 = arith.constant dense<0.000000e+00> : vector<16x384xf32>
    %34 = tpu.matmul %31, %33, %cst_22 {dimension_numbers = #tpu.dot_dimension_numbers<[1], [0], [0], [1], [0, 0, 1, 1], [], []>} : vector<16x4xbf16>, vector<4x384xbf16>, vector<16x384xf32> -> vector<16x384xf32>
    %35 = vector.shape_cast %34 : vector<16x384xf32> to vector<8x2x384xf32>
    %36 = vector.extract_strided_slice %35 {offsets = [0, 0, 0], sizes = [8, 2, 128], strides = [1, 1, 1]} : vector<8x2x384xf32> to vector<8x2x128xf32>
    %37 = vector.extract_strided_slice %3 {offsets = [0, 128], sizes = [1, 128], strides = [1, 1]} : vector<1x768xf32> to vector<1x128xf32>
    %38 = vector.shape_cast %37 : vector<1x128xf32> to vector<1x1x128xf32>
    %39 = vector.broadcast %38 : vector<1x1x128xf32> to vector<8x2x128xf32>
    %40 = arith.addf %36, %39 : vector<8x2x128xf32>
    %c0_23 = arith.constant 0 : index
    %c0_24 = arith.constant 0 : index
    %c128 = arith.constant 128 : index
    %41 = vector.load %arg8[%c0_23, %c0_24, %c128] : memref<8x2x768xf32, #tpu.memory_space<vmem>>, vector<8x2x128xf32>
    tpu.vector_store %arg8[%c0_23, %c0_24, %c128], %40 {strides = array<i32>} : memref<8x2x768xf32, #tpu.memory_space<vmem>>, vector<8x2x128xf32>,
    %42 = vector.extract_strided_slice %35 {offsets = [0, 0, 128], sizes = [8, 2, 128], strides = [1, 1, 1]} : vector<8x2x384xf32> to vector<8x2x128xf32>
    %43 = vector.extract_strided_slice %3 {offsets = [0, 384], sizes = [1, 128], strides = [1, 1]} : vector<1x768xf32> to vector<1x128xf32>
    %44 = vector.shape_cast %43 : vector<1x128xf32> to vector<1x1x128xf32>
    %45 = vector.broadcast %44 : vector<1x1x128xf32> to vector<8x2x128xf32>
    %46 = arith.addf %42, %45 : vector<8x2x128xf32>
    %c0_25 = arith.constant 0 : index
    %c0_26 = arith.constant 0 : index
    %c384 = arith.constant 384 : index
    %47 = vector.load %arg8[%c0_25, %c0_26, %c384] : memref<8x2x768xf32, #tpu.memory_space<vmem>>, vector<8x2x128xf32>
    tpu.vector_store %arg8[%c0_25, %c0_26, %c384], %46 {strides = array<i32>} : memref<8x2x768xf32, #tpu.memory_space<vmem>>, vector<8x2x128xf32>,
    %48 = vector.extract_strided_slice %35 {offsets = [0, 0, 256], sizes = [8, 2, 128], strides = [1, 1, 1]} : vector<8x2x384xf32> to vector<8x2x128xf32>
    %49 = vector.extract_strided_slice %3 {offsets = [0, 640], sizes = [1, 128], strides = [1, 1]} : vector<1x768xf32> to vector<1x128xf32>
    %50 = vector.shape_cast %49 : vector<1x128xf32> to vector<1x1x128xf32>
    %51 = vector.broadcast %50 : vector<1x1x128xf32> to vector<8x2x128xf32>
    %52 = arith.addf %48, %51 : vector<8x2x128xf32>
    %c0_27 = arith.constant 0 : index
    %c0_28 = arith.constant 0 : index
    %c640 = arith.constant 640 : index
    %53 = vector.load %arg8[%c0_27, %c0_28, %c640] : memref<8x2x768xf32, #tpu.memory_space<vmem>>, vector<8x2x128xf32>
    tpu.vector_store %arg8[%c0_27, %c0_28, %c640], %52 {strides = array<i32>} : memref<8x2x768xf32, #tpu.memory_space<vmem>>, vector<8x2x128xf32>,
    %c0_29 = arith.constant 0 : index
    %c0_30 = arith.constant 0 : index
    %54 = vector.load %arg3[%c0_29, %c0_30] : memref<256x768xf32, #tpu.memory_space<vmem>>, vector<256x768xf32>
    %c0_31 = arith.constant 0 : index
    %c0_32 = arith.constant 0 : index
    %55 = vector.load %arg5[%c0_31, %c0_32] : memref<1x256xf32, #tpu.memory_space<vmem>>, vector<1x256xf32>
    %c0_33 = arith.constant 0 : index
    %c0_34 = arith.constant 0 : index
    %56 = vector.load %arg9[%c0_33, %c0_34] : memref<2x256xf32, #tpu.memory_space<vmem>>, vector<2x256xf32>
    %c0_35 = arith.constant 0 : index
    %c0_36 = arith.constant 0 : index
    %c0_37 = arith.constant 0 : index
    %57 = vector.load %arg8[%c0_35, %c0_36, %c0_37] : memref<8x2x768xf32, #tpu.memory_space<vmem>>, vector<1x2x768xf32>
    %58 = vector.shape_cast %57 : vector<1x2x768xf32> to vector<2x768xf32>
    %cst_38 = arith.constant dense<0.000000e+00> : vector<2x768xf32>
    %59 = tpu.matmul %56, %54, %cst_38 {dimension_numbers = #tpu.dot_dimension_numbers<[1], [0], [0], [1], [0, 0, 1, 1], [], []>} : vector<2x256xf32>, vector<256x768xf32>, vector<2x768xf32> -> vector<2x768xf32>
    %60 = vector.extract_strided_slice %58 {offsets = [0, 0], sizes = [2, 256], strides = [1, 1]} : vector<2x768xf32> to vector<2x256xf32>
    %61 = vector.extract_strided_slice %59 {offsets = [0, 0], sizes = [2, 256], strides = [1, 1]} : vector<2x768xf32> to vector<2x256xf32>
    %62 = arith.addf %60, %61 : vector<2x256xf32>
    %63 = arith.negf %62 : vector<2x256xf32>
    %64 = math.exp %63 : vector<2x256xf32>
    %cst_39 = arith.constant 1.000000e+00 : f32
    %65 = vector.broadcast %cst_39 : f32 to vector<2x256xf32>
    %66 = arith.addf %65, %64 : vector<2x256xf32>
    %67 = arith.divf %65, %66 : vector<2x256xf32>
    %68 = vector.extract_strided_slice %58 {offsets = [0, 256], sizes = [2, 256], strides = [1, 1]} : vector<2x768xf32> to vector<2x256xf32>
    %69 = vector.extract_strided_slice %59 {offsets = [0, 256], sizes = [2, 256], strides = [1, 1]} : vector<2x768xf32> to vector<2x256xf32>
    %70 = arith.addf %68, %69 : vector<2x256xf32>
    %71 = arith.negf %70 : vector<2x256xf32>
    %72 = math.exp %71 : vector<2x256xf32>
    %cst_40 = arith.constant 1.000000e+00 : f32
    %73 = vector.broadcast %cst_40 : f32 to vector<2x256xf32>
    %74 = arith.addf %73, %72 : vector<2x256xf32>
    %75 = arith.divf %73, %74 : vector<2x256xf32>
    %76 = vector.extract_strided_slice %58 {offsets = [0, 512], sizes = [2, 256], strides = [1, 1]} : vector<2x768xf32> to vector<2x256xf32>
    %77 = vector.extract_strided_slice %59 {offsets = [0, 512], sizes = [2, 256], strides = [1, 1]} : vector<2x768xf32> to vector<2x256xf32>
    %78 = vector.broadcast %55 : vector<1x256xf32> to vector<2x256xf32>
    %79 = arith.addf %77, %78 : vector<2x256xf32>
    %80 = arith.mulf %67, %79 : vector<2x256xf32>
    %81 = arith.addf %76, %80 : vector<2x256xf32>
    %82 = math.tanh %81 : vector<2x256xf32>
    %cst_41 = arith.constant 1.000000e+00 : f32
    %83 = vector.broadcast %cst_41 : f32 to vector<2x256xf32>
    %84 = arith.subf %83, %75 : vector<2x256xf32>
    %85 = arith.mulf %84, %82 : vector<2x256xf32>
    %86 = arith.mulf %75, %56 : vector<2x256xf32>
    %87 = arith.addf %85, %86 : vector<2x256xf32>
    %c0_42 = arith.constant 0 : index
    %c0_43 = arith.constant 0 : index
    %c0_44 = arith.constant 0 : index
    %88 = vector.load %arg6[%c0_42, %c0_43, %c0_44] : memref<8x2x256xf32, #tpu.memory_space<vmem>>, vector<1x2x256xf32>
    %89 = vector.shape_cast %88 : vector<1x2x256xf32> to vector<2x256xf32>
    %90 = vector.shape_cast %87 : vector<2x256xf32> to vector<1x2x256xf32>
    tpu.vector_store %arg6[%c0_42, %c0_43, %c0_44], %90 {strides = array<i32>} : memref<8x2x256xf32, #tpu.memory_space<vmem>>, vector<1x2x256xf32>,
    %c1_45 = arith.constant 1 : index
    %c0_46 = arith.constant 0 : index
    %c0_47 = arith.constant 0 : index
    %91 = vector.load %arg8[%c1_45, %c0_46, %c0_47] : memref<8x2x768xf32, #tpu.memory_space<vmem>>, vector<1x2x768xf32>
    %92 = vector.shape_cast %91 : vector<1x2x768xf32> to vector<2x768xf32>
    %cst_48 = arith.constant dense<0.000000e+00> : vector<2x768xf32>
    %93 = tpu.matmul %87, %54, %cst_48 {dimension_numbers = #tpu.dot_dimension_numbers<[1], [0], [0], [1], [0, 0, 1, 1], [], []>} : vector<2x256xf32>, vector<256x768xf32>, vector<2x768xf32> -> vector<2x768xf32>
    %94 = vector.extract_strided_slice %92 {offsets = [0, 0], sizes = [2, 256], strides = [1, 1]} : vector<2x768xf32> to vector<2x256xf32>
    %95 = vector.extract_strided_slice %93 {offsets = [0, 0], sizes = [2, 256], strides = [1, 1]} : vector<2x768xf32> to vector<2x256xf32>
    %96 = arith.addf %94, %95 : vector<2x256xf32>
    %97 = arith.negf %96 : vector<2x256xf32>
    %98 = math.exp %97 : vector<2x256xf32>
    %cst_49 = arith.constant 1.000000e+00 : f32
    %99 = vector.broadcast %cst_49 : f32 to vector<2x256xf32>
    %100 = arith.addf %99, %98 : vector<2x256xf32>
    %101 = arith.divf %99, %100 : vector<2x256xf32>
    %102 = vector.extract_strided_slice %92 {offsets = [0, 256], sizes = [2, 256], strides = [1, 1]} : vector<2x768xf32> to vector<2x256xf32>
    %103 = vector.extract_strided_slice %93 {offsets = [0, 256], sizes = [2, 256], strides = [1, 1]} : vector<2x768xf32> to vector<2x256xf32>
    %104 = arith.addf %102, %103 : vector<2x256xf32>
    %105 = arith.negf %104 : vector<2x256xf32>
    %106 = math.exp %105 : vector<2x256xf32>
    %cst_50 = arith.constant 1.000000e+00 : f32
    %107 = vector.broadcast %cst_50 : f32 to vector<2x256xf32>
    %108 = arith.addf %107, %106 : vector<2x256xf32>
    %109 = arith.divf %107, %108 : vector<2x256xf32>
    %110 = vector.extract_strided_slice %92 {offsets = [0, 512], sizes = [2, 256], strides = [1, 1]} : vector<2x768xf32> to vector<2x256xf32>
    %111 = vector.extract_strided_slice %93 {offsets = [0, 512], sizes = [2, 256], strides = [1, 1]} : vector<2x768xf32> to vector<2x256xf32>
    %112 = vector.broadcast %55 : vector<1x256xf32> to vector<2x256xf32>
    %113 = arith.addf %111, %112 : vector<2x256xf32>
    %114 = arith.mulf %101, %113 : vector<2x256xf32>
    %115 = arith.addf %110, %114 : vector<2x256xf32>
    %116 = math.tanh %115 : vector<2x256xf32>
    %cst_51 = arith.constant 1.000000e+00 : f32
    %117 = vector.broadcast %cst_51 : f32 to vector<2x256xf32>
    %118 = arith.subf %117, %109 : vector<2x256xf32>
    %119 = arith.mulf %118, %116 : vector<2x256xf32>
    %120 = arith.mulf %109, %87 : vector<2x256xf32>
    %121 = arith.addf %119, %120 : vector<2x256xf32>
    %c1_52 = arith.constant 1 : index
    %c0_53 = arith.constant 0 : index
    %c0_54 = arith.constant 0 : index
    %122 = vector.load %arg6[%c1_52, %c0_53, %c0_54] : memref<8x2x256xf32, #tpu.memory_space<vmem>>, vector<1x2x256xf32>
    %123 = vector.shape_cast %122 : vector<1x2x256xf32> to vector<2x256xf32>
    %124 = vector.shape_cast %121 : vector<2x256xf32> to vector<1x2x256xf32>
    tpu.vector_store %arg6[%c1_52, %c0_53, %c0_54], %124 {strides = array<i32>} : memref<8x2x256xf32, #tpu.memory_space<vmem>>, vector<1x2x256xf32>,
    %c2 = arith.constant 2 : index
    %c0_55 = arith.constant 0 : index
    %c0_56 = arith.constant 0 : index
    %125 = vector.load %arg8[%c2, %c0_55, %c0_56] : memref<8x2x768xf32, #tpu.memory_space<vmem>>, vector<1x2x768xf32>
    %126 = vector.shape_cast %125 : vector<1x2x768xf32> to vector<2x768xf32>
    %cst_57 = arith.constant dense<0.000000e+00> : vector<2x768xf32>
    %127 = tpu.matmul %121, %54, %cst_57 {dimension_numbers = #tpu.dot_dimension_numbers<[1], [0], [0], [1], [0, 0, 1, 1], [], []>} : vector<2x256xf32>, vector<256x768xf32>, vector<2x768xf32> -> vector<2x768xf32>
    %128 = vector.extract_strided_slice %126 {offsets = [0, 0], sizes = [2, 256], strides = [1, 1]} : vector<2x768xf32> to vector<2x256xf32>
    %129 = vector.extract_strided_slice %127 {offsets = [0, 0], sizes = [2, 256], strides = [1, 1]} : vector<2x768xf32> to vector<2x256xf32>
    %130 = arith.addf %128, %129 : vector<2x256xf32>
    %131 = arith.negf %130 : vector<2x256xf32>
    %132 = math.exp %131 : vector<2x256xf32>
    %cst_58 = arith.constant 1.000000e+00 : f32
    %133 = vector.broadcast %cst_58 : f32 to vector<2x256xf32>
    %134 = arith.addf %133, %132 : vector<2x256xf32>
    %135 = arith.divf %133, %134 : vector<2x256xf32>
    %136 = vector.extract_strided_slice %126 {offsets = [0, 256], sizes = [2, 256], strides = [1, 1]} : vector<2x768xf32> to vector<2x256xf32>
    %137 = vector.extract_strided_slice %127 {offsets = [0, 256], sizes = [2, 256], strides = [1, 1]} : vector<2x768xf32> to vector<2x256xf32>
    %138 = arith.addf %136, %137 : vector<2x256xf32>
    %139 = arith.negf %138 : vector<2x256xf32>
    %140 = math.exp %139 : vector<2x256xf32>
    %cst_59 = arith.constant 1.000000e+00 : f32
    %141 = vector.broadcast %cst_59 : f32 to vector<2x256xf32>
    %142 = arith.addf %141, %140 : vector<2x256xf32>
    %143 = arith.divf %141, %142 : vector<2x256xf32>
    %144 = vector.extract_strided_slice %126 {offsets = [0, 512], sizes = [2, 256], strides = [1, 1]} : vector<2x768xf32> to vector<2x256xf32>
    %145 = vector.extract_strided_slice %127 {offsets = [0, 512], sizes = [2, 256], strides = [1, 1]} : vector<2x768xf32> to vector<2x256xf32>
    %146 = vector.broadcast %55 : vector<1x256xf32> to vector<2x256xf32>
    %147 = arith.addf %145, %146 : vector<2x256xf32>
    %148 = arith.mulf %135, %147 : vector<2x256xf32>
    %149 = arith.addf %144, %148 : vector<2x256xf32>
    %150 = math.tanh %149 : vector<2x256xf32>
    %cst_60 = arith.constant 1.000000e+00 : f32
    %151 = vector.broadcast %cst_60 : f32 to vector<2x256xf32>
    %152 = arith.subf %151, %143 : vector<2x256xf32>
    %153 = arith.mulf %152, %150 : vector<2x256xf32>
    %154 = arith.mulf %143, %121 : vector<2x256xf32>
    %155 = arith.addf %153, %154 : vector<2x256xf32>
    %c2_61 = arith.constant 2 : index
    %c0_62 = arith.constant 0 : index
    %c0_63 = arith.constant 0 : index
    %156 = vector.load %arg6[%c2_61, %c0_62, %c0_63] : memref<8x2x256xf32, #tpu.memory_space<vmem>>, vector<1x2x256xf32>
    %157 = vector.shape_cast %156 : vector<1x2x256xf32> to vector<2x256xf32>
    %158 = vector.shape_cast %155 : vector<2x256xf32> to vector<1x2x256xf32>
    tpu.vector_store %arg6[%c2_61, %c0_62, %c0_63], %158 {strides = array<i32>} : memref<8x2x256xf32, #tpu.memory_space<vmem>>, vector<1x2x256xf32>,
    %c3 = arith.constant 3 : index
    %c0_64 = arith.constant 0 : index
    %c0_65 = arith.constant 0 : index
    %159 = vector.load %arg8[%c3, %c0_64, %c0_65] : memref<8x2x768xf32, #tpu.memory_space<vmem>>, vector<1x2x768xf32>
    %160 = vector.shape_cast %159 : vector<1x2x768xf32> to vector<2x768xf32>
    %cst_66 = arith.constant dense<0.000000e+00> : vector<2x768xf32>
    %161 = tpu.matmul %155, %54, %cst_66 {dimension_numbers = #tpu.dot_dimension_numbers<[1], [0], [0], [1], [0, 0, 1, 1], [], []>} : vector<2x256xf32>, vector<256x768xf32>, vector<2x768xf32> -> vector<2x768xf32>
    %162 = vector.extract_strided_slice %160 {offsets = [0, 0], sizes = [2, 256], strides = [1, 1]} : vector<2x768xf32> to vector<2x256xf32>
    %163 = vector.extract_strided_slice %161 {offsets = [0, 0], sizes = [2, 256], strides = [1, 1]} : vector<2x768xf32> to vector<2x256xf32>
    %164 = arith.addf %162, %163 : vector<2x256xf32>
    %165 = arith.negf %164 : vector<2x256xf32>
    %166 = math.exp %165 : vector<2x256xf32>
    %cst_67 = arith.constant 1.000000e+00 : f32
    %167 = vector.broadcast %cst_67 : f32 to vector<2x256xf32>
    %168 = arith.addf %167, %166 : vector<2x256xf32>
    %169 = arith.divf %167, %168 : vector<2x256xf32>
    %170 = vector.extract_strided_slice %160 {offsets = [0, 256], sizes = [2, 256], strides = [1, 1]} : vector<2x768xf32> to vector<2x256xf32>
    %171 = vector.extract_strided_slice %161 {offsets = [0, 256], sizes = [2, 256], strides = [1, 1]} : vector<2x768xf32> to vector<2x256xf32>
    %172 = arith.addf %170, %171 : vector<2x256xf32>
    %173 = arith.negf %172 : vector<2x256xf32>
    %174 = math.exp %173 : vector<2x256xf32>
    %cst_68 = arith.constant 1.000000e+00 : f32
    %175 = vector.broadcast %cst_68 : f32 to vector<2x256xf32>
    %176 = arith.addf %175, %174 : vector<2x256xf32>
    %177 = arith.divf %175, %176 : vector<2x256xf32>
    %178 = vector.extract_strided_slice %160 {offsets = [0, 512], sizes = [2, 256], strides = [1, 1]} : vector<2x768xf32> to vector<2x256xf32>
    %179 = vector.extract_strided_slice %161 {offsets = [0, 512], sizes = [2, 256], strides = [1, 1]} : vector<2x768xf32> to vector<2x256xf32>
    %180 = vector.broadcast %55 : vector<1x256xf32> to vector<2x256xf32>
    %181 = arith.addf %179, %180 : vector<2x256xf32>
    %182 = arith.mulf %169, %181 : vector<2x256xf32>
    %183 = arith.addf %178, %182 : vector<2x256xf32>
    %184 = math.tanh %183 : vector<2x256xf32>
    %cst_69 = arith.constant 1.000000e+00 : f32
    %185 = vector.broadcast %cst_69 : f32 to vector<2x256xf32>
    %186 = arith.subf %185, %177 : vector<2x256xf32>
    %187 = arith.mulf %186, %184 : vector<2x256xf32>
    %188 = arith.mulf %177, %155 : vector<2x256xf32>
    %189 = arith.addf %187, %188 : vector<2x256xf32>
    %c3_70 = arith.constant 3 : index
    %c0_71 = arith.constant 0 : index
    %c0_72 = arith.constant 0 : index
    %190 = vector.load %arg6[%c3_70, %c0_71, %c0_72] : memref<8x2x256xf32, #tpu.memory_space<vmem>>, vector<1x2x256xf32>
    %191 = vector.shape_cast %190 : vector<1x2x256xf32> to vector<2x256xf32>
    %192 = vector.shape_cast %189 : vector<2x256xf32> to vector<1x2x256xf32>
    tpu.vector_store %arg6[%c3_70, %c0_71, %c0_72], %192 {strides = array<i32>} : memref<8x2x256xf32, #tpu.memory_space<vmem>>, vector<1x2x256xf32>,
    %c4 = arith.constant 4 : index
    %c0_73 = arith.constant 0 : index
    %c0_74 = arith.constant 0 : index
    %193 = vector.load %arg8[%c4, %c0_73, %c0_74] : memref<8x2x768xf32, #tpu.memory_space<vmem>>, vector<1x2x768xf32>
    %194 = vector.shape_cast %193 : vector<1x2x768xf32> to vector<2x768xf32>
    %cst_75 = arith.constant dense<0.000000e+00> : vector<2x768xf32>
    %195 = tpu.matmul %189, %54, %cst_75 {dimension_numbers = #tpu.dot_dimension_numbers<[1], [0], [0], [1], [0, 0, 1, 1], [], []>} : vector<2x256xf32>, vector<256x768xf32>, vector<2x768xf32> -> vector<2x768xf32>
    %196 = vector.extract_strided_slice %194 {offsets = [0, 0], sizes = [2, 256], strides = [1, 1]} : vector<2x768xf32> to vector<2x256xf32>
    %197 = vector.extract_strided_slice %195 {offsets = [0, 0], sizes = [2, 256], strides = [1, 1]} : vector<2x768xf32> to vector<2x256xf32>
    %198 = arith.addf %196, %197 : vector<2x256xf32>
    %199 = arith.negf %198 : vector<2x256xf32>
    %200 = math.exp %199 : vector<2x256xf32>
    %cst_76 = arith.constant 1.000000e+00 : f32
    %201 = vector.broadcast %cst_76 : f32 to vector<2x256xf32>
    %202 = arith.addf %201, %200 : vector<2x256xf32>
    %203 = arith.divf %201, %202 : vector<2x256xf32>
    %204 = vector.extract_strided_slice %194 {offsets = [0, 256], sizes = [2, 256], strides = [1, 1]} : vector<2x768xf32> to vector<2x256xf32>
    %205 = vector.extract_strided_slice %195 {offsets = [0, 256], sizes = [2, 256], strides = [1, 1]} : vector<2x768xf32> to vector<2x256xf32>
    %206 = arith.addf %204, %205 : vector<2x256xf32>
    %207 = arith.negf %206 : vector<2x256xf32>
    %208 = math.exp %207 : vector<2x256xf32>
    %cst_77 = arith.constant 1.000000e+00 : f32
    %209 = vector.broadcast %cst_77 : f32 to vector<2x256xf32>
    %210 = arith.addf %209, %208 : vector<2x256xf32>
    %211 = arith.divf %209, %210 : vector<2x256xf32>
    %212 = vector.extract_strided_slice %194 {offsets = [0, 512], sizes = [2, 256], strides = [1, 1]} : vector<2x768xf32> to vector<2x256xf32>
    %213 = vector.extract_strided_slice %195 {offsets = [0, 512], sizes = [2, 256], strides = [1, 1]} : vector<2x768xf32> to vector<2x256xf32>
    %214 = vector.broadcast %55 : vector<1x256xf32> to vector<2x256xf32>
    %215 = arith.addf %213, %214 : vector<2x256xf32>
    %216 = arith.mulf %203, %215 : vector<2x256xf32>
    %217 = arith.addf %212, %216 : vector<2x256xf32>
    %218 = math.tanh %217 : vector<2x256xf32>
    %cst_78 = arith.constant 1.000000e+00 : f32
    %219 = vector.broadcast %cst_78 : f32 to vector<2x256xf32>
    %220 = arith.subf %219, %211 : vector<2x256xf32>
    %221 = arith.mulf %220, %218 : vector<2x256xf32>
    %222 = arith.mulf %211, %189 : vector<2x256xf32>
    %223 = arith.addf %221, %222 : vector<2x256xf32>
    %c4_79 = arith.constant 4 : index
    %c0_80 = arith.constant 0 : index
    %c0_81 = arith.constant 0 : index
    %224 = vector.load %arg6[%c4_79, %c0_80, %c0_81] : memref<8x2x256xf32, #tpu.memory_space<vmem>>, vector<1x2x256xf32>
    %225 = vector.shape_cast %224 : vector<1x2x256xf32> to vector<2x256xf32>
    %226 = vector.shape_cast %223 : vector<2x256xf32> to vector<1x2x256xf32>
    tpu.vector_store %arg6[%c4_79, %c0_80, %c0_81], %226 {strides = array<i32>} : memref<8x2x256xf32, #tpu.memory_space<vmem>>, vector<1x2x256xf32>,
    %c5 = arith.constant 5 : index
    %c0_82 = arith.constant 0 : index
    %c0_83 = arith.constant 0 : index
    %227 = vector.load %arg8[%c5, %c0_82, %c0_83] : memref<8x2x768xf32, #tpu.memory_space<vmem>>, vector<1x2x768xf32>
    %228 = vector.shape_cast %227 : vector<1x2x768xf32> to vector<2x768xf32>
    %cst_84 = arith.constant dense<0.000000e+00> : vector<2x768xf32>
    %229 = tpu.matmul %223, %54, %cst_84 {dimension_numbers = #tpu.dot_dimension_numbers<[1], [0], [0], [1], [0, 0, 1, 1], [], []>} : vector<2x256xf32>, vector<256x768xf32>, vector<2x768xf32> -> vector<2x768xf32>
    %230 = vector.extract_strided_slice %228 {offsets = [0, 0], sizes = [2, 256], strides = [1, 1]} : vector<2x768xf32> to vector<2x256xf32>
    %231 = vector.extract_strided_slice %229 {offsets = [0, 0], sizes = [2, 256], strides = [1, 1]} : vector<2x768xf32> to vector<2x256xf32>
    %232 = arith.addf %230, %231 : vector<2x256xf32>
    %233 = arith.negf %232 : vector<2x256xf32>
    %234 = math.exp %233 : vector<2x256xf32>
    %cst_85 = arith.constant 1.000000e+00 : f32
    %235 = vector.broadcast %cst_85 : f32 to vector<2x256xf32>
    %236 = arith.addf %235, %234 : vector<2x256xf32>
    %237 = arith.divf %235, %236 : vector<2x256xf32>
    %238 = vector.extract_strided_slice %228 {offsets = [0, 256], sizes = [2, 256], strides = [1, 1]} : vector<2x768xf32> to vector<2x256xf32>
    %239 = vector.extract_strided_slice %229 {offsets = [0, 256], sizes = [2, 256], strides = [1, 1]} : vector<2x768xf32> to vector<2x256xf32>
    %240 = arith.addf %238, %239 : vector<2x256xf32>
    %241 = arith.negf %240 : vector<2x256xf32>
    %242 = math.exp %241 : vector<2x256xf32>
    %cst_86 = arith.constant 1.000000e+00 : f32
    %243 = vector.broadcast %cst_86 : f32 to vector<2x256xf32>
    %244 = arith.addf %243, %242 : vector<2x256xf32>
    %245 = arith.divf %243, %244 : vector<2x256xf32>
    %246 = vector.extract_strided_slice %228 {offsets = [0, 512], sizes = [2, 256], strides = [1, 1]} : vector<2x768xf32> to vector<2x256xf32>
    %247 = vector.extract_strided_slice %229 {offsets = [0, 512], sizes = [2, 256], strides = [1, 1]} : vector<2x768xf32> to vector<2x256xf32>
    %248 = vector.broadcast %55 : vector<1x256xf32> to vector<2x256xf32>
    %249 = arith.addf %247, %248 : vector<2x256xf32>
    %250 = arith.mulf %237, %249 : vector<2x256xf32>
    %251 = arith.addf %246, %250 : vector<2x256xf32>
    %252 = math.tanh %251 : vector<2x256xf32>
    %cst_87 = arith.constant 1.000000e+00 : f32
    %253 = vector.broadcast %cst_87 : f32 to vector<2x256xf32>
    %254 = arith.subf %253, %245 : vector<2x256xf32>
    %255 = arith.mulf %254, %252 : vector<2x256xf32>
    %256 = arith.mulf %245, %223 : vector<2x256xf32>
    %257 = arith.addf %255, %256 : vector<2x256xf32>
    %c5_88 = arith.constant 5 : index
    %c0_89 = arith.constant 0 : index
    %c0_90 = arith.constant 0 : index
    %258 = vector.load %arg6[%c5_88, %c0_89, %c0_90] : memref<8x2x256xf32, #tpu.memory_space<vmem>>, vector<1x2x256xf32>
    %259 = vector.shape_cast %258 : vector<1x2x256xf32> to vector<2x256xf32>
    %260 = vector.shape_cast %257 : vector<2x256xf32> to vector<1x2x256xf32>
    tpu.vector_store %arg6[%c5_88, %c0_89, %c0_90], %260 {strides = array<i32>} : memref<8x2x256xf32, #tpu.memory_space<vmem>>, vector<1x2x256xf32>,
    %c6 = arith.constant 6 : index
    %c0_91 = arith.constant 0 : index
    %c0_92 = arith.constant 0 : index
    %261 = vector.load %arg8[%c6, %c0_91, %c0_92] : memref<8x2x768xf32, #tpu.memory_space<vmem>>, vector<1x2x768xf32>
    %262 = vector.shape_cast %261 : vector<1x2x768xf32> to vector<2x768xf32>
    %cst_93 = arith.constant dense<0.000000e+00> : vector<2x768xf32>
    %263 = tpu.matmul %257, %54, %cst_93 {dimension_numbers = #tpu.dot_dimension_numbers<[1], [0], [0], [1], [0, 0, 1, 1], [], []>} : vector<2x256xf32>, vector<256x768xf32>, vector<2x768xf32> -> vector<2x768xf32>
    %264 = vector.extract_strided_slice %262 {offsets = [0, 0], sizes = [2, 256], strides = [1, 1]} : vector<2x768xf32> to vector<2x256xf32>
    %265 = vector.extract_strided_slice %263 {offsets = [0, 0], sizes = [2, 256], strides = [1, 1]} : vector<2x768xf32> to vector<2x256xf32>
    %266 = arith.addf %264, %265 : vector<2x256xf32>
    %267 = arith.negf %266 : vector<2x256xf32>
    %268 = math.exp %267 : vector<2x256xf32>
    %cst_94 = arith.constant 1.000000e+00 : f32
    %269 = vector.broadcast %cst_94 : f32 to vector<2x256xf32>
    %270 = arith.addf %269, %268 : vector<2x256xf32>
    %271 = arith.divf %269, %270 : vector<2x256xf32>
    %272 = vector.extract_strided_slice %262 {offsets = [0, 256], sizes = [2, 256], strides = [1, 1]} : vector<2x768xf32> to vector<2x256xf32>
    %273 = vector.extract_strided_slice %263 {offsets = [0, 256], sizes = [2, 256], strides = [1, 1]} : vector<2x768xf32> to vector<2x256xf32>
    %274 = arith.addf %272, %273 : vector<2x256xf32>
    %275 = arith.negf %274 : vector<2x256xf32>
    %276 = math.exp %275 : vector<2x256xf32>
    %cst_95 = arith.constant 1.000000e+00 : f32
    %277 = vector.broadcast %cst_95 : f32 to vector<2x256xf32>
    %278 = arith.addf %277, %276 : vector<2x256xf32>
    %279 = arith.divf %277, %278 : vector<2x256xf32>
    %280 = vector.extract_strided_slice %262 {offsets = [0, 512], sizes = [2, 256], strides = [1, 1]} : vector<2x768xf32> to vector<2x256xf32>
    %281 = vector.extract_strided_slice %263 {offsets = [0, 512], sizes = [2, 256], strides = [1, 1]} : vector<2x768xf32> to vector<2x256xf32>
    %282 = vector.broadcast %55 : vector<1x256xf32> to vector<2x256xf32>
    %283 = arith.addf %281, %282 : vector<2x256xf32>
    %284 = arith.mulf %271, %283 : vector<2x256xf32>
    %285 = arith.addf %280, %284 : vector<2x256xf32>
    %286 = math.tanh %285 : vector<2x256xf32>
    %cst_96 = arith.constant 1.000000e+00 : f32
    %287 = vector.broadcast %cst_96 : f32 to vector<2x256xf32>
    %288 = arith.subf %287, %279 : vector<2x256xf32>
    %289 = arith.mulf %288, %286 : vector<2x256xf32>
    %290 = arith.mulf %279, %257 : vector<2x256xf32>
    %291 = arith.addf %289, %290 : vector<2x256xf32>
    %c6_97 = arith.constant 6 : index
    %c0_98 = arith.constant 0 : index
    %c0_99 = arith.constant 0 : index
    %292 = vector.load %arg6[%c6_97, %c0_98, %c0_99] : memref<8x2x256xf32, #tpu.memory_space<vmem>>, vector<1x2x256xf32>
    %293 = vector.shape_cast %292 : vector<1x2x256xf32> to vector<2x256xf32>
    %294 = vector.shape_cast %291 : vector<2x256xf32> to vector<1x2x256xf32>
    tpu.vector_store %arg6[%c6_97, %c0_98, %c0_99], %294 {strides = array<i32>} : memref<8x2x256xf32, #tpu.memory_space<vmem>>, vector<1x2x256xf32>,
    %c7 = arith.constant 7 : index
    %c0_100 = arith.constant 0 : index
    %c0_101 = arith.constant 0 : index
    %295 = vector.load %arg8[%c7, %c0_100, %c0_101] : memref<8x2x768xf32, #tpu.memory_space<vmem>>, vector<1x2x768xf32>
    %296 = vector.shape_cast %295 : vector<1x2x768xf32> to vector<2x768xf32>
    %cst_102 = arith.constant dense<0.000000e+00> : vector<2x768xf32>
    %297 = tpu.matmul %291, %54, %cst_102 {dimension_numbers = #tpu.dot_dimension_numbers<[1], [0], [0], [1], [0, 0, 1, 1], [], []>} : vector<2x256xf32>, vector<256x768xf32>, vector<2x768xf32> -> vector<2x768xf32>
    %298 = vector.extract_strided_slice %296 {offsets = [0, 0], sizes = [2, 256], strides = [1, 1]} : vector<2x768xf32> to vector<2x256xf32>
    %299 = vector.extract_strided_slice %297 {offsets = [0, 0], sizes = [2, 256], strides = [1, 1]} : vector<2x768xf32> to vector<2x256xf32>
    %300 = arith.addf %298, %299 : vector<2x256xf32>
    %301 = arith.negf %300 : vector<2x256xf32>
    %302 = math.exp %301 : vector<2x256xf32>
    %cst_103 = arith.constant 1.000000e+00 : f32
    %303 = vector.broadcast %cst_103 : f32 to vector<2x256xf32>
    %304 = arith.addf %303, %302 : vector<2x256xf32>
    %305 = arith.divf %303, %304 : vector<2x256xf32>
    %306 = vector.extract_strided_slice %296 {offsets = [0, 256], sizes = [2, 256], strides = [1, 1]} : vector<2x768xf32> to vector<2x256xf32>
    %307 = vector.extract_strided_slice %297 {offsets = [0, 256], sizes = [2, 256], strides = [1, 1]} : vector<2x768xf32> to vector<2x256xf32>
    %308 = arith.addf %306, %307 : vector<2x256xf32>
    %309 = arith.negf %308 : vector<2x256xf32>
    %310 = math.exp %309 : vector<2x256xf32>
    %cst_104 = arith.constant 1.000000e+00 : f32
    %311 = vector.broadcast %cst_104 : f32 to vector<2x256xf32>
    %312 = arith.addf %311, %310 : vector<2x256xf32>
    %313 = arith.divf %311, %312 : vector<2x256xf32>
    %314 = vector.extract_strided_slice %296 {offsets = [0, 512], sizes = [2, 256], strides = [1, 1]} : vector<2x768xf32> to vector<2x256xf32>
    %315 = vector.extract_strided_slice %297 {offsets = [0, 512], sizes = [2, 256], strides = [1, 1]} : vector<2x768xf32> to vector<2x256xf32>
    %316 = vector.broadcast %55 : vector<1x256xf32> to vector<2x256xf32>
    %317 = arith.addf %315, %316 : vector<2x256xf32>
    %318 = arith.mulf %305, %317 : vector<2x256xf32>
    %319 = arith.addf %314, %318 : vector<2x256xf32>
    %320 = math.tanh %319 : vector<2x256xf32>
    %cst_105 = arith.constant 1.000000e+00 : f32
    %321 = vector.broadcast %cst_105 : f32 to vector<2x256xf32>
    %322 = arith.subf %321, %313 : vector<2x256xf32>
    %323 = arith.mulf %322, %320 : vector<2x256xf32>
    %324 = arith.mulf %313, %291 : vector<2x256xf32>
    %325 = arith.addf %323, %324 : vector<2x256xf32>
    %c7_106 = arith.constant 7 : index
    %c0_107 = arith.constant 0 : index
    %c0_108 = arith.constant 0 : index
    %326 = vector.load %arg6[%c7_106, %c0_107, %c0_108] : memref<8x2x256xf32, #tpu.memory_space<vmem>>, vector<1x2x256xf32>
    %327 = vector.shape_cast %326 : vector<1x2x256xf32> to vector<2x256xf32>
    %328 = vector.shape_cast %325 : vector<2x256xf32> to vector<1x2x256xf32>
    tpu.vector_store %arg6[%c7_106, %c0_107, %c0_108], %328 {strides = array<i32>} : memref<8x2x256xf32, #tpu.memory_space<vmem>>, vector<1x2x256xf32>,
    %c0_109 = arith.constant 0 : index
    %c0_110 = arith.constant 0 : index
    %329 = vector.load %arg9[%c0_109, %c0_110] : memref<2x256xf32, #tpu.memory_space<vmem>>, vector<2x256xf32>
    tpu.vector_store %arg9[%c0_109, %c0_110], %325 {strides = array<i32>} : memref<2x256xf32, #tpu.memory_space<vmem>>, vector<2x256xf32>,
    %c0_111 = arith.constant 0 : index
    %c0_112 = arith.constant 0 : index
    %330 = vector.load %arg7[%c0_111, %c0_112] : memref<2x256xf32, #tpu.memory_space<vmem>>, vector<2x256xf32>
    tpu.vector_store %arg7[%c0_111, %c0_112], %325 {strides = array<i32>} : memref<2x256xf32, #tpu.memory_space<vmem>>, vector<2x256xf32>,
    return
  }
  func.func @transform_0(%arg0: i32) -> (i32, i32, i32, i32) {
    %c0_i32 = arith.constant 0 : i32
    %c0_i32_0 = arith.constant 0 : i32
    %c0_i32_1 = arith.constant 0 : i32
    %c0_i32_2 = arith.constant 0 : i32
    return %c0_i32, %arg0, %c0_i32_0, %c0_i32_1 : i32, i32, i32, i32
  }
  func.func @transform_1(%arg0: i32) -> (i32, i32, i32) {
    %c0_i32 = arith.constant 0 : i32
    %c0_i32_0 = arith.constant 0 : i32
    %c0_i32_1 = arith.constant 0 : i32
    %c0_i32_2 = arith.constant 0 : i32
    return %c0_i32, %c0_i32_0, %c0_i32_1 : i32, i32, i32
  }
  func.func @transform_2(%arg0: i32) -> (i32, i32) {
    %c0_i32 = arith.constant 0 : i32
    %c0_i32_0 = arith.constant 0 : i32
    %c0_i32_1 = arith.constant 0 : i32
    return %c0_i32, %c0_i32_0 : i32, i32
  }
  func.func @transform_3(%arg0: i32) -> (i32, i32) {
    %c0_i32 = arith.constant 0 : i32
    %c0_i32_0 = arith.constant 0 : i32
    %c0_i32_1 = arith.constant 0 : i32
    return %c0_i32, %c0_i32_0 : i32, i32
  }
  func.func @transform_4(%arg0: i32) -> (i32, i32) {
    %c0_i32 = arith.constant 0 : i32
    %c0_i32_0 = arith.constant 0 : i32
    %c0_i32_1 = arith.constant 0 : i32
    return %c0_i32, %c0_i32_0 : i32, i32
  }
  func.func @transform_5(%arg0: i32) -> (i32, i32, i32) {
    %c0_i32 = arith.constant 0 : i32
    %c0_i32_0 = arith.constant 0 : i32
    %c0_i32_1 = arith.constant 0 : i32
    return %arg0, %c0_i32, %c0_i32_0 : i32, i32, i32
  }
  func.func @transform_6(%arg0: i32) -> (i32, i32) {
    %c0_i32 = arith.constant 0 : i32
    %c0_i32_0 = arith.constant 0 : i32
    %c0_i32_1 = arith.constant 0 : i32
    return %c0_i32, %c0_i32_0 : i32, i32
  }
}

</mosaic_0001>

<bundles_post_ra>
// kernel: encoder_forward.1
= control target key start
LH: loop header
LB: loop body
LE: loop exit
PB: predicated region body
PF: predicated region fallthrough
CT: control target
= control target key end

     0   :  { %12 = vsyncpa [#allocation5], 0  ;;  %s6619_s0 = inlined_call_operand.hbm [shape: bf16[2,8,2,4], index: 0, kind: input, shape index: {}]   ;;  %s6620_s1 = inlined_call_operand.hbm [shape: bf16[2,4,384], index: 1, kind: input, shape index: {}]   ;;  %s6621_s2 = inlined_call_operand.hbm [shape: f32[256,768], index: 2, kind: input, shape index: {}]   ;;  %s6622_s3 = inlined_call_operand.hbm [shape: f32[1,768], index: 3, kind: input, shape index: {}]   ;;  %s6623_s4 = inlined_call_operand.hbm [shape: f32[1,256], index: 4, kind: input, shape index: {}]   ;;  %s6624_s5 = inlined_call_operand.hbm [shape: f32[8,2,256], index: 5, kind: output, shape index: {0}]   ;;  %s6625_s6 = inlined_call_operand.hbm [shape: f32[2,256], index: 6, kind: output, shape index: {1}]  }
   0x1   :  { %13 = vsyncpa [#allocation8], 0 }
   0x2   :  { %14 = vsyncpa [#allocation11], 0 }
   0x3   :  { %15 = vsyncpa [#allocation6], 0 }
   0x4   :  { %16 = vsyncpa [#allocation15], 0  ;;  %s5205_s21 = smov [#allocation7]   ;;  %s5041_s25 = scalar_lea.hbm %s6620_s1, 192 }
   0x5   :  { %s34_s22 = sshll.u32 %s5205_s21, 4  ;;  %p5042_p0 = scmp.ne.s32.totalorder %s6620_s1, %s5041_s25  ;;  %s35_s22 = int_to_ptr.vmem [resolvable:$true] %s34_s22 }
   0x6   :  { %p5045_p1 = scmp.lt.u32.totalorder %s5041_s25, %s6620_s1 }
   0x8   :  { %p5047_p2 = pnand %p5045_p1, %p5042_p0 }
   0xa   :  { %5050 = shalt.err (!%p5047_p2)
}
   0xb   :  { %s5051_s30 = scalar_lea.vmem %s35_s22, 192  ;;  %p5056_p4 = scmp.lt.s32.totalorder %s35_s22, %s35_s22 }
   0xc   :  { %p5052_p3 = scmp.ne.s32.totalorder %s35_s22, %s5051_s30  ;;  %p5057_p5 = scmp.lt.s32.totalorder %s5051_s30, %s5051_s30 }
   0xe   :  { %p5058_p6 = por %p5057_p5, %p5056_p4 }
  0x10   :  { %p5059_p7 = pnand %p5058_p6, %p5052_p3 }
  0x12   :  { %5062 = shalt.err (!%p5059_p7)
}
  0x13   :  { %s5206_s7 = smov 96   ;;  %s5207_s8 = smov 6  }
  0x14   :  { %40 = dma.hbm_to_vmem [thread:$0]  %s6620_s1, 192, %s35_s22, [#allocation8], %s5206_s7, %s5206_s7, %s5207_s8  }
  0x15   :  { %s5208_s11 = smov [#allocation10]   ;;  %s5209_s13 = smov [#allocation4]  }
  0x16   :  { %s59_s12 = sshll.u32 %s5208_s11, 4  ;;  %s22_s14 = sshll.u32 %s5209_s13, 4  ;;  %s60_s12 = int_to_ptr.vmem [resolvable:$true] %s59_s12  ;;  %s23_s14 = int_to_ptr.vmem [resolvable:$true] %s22_s14 }
  0x17   :  { %s5063_s17 = scalar_lea.hbm %s6622_s3, 96 }
  0x18   :  { %p5064_p8 = scmp.ne.s32.totalorder %s6622_s3, %s5063_s17  ;;  %p5067_p9 = scmp.lt.u32.totalorder %s5063_s17, %s6622_s3 }
  0x1a   :  { %p5069_p10 = pnand %p5067_p9, %p5064_p8 }
  0x1c   :  { %5072 = shalt.err (!%p5069_p10)
}
  0x1d   :  { %s5073_s1 = scalar_lea.vmem %s60_s12, 96  ;;  %p5078_p12 = scmp.lt.s32.totalorder %s60_s12, %s60_s12 }
  0x1e   :  { %p5074_p11 = scmp.ne.s32.totalorder %s60_s12, %s5073_s1  ;;  %p5079_p13 = scmp.lt.s32.totalorder %s5073_s1, %s5073_s1 }
  0x20   :  { %p5080_p0 = por %p5079_p13, %p5078_p12 }
  0x22   :  { %p5081_p1 = pnand %p5080_p0, %p5074_p11 }
  0x24   :  { %5084 = shalt.err (!%p5081_p1)
}
  0x25   :  { %62 = dma.hbm_to_vmem [thread:$0]  %s6622_s3, 96, %s60_s12, [#allocation11]  }
  0x26   :  { %s5085_s26 = scalar_lea.hbm %s6619_s0, 256 }
  0x27   :  { %p5086_p2 = scmp.ne.s32.totalorder %s6619_s0, %s5085_s26  ;;  %p5089_p3 = scmp.lt.u32.totalorder %s5085_s26, %s6619_s0 }
  0x29   :  { %p5091_p4 = pnand %p5089_p3, %p5086_p2 }
  0x2b   :  { %5094 = shalt.err (!%p5091_p4)
}
  0x2c   :  { %s5095_s7 = scalar_lea.vmem %s23_s14, 256  ;;  %p5100_p6 = scmp.lt.s32.totalorder %s23_s14, %s23_s14 }
  0x2d   :  { %p5096_p5 = scmp.ne.s32.totalorder %s23_s14, %s5095_s7  ;;  %p5101_p7 = scmp.lt.s32.totalorder %s5095_s7, %s5095_s7 }
  0x2f   :  { %p5102_p8 = por %p5101_p7, %p5100_p6 }
  0x31   :  { %p5103_p9 = pnand %p5102_p8, %p5096_p5 }
  0x33   :  { %5106 = shalt.err (!%p5103_p9)
}
  0x34   :  { %s5210_s3 = smov 16   ;;  %s5211_s8 = smov 1  }
  0x35   :  { %28 = dma.hbm_to_vmem [thread:$0]  %s6619_s0, 256, %s23_s14, [#allocation5], %s5210_s3, %s5210_s3, %s5211_s8  }
  0x36   :  { %s5212_s11 = smov [#allocation9]   ;;  %s5107_s16 = scalar_lea.hbm %s6621_s2, 24576 }
  0x37   :  { %s46_s12 = sshll.u32 %s5212_s11, 4  ;;  %p5108_p10 = scmp.ne.s32.totalorder %s6621_s2, %s5107_s16  ;;  %s47_s12 = int_to_ptr.vmem [resolvable:$true] %s46_s12 }
  0x38   :  { %p5111_p11 = scmp.lt.u32.totalorder %s5107_s16, %s6621_s2 }
  0x3a   :  { %p5113_p12 = pnand %p5111_p11, %p5108_p10 }
  0x3c   :  { %5116 = shalt.err (!%p5113_p12)
}
  0x3d   :  { %s5117_s21 = scalar_lea.vmem %s47_s12, 24576  ;;  %p5122_p0 = scmp.lt.s32.totalorder %s47_s12, %s47_s12 }
  0x3e   :  { %p5118_p13 = scmp.ne.s32.totalorder %s47_s12, %s5117_s21  ;;  %p5123_p1 = scmp.lt.s32.totalorder %s5117_s21, %s5117_s21 }
  0x40   :  { %p5124_p2 = por %p5123_p1, %p5122_p0 }
  0x42   :  { %p5125_p3 = pnand %p5124_p2, %p5118_p13 }
  0x44   :  { %5128 = shalt.err (!%p5125_p3)
}
  0x45   :  { %s5213_s0 = smov 768   ;;  %s5214_s14 = smov 48  }
  0x46   :  { %52 = dma.hbm_to_vmem [thread:$0]  %s6621_s2, 24576, %s47_s12, [#allocation8], %s5213_s0, %s5213_s0, %s5214_s14  }
  0x47   :  { %s5215_s23 = smov [#allocation12]   ;;  %s5129_s27 = scalar_lea.hbm %s6623_s4, 32 }
  0x48   :  { %s69_s24 = sshll.u32 %s5215_s23, 4  ;;  %p5130_p4 = scmp.ne.s32.totalorder %s6623_s4, %s5129_s27  ;;  %s70_s24 = int_to_ptr.vmem [resolvable:$true] %s69_s24 }
  0x49   :  { %p5133_p5 = scmp.lt.u32.totalorder %s5129_s27, %s6623_s4 }
  0x4b   :  { %p5135_p6 = pnand %p5133_p5, %p5130_p4 }
  0x4d   :  { %5138 = shalt.err (!%p5135_p6)
}
  0x4e   :  { %s5139_s3 = scalar_lea.vmem %s70_s24, 32  ;;  %p5144_p8 = scmp.lt.s32.totalorder %s70_s24, %s70_s24 }
  0x4f   :  { %p5140_p7 = scmp.ne.s32.totalorder %s70_s24, %s5139_s3  ;;  %p5145_p9 = scmp.lt.s32.totalorder %s5139_s3, %s5139_s3 }
  0x51   :  { %p5146_p10 = por %p5145_p9, %p5144_p8 }
  0x53   :  { %p5147_p11 = pnand %p5146_p10, %p5140_p7 }
  0x55   :  { %5150 = shalt.err (!%p5147_p11)
}
  0x56   :  { %72 = dma.hbm_to_vmem [thread:$0]  %s6623_s4, 32, %s70_s24, [#allocation11]  }
  0x57   :  { %5195 = dma.done.wait [#allocation5], 256  }
  0x58   :  { %5196 = vsyncadd [#allocation5], 4294967040 }
  0x59   :  { %5197 = dma.done.wait [#allocation8], 24768  }
  0x5a   :  { %5198 = vsyncadd [#allocation8], 4294942528 }
  0x5b   :  { %5199 = dma.done.wait [#allocation11], 128  }
  0x5c   :  { %5200 = vsyncadd [#allocation11], 4294967168  ;;  %v119_v0 = vlaneseq  ;;  %v5216_v1 = vmov 1983009808   ;;  %v5217_v3 = vmov 0.0   ;;  %v5218_v5 = vmov 0  }
  0x5d   :  { %v164_v2 = vunpack.c.l.s4 %v5216_v1  ;;  %93 = vst [vmem:[#allocation3] sm:$0xf] %v5217_v3  ;;  %3389 = vmatprep.subr.bf16.mxu1 %v5217_v3  ;;  %224 = vmatprep.mubr.bf16.mxu0 %v5218_v5  ;;  %vm5219_vm0 = vmmov 0   ;;  %v5220_v6 = vmov 1966171168   ;;  %vm182_vm1 = vcmask 1041408  }
  0x5e   :  { %v5322_v4 = vshrl.u32 %v119_v0, 7  ;;  %3391 = vmatprep.mubr.msk.bf16.mxu1 %vm5219_vm0, %v5217_v3  ;;  %v117_v7 = vunpack.c.l.s4 %v5220_v6  ;;  %v103_v11 = vld [vmem:[#allocation7] sm:$0x3f]  ;;  %v468_v12 = vld [vmem:[#allocation7 + $0x6] sm:$0x3f]  ;;  %v822_v55 = vld [vmem:[#allocation9 + $0x8] sm:$0xff] }
  0x5f   :  { %v165_v8 = vunpack.c.0.s8 %v164_v2  ;;  %v95_v13 = vld [vmem:[#allocation4] sm:$0x1]  ;;  %v162_v16 = vcombine.high %v103_v11, %v103_v11  ;;  %v96_v18 = vld [vmem:[#allocation4 + $0x1] sm:$0x1]  ;;  %v97_v19 = vld [vmem:[#allocation4 + $0x2] sm:$0x1]  ;;  %v527_v26 = vcombine.high %v468_v12, %v468_v12 }
  0x60   :  { %6778 = vst [vmem:[#allocation21_spill] sm:$0xff] %v5322_v4  ;;  %v118_v9 = vunpack.c.0.s8 %v117_v7  ;;  %v98_v20 = vld [vmem:[#allocation4 + $0x3] sm:$0x1]  ;;  %v99_v21 = vld [vmem:[#allocation4 + $0x4] sm:$0x1]  ;;  %v112_v24 = vcombine.low %v95_v13, %v96_v18  ;;  %v828_v59 = vld [vmem:[#allocation9 + $0x38] sm:$0xff] }
  0x61   :  { %v5328_v10 = vsub.s32 %v165_v8, %v5322_v4  ;;  %v100_v22 = vld [vmem:[#allocation4 + $0x5] sm:$0x1]  ;;  %v101_v23 = vld [vmem:[#allocation4 + $0x6] sm:$0x1]  ;;  %v113_v25 = vcombine.low %v97_v19, %v98_v20  ;;  %v102_v31 = vld [vmem:[#allocation4 + $0x7] sm:$0x1]  ;;  %v5354_v8 = vpack.c.bf16 %v828_v59, %v822_v55 }
  0x62   :  { %v5331_v14 = vsub.s32 %v118_v9, %v5322_v4  ;;  %v114_v32 = vcombine.low %v99_v21, %v100_v22  ;;  %v115_v33 = vcombine.low %v101_v23, %v102_v31  ;;  %v459_v36 = vld [vmem:[#allocation4 + $0x8] sm:$0x1]  ;;  %v460_v38 = vld [vmem:[#allocation4 + $0x9] sm:$0x1]  ;;  %v461_v39 = vld [vmem:[#allocation4 + $0xa] sm:$0x1] }
  0x63   :  { %6779 = vst [vmem:[#allocation22_spill] sm:$0xff] %v5328_v10  ;;  %v169_v15 = vrot.slane %v103_v11, %v5328_v10  ;;  %v534_v17 = vrot.slane %v468_v12, %v5328_v10  ;;  %v176_v29 = vrot.slane %v162_v16, %v5328_v10  ;;  %v462_v43 = vld [vmem:[#allocation4 + $0xb] sm:$0x1]  ;;  %v463_v44 = vld [vmem:[#allocation4 + $0xc] sm:$0x1]  ;;  %v541_v46 = vrot.slane %v527_v26, %v5328_v10  ;;  %v824_v60 = vld [vmem:[#allocation9 + $0x18] sm:$0xff] }
  0x64   :  { %v122_v34 = vrot.slane %v112_v24, %v5331_v14  ;;  %v129_v35 = vrot.slane %v113_v25, %v5331_v14  ;;  %v136_v40 = vrot.slane %v114_v32, %v5331_v14  ;;  %v143_v41 = vrot.slane %v115_v33, %v5331_v14  ;;  %v464_v45 = vld [vmem:[#allocation4 + $0xd] sm:$0x1]  ;;  %v465_v47 = vld [vmem:[#allocation4 + $0xe] sm:$0x1]  ;;  %v466_v48 = vld [vmem:[#allocation4 + $0xf] sm:$0x1] }
  0x65   :  { %v177_v27 = vcombine.high %v169_v15, %v169_v15  ;;  %v184_v28 = vsel %vm182_vm1, %v169_v15, 0  ;;  %v542_v30 = vcombine.high %v534_v17, %v534_v17  ;;  %v190_v37 = vsel %vm182_vm1, %v176_v29, 0  ;;  %v830_v61 = vld [vmem:[#allocation9 + $0x48] sm:$0xff]  ;;  %6780 = vst [vmem:[#allocation23_spill] sm:$0xff] %v5354_v8  ;;  %v821_v13 = vld [vmem:[#allocation9] sm:$0xff]  ;;  %v827_v15 = vld [vmem:[#allocation9 + $0x30] sm:$0xff] }
  0x66   :  { %3390 = vmatpush3.bf16.msra.mxu1 %v190_v37  ;;  %v144_v42 = vcombine.low %v122_v34, %v129_v35  ;;  %v477_v49 = vcombine.low %v459_v36, %v460_v38  ;;  %v478_v50 = vcombine.low %v461_v39, %v462_v43  ;;  %v145_v51 = vcombine.low %v136_v40, %v143_v41  ;;  %v823_v16 = vld [vmem:[#allocation9 + $0x10] sm:$0xff]  ;;  %v834_v18 = vld [vmem:[#allocation9 + $0x68] sm:$0xff]  ;;  %v840_v19 = vld [vmem:[#allocation9 + $0x98] sm:$0xff]  ;;  %s5221_s4 = smov [#allocation13]   ;;  %s5222_s10 = smov [#allocation14]  }
  0x67   :  { %3363 = vmatprep.subr.msk.bf16.mxu0 %vm182_vm1, %v177_v27  ;;  %3395 = vmatprep.subr.bf16.mxu1 %v5217_v3  ;;  %v479_v53 = vcombine.low %v463_v44, %v464_v45  ;;  %v480_v54 = vcombine.low %v465_v47, %v466_v48  ;;  %vm178_vm2 = vcmask 31744   ;;  %v547_v2 = vsel %vm182_vm1, %v534_v17, 0  ;;  %v829_v17 = vld [vmem:[#allocation9 + $0x40] sm:$0xff]  ;;  %v836_v20 = vld [vmem:[#allocation9 + $0x78] sm:$0xff]  ;;  %v842_v21 = vld [vmem:[#allocation9 + $0xa8] sm:$0xff]  ;;  %s3335_s9 = sshll.u32 %s5221_s4, 4  ;;  %s3336_s9 = int_to_ptr.vmem [resolvable:$true] %s3335_s9 }
  0x68   :  { %193 = vmatpush1.bf16.msra.mxu0 %v184_v28  ;;  %v152_v52 = vrot.slane %v144_v42, %v5331_v14  ;;  %v487_v56 = vrot.slane %v477_v49, %v5331_v14  ;;  %v494_v57 = vrot.slane %v478_v50, %v5331_v14  ;;  %v159_v58 = vrot.slane %v145_v51, %v5331_v14  ;;  %v833_v24 = vld [vmem:[#allocation9 + $0x60] sm:$0xff]  ;;  %v835_v26 = vld [vmem:[#allocation9 + $0x70] sm:$0xff]  ;;  %v846_v28 = vld [vmem:[#allocation9 + $0xc8] sm:$0xff]  ;;  %s3348_s11 = sshll.u32 %s5222_s10, 4  ;;  %s5151_s12 = scalar_lea.vmem %s3336_s9, 512  ;;  %s6588_s11 = int_to_ptr.vmem [resolvable:$true] %s3348_s11 }
  0x69   :  { %3366 = vmatprep.subr.msk.bf16.mxu0 %vm182_vm1, %v542_v30  ;;  %v501_v62 = vrot.slane %v479_v53, %v5331_v14  ;;  %v508_v63 = vrot.slane %v480_v54, %v5331_v14  ;;  %v553_v6 = vsel %vm182_vm1, %v541_v46, 0  ;;  %v5356_v9 = vpack.c.bf16 %v830_v61, %v824_v60  ;;  %v841_v27 = vld [vmem:[#allocation9 + $0xa0] sm:$0xff]  ;;  %v852_v29 = vld [vmem:[#allocation9 + $0xf8] sm:$0xff]  ;;  %v854_v31 = vld [vmem:[#allocation9 + $0x108] sm:$0xff]  ;;  %p5152_p12 = scmp.ne.s32.totalorder %s3336_s9, %s5151_s12  ;;  %p5156_p13 = scmp.lt.s32.totalorder %s3336_s9, %s3336_s9 }
  0x6a   :  { %v509_v0 = vcombine.low %v487_v56, %v494_v57  ;;  %v160_v1 = vcombine.low %v152_v52, %v159_v58  ;;  %v5367_v22 = vpack.c.bf16 %v827_v15, %v821_v13  ;;  %v5369_v23 = vpack.c.bf16 %v829_v17, %v823_v16  ;;  %v848_v30 = vld [vmem:[#allocation9 + $0xd8] sm:$0xff]  ;;  %v845_v34 = vld [vmem:[#allocation9 + $0xc0] sm:$0xff]  ;;  %v851_v35 = vld [vmem:[#allocation9 + $0xf0] sm:$0xff]  ;;  %p5157_p0 = scmp.lt.s32.totalorder %s5151_s12, %s5151_s12 }
  0x6b   :  { %v510_v7 = vcombine.low %v501_v62, %v508_v63  ;;  %6781 = vst [vmem:[#allocation24_spill] sm:$0xff] %v5356_v9  ;;  %v5371_v25 = vpack.c.bf16 %v840_v19, %v834_v18  ;;  %v5381_v33 = vpack.c.bf16 %v841_v27, %v835_v26  ;;  %v5385_v36 = vpack.c.bf16 %v852_v29, %v846_v28  ;;  %v847_v38 = vld [vmem:[#allocation9 + $0xd0] sm:$0xff]  ;;  %v853_v39 = vld [vmem:[#allocation9 + $0x100] sm:$0xff]  ;;  %v858_v40 = vld [vmem:[#allocation9 + $0x128] sm:$0xff] }
  0x6c   :  { %3364 = vmatmul.mubr.msk.bf16.vlgmr.msra.gmra.mrb[0].mxu0 %vm178_vm2, %v160_v1  ;;  %3392 = vmatmul.mubr.msk.bf16.vlgmr.msra.gmra.mrb[0].mxu1 %vm178_vm2, %v160_v1  ;;  %v517_v11 = vrot.slane %v509_v0, %v5331_v14  ;;  %6782 = vst [vmem:[#allocation25_spill] sm:$0xff] %v5367_v22  ;;  %6783 = vst [vmem:[#allocation26_spill] sm:$0xff] %v5369_v23  ;;  %v5387_v37 = vpack.c.bf16 %v854_v31, %v848_v30  ;;  %v864_v41 = vld [vmem:[#allocation9 + $0x158] sm:$0xff]  ;;  %v866_v43 = vld [vmem:[#allocation9 + $0x168] sm:$0xff]  ;;  %p5158_p1 = por %p5157_p0, %p5156_p13 }
  0x6d   :  { %v524_v12 = vrot.slane %v510_v7, %v5331_v14  ;;  %556 = vmatpush1.bf16.msra.mxu0 %v547_v2  ;;  %3396 = vmatpush3.bf16.msra.mxu1 %v553_v6  ;;  %6786 = vst [vmem:[#allocation29_spill] sm:$0xff] %v5381_v33  ;;  %v860_v42 = vld [vmem:[#allocation9 + $0x138] sm:$0xff]  ;;  %v5391_v44 = vpack.c.bf16 %v851_v35, %v845_v34  ;;  %v857_v46 = vld [vmem:[#allocation9 + $0x120] sm:$0xff]  ;;  %v863_v47 = vld [vmem:[#allocation9 + $0x150] sm:$0xff] }
  0x6e   :  { %587 = vmatprep.mubr.bf16.mxu0 %v5218_v5  ;;  %3397 = vmatprep.mubr.msk.bf16.mxu1 %vm5219_vm0, %v5217_v3  ;;  %v839_v5 = vld [vmem:[#allocation9 + $0x90] sm:$0xff]  ;;  %v5373_v3 = vpack.c.bf16 %v842_v21, %v836_v20  ;;  %6787 = vst [vmem:[#allocation30_spill] sm:$0xff] %v5387_v37  ;;  %v5393_v45 = vpack.c.bf16 %v853_v39, %v847_v38  ;;  %v865_v51 = vld [vmem:[#allocation9 + $0x160] sm:$0xff]  ;;  %v870_v52 = vld [vmem:[#allocation9 + $0x188] sm:$0xff]  ;;  %p5159_p2 = pnand %p5158_p1, %p5152_p12 }
  0x6f   :  { %3402 = vmatprep.subr.bf16.mxu0 %v5354_v8  ;;  %3466 = vmatprep.subr.bf16.mxu1 %v5356_v9  ;;  %v525_v14 = vcombine.low %v517_v11, %v524_v12  ;;  %v5379_v32 = vpack.c.bf16 %v839_v5, %v833_v24  ;;  %6788 = vst [vmem:[#allocation31_spill] sm:$0xff] %v5391_v44  ;;  %v859_v50 = vld [vmem:[#allocation9 + $0x130] sm:$0xff]  ;;  %v876_v53 = vld [vmem:[#allocation9 + $0x1b8] sm:$0xff]  ;;  %v878_v55 = vld [vmem:[#allocation9 + $0x1c8] sm:$0xff] }
  0x70   :  { %6784 = vst [vmem:[#allocation27_spill] sm:$0xff] %v5373_v3  ;;  %6789 = vst [vmem:[#allocation32_spill] sm:$0xff] %v5393_v45  ;;  %v5397_v48 = vpack.c.bf16 %v864_v41, %v858_v40  ;;  %v5399_v49 = vpack.c.bf16 %v866_v43, %v860_v42  ;;  %v872_v54 = vld [vmem:[#allocation9 + $0x198] sm:$0xff]  ;;  %v5403_v56 = vpack.c.bf16 %v863_v47, %v857_v46  ;;  %v869_v58 = vld [vmem:[#allocation9 + $0x180] sm:$0xff] }
  0x71   :  { %6785 = vst [vmem:[#allocation28_spill] sm:$0xff] %v5379_v32  ;;  %v5405_v57 = vpack.c.bf16 %v865_v51, %v859_v50  ;;  %v875_v59 = vld [vmem:[#allocation9 + $0x1b0] sm:$0xff]  ;;  %v5409_v60 = vpack.c.bf16 %v876_v53, %v870_v52  ;;  %v5411_v61 = vpack.c.bf16 %v878_v55, %v872_v54  ;;  %v877_v63 = vld [vmem:[#allocation9 + $0x1c0] sm:$0xff]  ;;  %v882_v0 = vld [vmem:[#allocation9 + $0x1e8] sm:$0xff] }
  0x72   :  { %6790 = vst [vmem:[#allocation33_spill] sm:$0xff] %v5399_v49  ;;  %6791 = vst [vmem:[#allocation34_spill] sm:$0xff] %v5403_v56  ;;  %v871_v62 = vld [vmem:[#allocation9 + $0x190] sm:$0xff]  ;;  %v888_v1 = vld [vmem:[#allocation9 + $0x218] sm:$0xff]  ;;  %v5415_v7 = vpack.c.bf16 %v875_v59, %v869_v58 }
  0x73   :  { %6792 = vst [vmem:[#allocation35_spill] sm:$0xff] %v5405_v57  ;;  %6793 = vst [vmem:[#allocation36_spill] sm:$0xff] %v5411_v61  ;;  %v884_v2 = vld [vmem:[#allocation9 + $0x1f8] sm:$0xff]  ;;  %v890_v6 = vld [vmem:[#allocation9 + $0x228] sm:$0xff]  ;;  %v5417_v11 = vpack.c.bf16 %v877_v63, %v871_v62  ;;  %v5421_v15 = vpack.c.bf16 %v888_v1, %v882_v0 }
  0x74   :  { %3367 = vmatmul.mubr.msk.bf16.vlgmr.msra.gmra.mrb[4].mxu0 %vm178_vm2, %v525_v14  ;;  %3398 = vmatmul.mubr.msk.bf16.vlgmr.msra.gmra.mrb[4].mxu1 %vm178_vm2, %v525_v14  ;;  %6794 = vst [vmem:[#allocation37_spill] sm:$0xff] %v5415_v7  ;;  %v881_v12 = vld [vmem:[#allocation9 + $0x1e0] sm:$0xff]  ;;  %v887_v13 = vld [vmem:[#allocation9 + $0x210] sm:$0xff]  ;;  %v5423_v16 = vpack.c.bf16 %v890_v6, %v884_v2  ;;  %v894_v19 = vld [vmem:[#allocation9 + $0x248] sm:$0xff] }
  0x75   :  { %3404 = vmatpush1.bf16.msra.mxu0 %v5367_v22  ;;  %3468 = vmatpush1.bf16.msra.mxu1 %v5369_v23  ;;  %6795 = vst [vmem:[#allocation38_spill] sm:$0xff] %v5417_v11  ;;  %v883_v17 = vld [vmem:[#allocation9 + $0x1f0] sm:$0xff]  ;;  %v889_v18 = vld [vmem:[#allocation9 + $0x220] sm:$0xff]  ;;  %v900_v20 = vld [vmem:[#allocation9 + $0x278] sm:$0xff]  ;;  %v5427_v24 = vpack.c.bf16 %v887_v13, %v881_v12 }
  0x76   :  { %3406 = vmatprep.subr.bf16.mxu0 %v5371_v25  ;;  %3470 = vmatprep.subr.bf16.mxu1 %v5373_v3  ;;  %6796 = vst [vmem:[#allocation39_spill] sm:$0xff] %v5423_v16  ;;  %v896_v21 = vld [vmem:[#allocation9 + $0x258] sm:$0xff]  ;;  %v902_v14 = vld [vmem:[#allocation9 + $0x288] sm:$0xff]  ;;  %v5429_v5 = vpack.c.bf16 %v889_v18, %v883_v17  ;;  %v893_v26 = vld [vmem:[#allocation9 + $0x240] sm:$0xff]  ;;  %v5433_v28 = vpack.c.bf16 %v900_v20, %v894_v19 }
  0x77   :  { %6797 = vst [vmem:[#allocation40_spill] sm:$0xff] %v5427_v24  ;;  %v899_v27 = vld [vmem:[#allocation9 + $0x270] sm:$0xff]  ;;  %v5435_v29 = vpack.c.bf16 %v902_v14, %v896_v21  ;;  %v901_v31 = vld [vmem:[#allocation9 + $0x280] sm:$0xff]  ;;  %v906_v34 = vld [vmem:[#allocation9 + $0x2a8] sm:$0xff] }
  0x78   :  { %6798 = vst [vmem:[#allocation41_spill] sm:$0xff] %v5429_v5  ;;  %v895_v30 = vld [vmem:[#allocation9 + $0x250] sm:$0xff]  ;;  %v912_v35 = vld [vmem:[#allocation9 + $0x2d8] sm:$0xff]  ;;  %v914_v39 = vld [vmem:[#allocation9 + $0x2e8] sm:$0xff]  ;;  %v5439_v40 = vpack.c.bf16 %v899_v27, %v893_v26 }
  0x79   :  { %3408 = vmatpush1.bf16.msra.mxu0 %v5379_v32  ;;  %3472 = vmatpush1.bf16.msra.mxu1 %v5381_v33  ;;  %6799 = vst [vmem:[#allocation42_spill] sm:$0xff] %v5435_v29  ;;  %v908_v38 = vld [vmem:[#allocation9 + $0x2b8] sm:$0xff]  ;;  %v5441_v41 = vpack.c.bf16 %v901_v31, %v895_v30  ;;  %v905_v42 = vld [vmem:[#allocation9 + $0x2a0] sm:$0xff]  ;;  %v911_v43 = vld [vmem:[#allocation9 + $0x2d0] sm:$0xff]  ;;  %v5445_v46 = vpack.c.bf16 %v912_v35, %v906_v34 }
  0x7a   :  { %3410 = vmatprep.subr.bf16.mxu0 %v5385_v36  ;;  %3474 = vmatprep.subr.bf16.mxu1 %v5387_v37  ;;  %6800 = vst [vmem:[#allocation43_spill] sm:$0xff] %v5439_v40  ;;  %v5447_v47 = vpack.c.bf16 %v914_v39, %v908_v38  ;;  %v907_v50 = vld [vmem:[#allocation9 + $0x2b0] sm:$0xff]  ;;  %v913_v51 = vld [vmem:[#allocation9 + $0x2e0] sm:$0xff]  ;;  %v918_v52 = vld [vmem:[#allocation9 + $0x308] sm:$0xff]  ;;  %v5451_v58 = vpack.c.bf16 %v911_v43, %v905_v42 }
  0x7b   :  { %6801 = vst [vmem:[#allocation44_spill] sm:$0xff] %v5441_v41  ;;  %v924_v53 = vld [vmem:[#allocation9 + $0x338] sm:$0xff]  ;;  %v926_v55 = vld [vmem:[#allocation9 + $0x348] sm:$0xff]  ;;  %v5453_v59 = vpack.c.bf16 %v913_v51, %v907_v50  ;;  %v917_v62 = vld [vmem:[#allocation9 + $0x300] sm:$0xff] }
  0x7c   :  { %6802 = vst [vmem:[#allocation45_spill] sm:$0xff] %v5447_v47  ;;  %v920_v54 = vld [vmem:[#allocation9 + $0x318] sm:$0xff]  ;;  %6803 = vst [vmem:[#allocation46_spill] sm:$0xff] %v5451_v58  ;;  %v923_v63 = vld [vmem:[#allocation9 + $0x330] sm:$0xff]  ;;  %v5457_v1 = vpack.c.bf16 %v924_v53, %v918_v52 }
  0x7d   :  { %3412 = vmatpush1.bf16.msra.mxu0 %v5391_v44  ;;  %3476 = vmatpush1.bf16.msra.mxu1 %v5393_v45  ;;  %6804 = vst [vmem:[#allocation47_spill] sm:$0xff] %v5453_v59  ;;  %v919_v0 = vld [vmem:[#allocation9 + $0x310] sm:$0xff]  ;;  %v5459_v2 = vpack.c.bf16 %v926_v55, %v920_v54  ;;  %v925_v6 = vld [vmem:[#allocation9 + $0x340] sm:$0xff]  ;;  %v930_v12 = vld [vmem:[#allocation9 + $0x368] sm:$0xff]  ;;  %v5465_v20 = vpack.c.bf16 %v923_v63, %v917_v62 }
  0x7e   :  { %3414 = vmatprep.subr.bf16.mxu0 %v5397_v48  ;;  %3478 = vmatprep.subr.bf16.mxu1 %v5399_v49  ;;  %v936_v13 = vld [vmem:[#allocation9 + $0x398] sm:$0xff]  ;;  %v938_v18 = vld [vmem:[#allocation9 + $0x3a8] sm:$0xff]  ;;  %v5461_v19 = vld.sshfl [vmem:[#allocation3] sm:$0x33 pattern:$0x76325410]  ;;  %v5467_v21 = vpack.c.bf16 %v925_v6, %v919_v0 }
  0x7f   :  { %6805 = vst [vmem:[#allocation48_spill] sm:$0xff] %v5459_v2  ;;  %v932_v17 = vld [vmem:[#allocation9 + $0x378] sm:$0xff]  ;;  %6806 = vst [vmem:[#allocation49_spill] sm:$0xff] %v5465_v20  ;;  %v929_v14 = vld [vmem:[#allocation9 + $0x360] sm:$0xff]  ;;  %v5471_v27 = vpack.c.bf16 %v936_v13, %v930_v12  ;;  %v5477_v38 = vcombine.high %v5461_v19, %v5461_v19 }
  0x80   :  { %6807 = vst [vmem:[#allocation50_spill] sm:$0xff] %v5467_v21  ;;  %v935_v26 = vld [vmem:[#allocation9 + $0x390] sm:$0xff]  ;;  %v5473_v30 = vpack.c.bf16 %v938_v18, %v932_v17  ;;  %v937_v34 = vld [vmem:[#allocation9 + $0x3a0] sm:$0xff]  ;;  %v942_v35 = vld [vmem:[#allocation9 + $0x3c8] sm:$0xff] }
  0x81   :  { %3416 = vmatpush1.bf16.msra.mxu0 %v5403_v56  ;;  %3480 = vmatpush1.bf16.msra.mxu1 %v5405_v57  ;;  %v931_v31 = vld [vmem:[#allocation9 + $0x370] sm:$0xff]  ;;  %v948_v39 = vld [vmem:[#allocation9 + $0x3f8] sm:$0xff]  ;;  %v950_v43 = vld [vmem:[#allocation9 + $0x408] sm:$0xff]  ;;  %v5483_v50 = vpack.c.bf16 %v935_v26, %v929_v14 }
  0x82   :  { %3418 = vmatprep.subr.bf16.mxu0 %v5409_v60  ;;  %3482 = vmatprep.subr.bf16.mxu1 %v5411_v61  ;;  %6808 = vst [vmem:[#allocation51_spill] sm:$0xff] %v5473_v30  ;;  %v944_v42 = vld [vmem:[#allocation9 + $0x3d8] sm:$0xff]  ;;  %v5485_v51 = vpack.c.bf16 %v937_v34, %v931_v31  ;;  %v941_v52 = vld [vmem:[#allocation9 + $0x3c0] sm:$0xff]  ;;  %v947_v53 = vld [vmem:[#allocation9 + $0x3f0] sm:$0xff]  ;;  %v5489_v54 = vpack.c.bf16 %v948_v39, %v942_v35 }
  0x83   :  { %1092 = vmatprep.mubr.f32.mxu0 %v5477_v38  ;;  %1163 = vmatprep.mubr.f32.mxu1 %v5477_v38  ;;  %6809 = vst [vmem:[#allocation52_spill] sm:$0xff] %v5483_v50  ;;  %v5491_v55 = vpack.c.bf16 %v950_v43, %v944_v42  ;;  %v943_v62 = vld [vmem:[#allocation9 + $0x3d0] sm:$0xff]  ;;  %v949_v63 = vld [vmem:[#allocation9 + $0x400] sm:$0xff]  ;;  %v954_v0 = vld [vmem:[#allocation9 + $0x428] sm:$0xff]  ;;  %v5495_v17 = vpack.c.bf16 %v947_v53, %v941_v52 }
  0x84   :  { %6810 = vst [vmem:[#allocation53_spill] sm:$0xff] %v5485_v51  ;;  %v960_v6 = vld [vmem:[#allocation9 + $0x458] sm:$0xff]  ;;  %v962_v13 = vld [vmem:[#allocation9 + $0x468] sm:$0xff]  ;;  %v5497_v18 = vpack.c.bf16 %v949_v63, %v943_v62  ;;  %v953_v14 = vld [vmem:[#allocation9 + $0x420] sm:$0xff] }
  0x85   :  { %3420 = vmatpush1.bf16.msra.mxu0 %v5415_v7  ;;  %3484 = vmatpush1.bf16.msra.mxu1 %v5417_v11  ;;  %6811 = vst [vmem:[#allocation54_spill] sm:$0xff] %v5491_v55  ;;  %v956_v12 = vld [vmem:[#allocation9 + $0x438] sm:$0xff]  ;;  %6812 = vst [vmem:[#allocation55_spill] sm:$0xff] %v5495_v17  ;;  %v959_v26 = vld [vmem:[#allocation9 + $0x450] sm:$0xff]  ;;  %v5501_v31 = vpack.c.bf16 %v960_v6, %v954_v0 }
  0x86   :  { %3422 = vmatprep.subr.bf16.mxu0 %v5421_v15  ;;  %3486 = vmatprep.subr.bf16.mxu1 %v5423_v16  ;;  %6813 = vst [vmem:[#allocation56_spill] sm:$0xff] %v5497_v18  ;;  %v5503_v34 = vpack.c.bf16 %v962_v13, %v956_v12  ;;  %v955_v35 = vld [vmem:[#allocation9 + $0x430] sm:$0xff]  ;;  %v961_v39 = vld [vmem:[#allocation9 + $0x460] sm:$0xff]  ;;  %v966_v42 = vld [vmem:[#allocation9 + $0x488] sm:$0xff]  ;;  %v5507_v52 = vpack.c.bf16 %v959_v26, %v953_v14 }
  0x87   :  { %6814 = vst [vmem:[#allocation57_spill] sm:$0xff] %v5501_v31  ;;  %v972_v43 = vld [vmem:[#allocation9 + $0x4b8] sm:$0xff]  ;;  %v974_v4 = vld [vmem:[#allocation9 + $0x4c8] sm:$0xff]  ;;  %v5509_v53 = vpack.c.bf16 %v961_v39, %v955_v35  ;;  %v965_v62 = vld [vmem:[#allocation9 + $0x480] sm:$0xff] }
  0x88   :  { %6815 = vst [vmem:[#allocation58_spill] sm:$0xff] %v5503_v34  ;;  %v968_v10 = vld [vmem:[#allocation9 + $0x498] sm:$0xff]  ;;  %6816 = vst [vmem:[#allocation59_spill] sm:$0xff] %v5507_v52  ;;  %v971_v63 = vld [vmem:[#allocation9 + $0x4b0] sm:$0xff]  ;;  %v5513_v0 = vpack.c.bf16 %v972_v43, %v966_v42 }
  0x89   :  { %3424 = vmatpush1.bf16.msra.mxu0 %v5427_v24  ;;  %3488 = vmatpush1.bf16.msra.mxu1 %v5429_v5  ;;  %6817 = vst [vmem:[#allocation60_spill] sm:$0xff] %v5509_v53  ;;  %v5515_v6 = vpack.c.bf16 %v974_v4, %v968_v10  ;;  %v967_v12 = vld [vmem:[#allocation9 + $0x490] sm:$0xff]  ;;  %v973_v13 = vld [vmem:[#allocation9 + $0x4c0] sm:$0xff]  ;;  %v5519_v14 = vpack.c.bf16 %v971_v63, %v965_v62 }
  0x8a   :  { %3426 = vmatprep.subr.bf16.mxu0 %v5433_v28  ;;  %3490 = vmatprep.subr.bf16.mxu1 %v5435_v29  ;;  %6818 = vst [vmem:[#allocation61_spill] sm:$0xff] %v5513_v0  ;;  %v5521_v26 = vpack.c.bf16 %v973_v13, %v967_v12  ;;  %v977_v35 = vld [vmem:[#allocation9 + $0x4e0] sm:$0xff]  ;;  %v983_v39 = vld [vmem:[#allocation9 + $0x510] sm:$0xff] }
  0x8b   :  { %6819 = vst [vmem:[#allocation62_spill] sm:$0xff] %v5515_v6  ;;  %6820 = vst [vmem:[#allocation63_spill] sm:$0xff] %v5519_v14  ;;  %v979_v42 = vld [vmem:[#allocation9 + $0x4f0] sm:$0xff]  ;;  %v985_v43 = vld [vmem:[#allocation9 + $0x520] sm:$0xff]  ;;  %v5531_v62 = vpack.c.bf16 %v983_v39, %v977_v35 }
  0x8c   :  { %6821 = vst [vmem:[#allocation64_spill] sm:$0xff] %v5521_v26  ;;  %v5533_v63 = vpack.c.bf16 %v985_v43, %v979_v42  ;;  %v989_v12 = vld [vmem:[#allocation9 + $0x540] sm:$0xff]  ;;  %v995_v13 = vld [vmem:[#allocation9 + $0x570] sm:$0xff] }
  0x8d   :  { %3428 = vmatpush1.bf16.msra.mxu0 %v5439_v40  ;;  %3492 = vmatpush1.bf16.msra.mxu1 %v5441_v41  ;;  %6824 = vst [vmem:[#allocation67_spill] sm:$0xff] %v5531_v62  ;;  %v5543_v35 = vpack.c.bf16 %v995_v13, %v989_v12  ;;  %v1001_v42 = vld [vmem:[#allocation9 + $0x5a0] sm:$0xff]  ;;  %v832_v41 = vld [vmem:[#allocation9 + $0x58] sm:$0xff] }
  0x8e   :  { %3430 = vmatprep.subr.bf16.mxu0 %v5445_v46  ;;  %3494 = vmatprep.subr.bf16.mxu1 %v5447_v47  ;;  %6825 = vst [vmem:[#allocation68_spill] sm:$0xff] %v5533_v63  ;;  %v1004_v47 = vld [vmem:[#allocation9 + $0x5b8] sm:$0xff]  ;;  %v1009_v43 = vld [vmem:[#allocation9 + $0x5e0] sm:$0xff] }
  0x8f   :  { %6828 = vst [vmem:[#allocation71_spill] sm:$0xff] %v5543_v35 }
  0x91   :  { %3432 = vmatpush1.bf16.msra.mxu0 %v5451_v58  ;;  %3496 = vmatpush1.bf16.msra.mxu1 %v5453_v59  ;;  %v1008_v59 = vld [vmem:[#allocation9 + $0x5d8] sm:$0xff] }
  0x92   :  { %3434 = vmatprep.subr.bf16.mxu0 %v5457_v1  ;;  %3498 = vmatprep.subr.bf16.mxu1 %v5459_v2  ;;  %v992_v2 = vld [vmem:[#allocation9 + $0x558] sm:$0xff] }
  0x95   :  { %3436 = vmatpush1.bf16.msra.mxu0 %v5465_v20  ;;  %3500 = vmatpush1.bf16.msra.mxu1 %v5467_v21  ;;  %v996_v21 = vld [vmem:[#allocation9 + $0x578] sm:$0xff] }
  0x96   :  { %3438 = vmatprep.subr.bf16.mxu0 %v5471_v27  ;;  %3502 = vmatprep.subr.bf16.mxu1 %v5473_v30  ;;  %v980_v30 = vld [vmem:[#allocation9 + $0x4f8] sm:$0xff] }
  0x99   :  { %3440 = vmatpush1.bf16.msra.mxu0 %v5483_v50  ;;  %3504 = vmatpush1.bf16.msra.mxu1 %v5485_v51  ;;  %v984_v51 = vld [vmem:[#allocation9 + $0x518] sm:$0xff] }
  0x9a   :  { %3442 = vmatprep.subr.bf16.mxu0 %v5489_v54  ;;  %3506 = vmatprep.subr.bf16.mxu1 %v5491_v55  ;;  %v978_v55 = vld [vmem:[#allocation9 + $0x4e8] sm:$0xff] }
  0x9b   :  { %v5525_v4 = vpack.c.bf16 %v984_v51, %v978_v55  ;;  %v991_v55 = vld [vmem:[#allocation9 + $0x550] sm:$0xff] }
  0x9d   :  { %3444 = vmatpush1.bf16.msra.mxu0 %v5495_v17  ;;  %3508 = vmatpush1.bf16.msra.mxu1 %v5497_v18  ;;  %v986_v18 = vld [vmem:[#allocation9 + $0x528] sm:$0xff]  ;;  %6822 = vst [vmem:[#allocation65_spill] sm:$0xff] %v5525_v4 }
  0x9e   :  { %3446 = vmatprep.subr.bf16.mxu0 %v5501_v31  ;;  %3510 = vmatprep.subr.bf16.mxu1 %v5503_v34  ;;  %v5527_v10 = vpack.c.bf16 %v986_v18, %v980_v30  ;;  %v990_v34 = vld [vmem:[#allocation9 + $0x548] sm:$0xff]  ;;  %v997_v18 = vld [vmem:[#allocation9 + $0x580] sm:$0xff] }
  0x9f   :  { %v5537_v30 = vpack.c.bf16 %v996_v21, %v990_v34  ;;  %v5545_v39 = vpack.c.bf16 %v997_v18, %v991_v55  ;;  %v1007_v34 = vld [vmem:[#allocation9 + $0x5d0] sm:$0xff]  ;;  %v844_v55 = vld [vmem:[#allocation9 + $0xb8] sm:$0xff] }
  0xa0   :  { %6823 = vst [vmem:[#allocation66_spill] sm:$0xff] %v5527_v10  ;;  %v5555_v12 = vpack.c.bf16 %v1007_v34, %v1001_v42  ;;  %v837_v34 = vld [vmem:[#allocation9 + $0x80] sm:$0xff] }
  0xa1   :  { %3448 = vmatpush1.bf16.msra.mxu0 %v5507_v52  ;;  %3512 = vmatpush1.bf16.msra.mxu1 %v5509_v53  ;;  %v998_v53 = vld [vmem:[#allocation9 + $0x588] sm:$0xff]  ;;  %6826 = vst [vmem:[#allocation69_spill] sm:$0xff] %v5537_v30  ;;  %6829 = vst [vmem:[#allocation72_spill] sm:$0xff] %v5545_v39 }
  0xa2   :  { %3450 = vmatprep.subr.bf16.mxu0 %v5513_v0  ;;  %3514 = vmatprep.subr.bf16.mxu1 %v5515_v6  ;;  %v5539_v51 = vpack.c.bf16 %v998_v53, %v992_v2  ;;  %v1002_v6 = vld [vmem:[#allocation9 + $0x5a8] sm:$0xff]  ;;  %v1003_v53 = vld [vmem:[#allocation9 + $0x5b0] sm:$0xff]  ;;  %6832 = vst [vmem:[#allocation75_spill] sm:$0xff] %v5555_v12 }
  0xa3   :  { %v5549_v2 = vpack.c.bf16 %v1008_v59, %v1002_v6  ;;  %v5557_v13 = vpack.c.bf16 %v1009_v43, %v1003_v53  ;;  %v831_v6 = vld [vmem:[#allocation9 + $0x50] sm:$0xff] }
  0xa4   :  { %6827 = vst [vmem:[#allocation70_spill] sm:$0xff] %v5539_v51  ;;  %v843_v53 = vld [vmem:[#allocation9 + $0xb0] sm:$0xff] }
  0xa5   :  { %3452 = vmatpush1.bf16.msra.mxu0 %v5519_v14  ;;  %3516 = vmatpush1.bf16.msra.mxu1 %v5521_v26  ;;  %v1010_v26 = vld [vmem:[#allocation9 + $0x5e8] sm:$0xff]  ;;  %6830 = vst [vmem:[#allocation73_spill] sm:$0xff] %v5549_v2  ;;  %6833 = vst [vmem:[#allocation76_spill] sm:$0xff] %v5557_v13  ;;  %v5574_v43 = vpack.c.bf16 %v843_v53, %v837_v34  ;;  %v867_v53 = vld [vmem:[#allocation9 + $0x170] sm:$0xff] }
  0xa6   :  { %3454 = vmatprep.subr.bf16.mxu0 %v5525_v4  ;;  %3518 = vmatprep.subr.bf16.mxu1 %v5527_v10  ;;  %v5551_v21 = vpack.c.bf16 %v1010_v26, %v1004_v47  ;;  %v826_v10 = vld [vmem:[#allocation9 + $0x28] sm:$0xff]  ;;  %v825_v47 = vld [vmem:[#allocation9 + $0x20] sm:$0xff] }
  0xa7   :  { %v5561_v59 = vpack.c.bf16 %v832_v41, %v826_v10  ;;  %v838_v26 = vld [vmem:[#allocation9 + $0x88] sm:$0xff]  ;;  %v5565_v18 = vpack.c.bf16 %v831_v6, %v825_v47  ;;  %v856_v10 = vld [vmem:[#allocation9 + $0x118] sm:$0xff]  ;;  %v849_v6 = vld [vmem:[#allocation9 + $0xe0] sm:$0xff] }
  0xa8   :  { %6831 = vst [vmem:[#allocation74_spill] sm:$0xff] %v5551_v21  ;;  %v5568_v42 = vpack.c.bf16 %v844_v55, %v838_v26  ;;  %v850_v41 = vld [vmem:[#allocation9 + $0xe8] sm:$0xff]  ;;  %v855_v26 = vld [vmem:[#allocation9 + $0x110] sm:$0xff] }
  0xa9   :  { %3456 = vmatpush1.bf16.msra.mxu0 %v5531_v62  ;;  %3520 = vmatpush1.bf16.msra.mxu1 %v5533_v63  ;;  %6834 = vst [vmem:[#allocation77_spill] sm:$0xff] %v5561_v59  ;;  %v5578_v47 = vpack.c.bf16 %v856_v10, %v850_v41  ;;  %v862_v55 = vld [vmem:[#allocation9 + $0x148] sm:$0xff]  ;;  %v880_v10 = vld [vmem:[#allocation9 + $0x1d8] sm:$0xff] }
  0xaa   :  { %3458 = vmatprep.subr.bf16.mxu0 %v5537_v30  ;;  %3522 = vmatprep.subr.bf16.mxu1 %v5539_v51  ;;  %v874_v41 = vld [vmem:[#allocation9 + $0x1a8] sm:$0xff] }
  0xab   :  { %6835 = vst [vmem:[#allocation78_spill] sm:$0xff] %v5578_v47 }
  0xad   :  { %3460 = vmatpush1.bf16.msra.mxu0 %v5543_v35  ;;  %3524 = vmatpush1.bf16.msra.mxu1 %v5545_v39 }
  0xae   :  { %3462 = vmatprep.subr.bf16.mxu0 %v5549_v2  ;;  %3526 = vmatprep.subr.bf16.mxu1 %v5551_v21 }
  0xb1   :  { %3464 = vmatpush1.bf16.msra.mxu0 %v5555_v12  ;;  %3528 = vmatpush1.bf16.msra.mxu1 %v5557_v13  ;;  %v5583_v13 = vpack.c.bf16 %v855_v26, %v849_v6  ;;  %v5594_v6 = vpack.c.bf16 %v880_v10, %v874_v41  ;;  %v873_v26 = vld [vmem:[#allocation9 + $0x1a0] sm:$0xff]  ;;  %v898_v41 = vld [vmem:[#allocation9 + $0x268] sm:$0xff]  ;;  %v904_v10 = vld [vmem:[#allocation9 + $0x298] sm:$0xff] }
  0xb2   :  { %3530 = vmatprep.subr.bf16.mxu0 %v5561_v59  ;;  %3594 = vmatprep.subr.bf16.mxu1 %v5354_v8  ;;  %v868_v8 = vld [vmem:[#allocation9 + $0x178] sm:$0xff] }
  0xb3   :  { %v5586_v34 = vpack.c.bf16 %v868_v8, %v862_v55  ;;  %6837 = vst [vmem:[#allocation80_spill] sm:$0xff] %v5594_v6  ;;  %v886_v8 = vld [vmem:[#allocation9 + $0x208] sm:$0xff]  ;;  %v892_v55 = vld [vmem:[#allocation9 + $0x238] sm:$0xff] }
  0xb4   :  { %1093 = vmatmul.mubr.f32.vlgmr.msra.gmra.mrb[8].mxu0 %v5461_v19  ;;  %1164 = vmatmul.mubr.f32.vlgmr.msra.gmra.mrb[8].mxu1 %v5461_v19 }
  0xb5   :  { %3532 = vmatpush1.bf16.msra.mxu0 %v5565_v18  ;;  %1234 = vmatprep.mubr.f32.mxu0 %v5477_v38  ;;  %6836 = vst [vmem:[#allocation79_spill] sm:$0xff] %v5586_v34  ;;  %v861_v38 = vld [vmem:[#allocation9 + $0x140] sm:$0xff] }
  0xb6   :  { %3534 = vmatprep.subr.bf16.mxu0 %v5568_v42  ;;  %3596 = vmatpush1.bf16.msra.mxu1 %v5367_v22  ;;  %v5591_v22 = vpack.c.bf16 %v867_v53, %v861_v38  ;;  %v5602_v38 = vpack.c.bf16 %v892_v55, %v886_v8  ;;  %v885_v53 = vld [vmem:[#allocation9 + $0x200] sm:$0xff]  ;;  %v910_v8 = vld [vmem:[#allocation9 + $0x2c8] sm:$0xff]  ;;  %v916_v55 = vld [vmem:[#allocation9 + $0x2f8] sm:$0xff] }
  0xb7   :  { %3598 = vmatprep.subr.bf16.mxu1 %v5371_v25 }
  0xb8   :  { %6838 = vst [vmem:[#allocation81_spill] sm:$0xff] %v5602_v38 }
  0xb9   :  { %3536 = vmatpush1.bf16.msra.mxu0 %v5574_v43 }
  0xba   :  { %3538 = vmatprep.subr.bf16.mxu0 %v5578_v47  ;;  %3600 = vmatpush1.bf16.msra.mxu1 %v5379_v32  ;;  %v879_v47 = vld [vmem:[#allocation9 + $0x1d0] sm:$0xff] }
  0xbb   :  { %3602 = vmatprep.subr.bf16.mxu1 %v5385_v36  ;;  %v5599_v32 = vpack.c.bf16 %v879_v47, %v873_v26  ;;  %v5610_v47 = vpack.c.bf16 %v904_v10, %v898_v41  ;;  %v897_v26 = vld [vmem:[#allocation9 + $0x260] sm:$0xff]  ;;  %v922_v41 = vld [vmem:[#allocation9 + $0x328] sm:$0xff]  ;;  %v928_v10 = vld [vmem:[#allocation9 + $0x358] sm:$0xff] }
  0xbd   :  { %3540 = vmatpush1.bf16.msra.mxu0 %v5583_v13  ;;  %6839 = vst [vmem:[#allocation82_spill] sm:$0xff] %v5610_v47 }
  0xbe   :  { %3542 = vmatprep.subr.bf16.mxu0 %v5586_v34  ;;  %3604 = vmatpush1.bf16.msra.mxu1 %v5391_v44  ;;  %v891_v34 = vld [vmem:[#allocation9 + $0x230] sm:$0xff] }
  0xbf   :  { %3606 = vmatprep.subr.bf16.mxu1 %v5397_v48  ;;  %v5607_v44 = vpack.c.bf16 %v891_v34, %v885_v53  ;;  %v5618_v34 = vpack.c.bf16 %v916_v55, %v910_v8  ;;  %v909_v53 = vld [vmem:[#allocation9 + $0x2c0] sm:$0xff]  ;;  %v934_v8 = vld [vmem:[#allocation9 + $0x388] sm:$0xff]  ;;  %v940_v55 = vld [vmem:[#allocation9 + $0x3b8] sm:$0xff] }
  0xc1   :  { %3544 = vmatpush1.bf16.msra.mxu0 %v5591_v22  ;;  %6840 = vst [vmem:[#allocation83_spill] sm:$0xff] %v5618_v34 }
  0xc2   :  { %3546 = vmatprep.subr.bf16.mxu0 %v5594_v6  ;;  %3608 = vmatpush1.bf16.msra.mxu1 %v5403_v56  ;;  %v903_v6 = vld [vmem:[#allocation9 + $0x290] sm:$0xff] }
  0xc3   :  { %3610 = vmatprep.subr.bf16.mxu1 %v5409_v60  ;;  %v5615_v56 = vpack.c.bf16 %v903_v6, %v897_v26  ;;  %v5626_v6 = vpack.c.bf16 %v928_v10, %v922_v41  ;;  %v921_v26 = vld [vmem:[#allocation9 + $0x320] sm:$0xff]  ;;  %v946_v41 = vld [vmem:[#allocation9 + $0x3e8] sm:$0xff]  ;;  %v952_v10 = vld [vmem:[#allocation9 + $0x418] sm:$0xff] }
  0xc5   :  { %3548 = vmatpush1.bf16.msra.mxu0 %v5599_v32  ;;  %6841 = vst [vmem:[#allocation84_spill] sm:$0xff] %v5626_v6 }
  0xc6   :  { %3550 = vmatprep.subr.bf16.mxu0 %v5602_v38  ;;  %3612 = vmatpush1.bf16.msra.mxu1 %v5415_v7  ;;  %v915_v38 = vld [vmem:[#allocation9 + $0x2f0] sm:$0xff] }
  0xc7   :  { %3614 = vmatprep.subr.bf16.mxu1 %v5421_v15  ;;  %v5623_v7 = vpack.c.bf16 %v915_v38, %v909_v53  ;;  %v5634_v38 = vpack.c.bf16 %v940_v55, %v934_v8  ;;  %v933_v53 = vld [vmem:[#allocation9 + $0x380] sm:$0xff]  ;;  %v958_v8 = vld [vmem:[#allocation9 + $0x448] sm:$0xff]  ;;  %v964_v55 = vld [vmem:[#allocation9 + $0x478] sm:$0xff] }
  0xc9   :  { %3552 = vmatpush1.bf16.msra.mxu0 %v5607_v44  ;;  %6842 = vst [vmem:[#allocation85_spill] sm:$0xff] %v5634_v38 }
  0xca   :  { %3554 = vmatprep.subr.bf16.mxu0 %v5610_v47  ;;  %3616 = vmatpush1.bf16.msra.mxu1 %v5427_v24  ;;  %v927_v47 = vld [vmem:[#allocation9 + $0x350] sm:$0xff] }
  0xcb   :  { %3618 = vmatprep.subr.bf16.mxu1 %v5433_v28  ;;  %v5631_v24 = vpack.c.bf16 %v927_v47, %v921_v26  ;;  %v5642_v47 = vpack.c.bf16 %v952_v10, %v946_v41  ;;  %v945_v26 = vld [vmem:[#allocation9 + $0x3e0] sm:$0xff]  ;;  %v970_v41 = vld [vmem:[#allocation9 + $0x4a8] sm:$0xff]  ;;  %v976_v10 = vld [vmem:[#allocation9 + $0x4d8] sm:$0xff] }
  0xcd   :  { %3556 = vmatpush1.bf16.msra.mxu0 %v5615_v56  ;;  %6843 = vst [vmem:[#allocation86_spill] sm:$0xff] %v5642_v47 }
  0xce   :  { %3558 = vmatprep.subr.bf16.mxu0 %v5618_v34  ;;  %3620 = vmatpush1.bf16.msra.mxu1 %v5439_v40  ;;  %v939_v34 = vld [vmem:[#allocation9 + $0x3b0] sm:$0xff] }
  0xcf   :  { %3622 = vmatprep.subr.bf16.mxu1 %v5445_v46  ;;  %v5639_v40 = vpack.c.bf16 %v939_v34, %v933_v53  ;;  %v5650_v34 = vpack.c.bf16 %v964_v55, %v958_v8  ;;  %v957_v53 = vld [vmem:[#allocation9 + $0x440] sm:$0xff]  ;;  %v982_v8 = vld [vmem:[#allocation9 + $0x508] sm:$0xff]  ;;  %v988_v55 = vld [vmem:[#allocation9 + $0x538] sm:$0xff] }
  0xd1   :  { %3560 = vmatpush1.bf16.msra.mxu0 %v5623_v7  ;;  %6844 = vst [vmem:[#allocation87_spill] sm:$0xff] %v5650_v34 }
  0xd2   :  { %3562 = vmatprep.subr.bf16.mxu0 %v5626_v6  ;;  %3624 = vmatpush1.bf16.msra.mxu1 %v5451_v58  ;;  %v951_v6 = vld [vmem:[#allocation9 + $0x410] sm:$0xff] }
  0xd3   :  { %3626 = vmatprep.subr.bf16.mxu1 %v5457_v1  ;;  %v5647_v58 = vpack.c.bf16 %v951_v6, %v945_v26  ;;  %v5658_v6 = vpack.c.bf16 %v976_v10, %v970_v41  ;;  %v969_v26 = vld [vmem:[#allocation9 + $0x4a0] sm:$0xff]  ;;  %v994_v41 = vld [vmem:[#allocation9 + $0x568] sm:$0xff]  ;;  %v1000_v10 = vld [vmem:[#allocation9 + $0x598] sm:$0xff] }
  0xd5   :  { %3564 = vmatpush1.bf16.msra.mxu0 %v5631_v24  ;;  %6846 = vst [vmem:[#allocation89_spill] sm:$0xff] %v5658_v6 }
  0xd6   :  { %3566 = vmatprep.subr.bf16.mxu0 %v5634_v38  ;;  %3628 = vmatpush1.bf16.msra.mxu1 %v5465_v20  ;;  %v963_v38 = vld [vmem:[#allocation9 + $0x470] sm:$0xff] }
  0xd7   :  { %3630 = vmatprep.subr.bf16.mxu1 %v5471_v27  ;;  %v5655_v20 = vpack.c.bf16 %v963_v38, %v957_v53  ;;  %v5666_v38 = vpack.c.bf16 %v988_v55, %v982_v8  ;;  %v981_v53 = vld [vmem:[#allocation9 + $0x500] sm:$0xff]  ;;  %v1006_v8 = vld [vmem:[#allocation9 + $0x5c8] sm:$0xff]  ;;  %v1012_v55 = vld [vmem:[#allocation9 + $0x5f8] sm:$0xff] }
  0xd9   :  { %3568 = vmatpush1.bf16.msra.mxu0 %v5639_v40  ;;  %6845 = vst [vmem:[#allocation88_spill] sm:$0xff] %v5655_v20  ;;  %6848 = vst [vmem:[#allocation91_spill] sm:$0xff] %v5666_v38 }
  0xda   :  { %3570 = vmatprep.subr.bf16.mxu0 %v5642_v47  ;;  %3632 = vmatpush1.bf16.msra.mxu1 %v5483_v50  ;;  %v975_v47 = vld [vmem:[#allocation9 + $0x4d0] sm:$0xff] }
  0xdb   :  { %3634 = vmatprep.subr.bf16.mxu1 %v5489_v54  ;;  %v5663_v50 = vpack.c.bf16 %v975_v47, %v969_v26  ;;  %v5674_v47 = vpack.c.bf16 %v1000_v10, %v994_v41  ;;  %v993_v26 = vld [vmem:[#allocation9 + $0x560] sm:$0xff] }
  0xdc   :  { %v6857_v10 = vld [vmem:[#allocation48_spill] sm:$0xff] }
  0xdd   :  { %3572 = vmatpush1.bf16.msra.mxu0 %v5647_v58  ;;  %6847 = vst [vmem:[#allocation90_spill] sm:$0xff] %v5663_v50  ;;  %6850 = vst [vmem:[#allocation93_spill] sm:$0xff] %v5674_v47 }
  0xde   :  { %3574 = vmatprep.subr.bf16.mxu0 %v5650_v34  ;;  %3636 = vmatpush1.bf16.msra.mxu1 %v5495_v17  ;;  %v987_v34 = vld [vmem:[#allocation9 + $0x530] sm:$0xff] }
  0xdf   :  { %3638 = vmatprep.subr.bf16.mxu1 %v5501_v31  ;;  %v5671_v17 = vpack.c.bf16 %v987_v34, %v981_v53  ;;  %v5682_v34 = vpack.c.bf16 %v1012_v55, %v1006_v8  ;;  %v1005_v53 = vld [vmem:[#allocation9 + $0x5c0] sm:$0xff]  ;;  %v6860_v55 = vld [vmem:[#allocation53_spill] sm:$0xff] }
  0xe0   :  { %v6859_v8 = vld [vmem:[#allocation51_spill] sm:$0xff] }
  0xe1   :  { %3576 = vmatpush1.bf16.msra.mxu0 %v5655_v20  ;;  %6849 = vst [vmem:[#allocation92_spill] sm:$0xff] %v5671_v17  ;;  %6852 = vst [vmem:[#allocation95_spill] sm:$0xff] %v5682_v34 }
  0xe2   :  { %3578 = vmatprep.subr.bf16.mxu0 %v5658_v6  ;;  %3640 = vmatpush1.bf16.msra.mxu1 %v5507_v52  ;;  %v999_v6 = vld [vmem:[#allocation9 + $0x590] sm:$0xff] }
  0xe3   :  { %3642 = vmatprep.subr.bf16.mxu1 %v5513_v0  ;;  %v5679_v52 = vpack.c.bf16 %v999_v6, %v993_v26  ;;  %v6855_v6 = vld [vmem:[#allocation45_spill] sm:$0xff]  ;;  %v6858_v26 = vld [vmem:[#allocation50_spill] sm:$0xff] }
  0xe5   :  { %3580 = vmatpush1.bf16.msra.mxu0 %v5663_v50  ;;  %6851 = vst [vmem:[#allocation94_spill] sm:$0xff] %v5679_v52 }
  0xe6   :  { %3582 = vmatprep.subr.bf16.mxu0 %v5666_v38  ;;  %3644 = vmatpush1.bf16.msra.mxu1 %v5519_v14  ;;  %v1011_v38 = vld [vmem:[#allocation9 + $0x5f0] sm:$0xff] }
  0xe7   :  { %3646 = vmatprep.subr.bf16.mxu1 %v5525_v4  ;;  %v5687_v41 = vpack.c.bf16 %v1011_v38, %v1005_v53  ;;  %v6856_v38 = vld [vmem:[#allocation47_spill] sm:$0xff]  ;;  %v6861_v53 = vld [vmem:[#allocation54_spill] sm:$0xff] }
  0xe9   :  { %3584 = vmatpush1.bf16.msra.mxu0 %v5671_v17  ;;  %6853 = vst [vmem:[#allocation96_spill] sm:$0xff] %v5687_v41 }
  0xea   :  { %3586 = vmatprep.subr.bf16.mxu0 %v5674_v47  ;;  %3648 = vmatpush1.bf16.msra.mxu1 %v5531_v62 }
  0xeb   :  { %3650 = vmatprep.subr.bf16.mxu1 %v5537_v30 }
  0xed   :  { %3588 = vmatpush1.bf16.msra.mxu0 %v5679_v52 }
  0xee   :  { %3590 = vmatprep.subr.bf16.mxu0 %v5682_v34  ;;  %3652 = vmatpush1.bf16.msra.mxu1 %v5543_v35 }
  0xef   :  { %3654 = vmatprep.subr.bf16.mxu1 %v5549_v2 }
  0xf1   :  { %3592 = vmatpush1.bf16.msra.mxu0 %v5687_v41 }
  0xf2   :  { %3658 = vmatprep.subr.bf16.mxu0 %v5356_v9  ;;  %3656 = vmatpush1.bf16.msra.mxu1 %v5555_v12 }
  0xf3   :  { %3722 = vmatprep.subr.bf16.mxu1 %v5561_v59 }
  0xf4   :  { %1235 = vmatmul.mubr.f32.vlgmr.msra.gmra.mrb[10].mxu0 %v5461_v19  ;;  %v6854_v19 = vld [vmem:[#allocation44_spill] sm:$0xff] }
  0xf5   :  { %3660 = vmatpush1.bf16.msra.mxu0 %v5369_v23 }
  0xf6   :  { %3662 = vmatprep.subr.bf16.mxu0 %v5373_v3 }
  0xf9   :  { %3664 = vmatpush1.bf16.msra.mxu0 %v5381_v33 }
  0xfa   :  { %3666 = vmatprep.subr.bf16.mxu0 %v5387_v37 }
  0xfd   :  { %3668 = vmatpush1.bf16.msra.mxu0 %v5393_v45 }
  0xfe   :  { %3670 = vmatprep.subr.bf16.mxu0 %v5399_v49 }
 0x101   :  { %3672 = vmatpush1.bf16.msra.mxu0 %v5405_v57 }
 0x102   :  { %3674 = vmatprep.subr.bf16.mxu0 %v5411_v61 }
 0x105   :  { %3676 = vmatpush1.bf16.msra.mxu0 %v5417_v11 }
 0x106   :  { %3678 = vmatprep.subr.bf16.mxu0 %v5423_v16  ;;  %v6862_v16 = vld [vmem:[#allocation56_spill] sm:$0xff] }
 0x109   :  { %3680 = vmatpush1.bf16.msra.mxu0 %v5429_v5  ;;  %v6863_v5 = vld [vmem:[#allocation58_spill] sm:$0xff] }
 0x10a   :  { %3682 = vmatprep.subr.bf16.mxu0 %v5435_v29  ;;  %v6864_v29 = vld [vmem:[#allocation60_spill] sm:$0xff] }
 0x10d   :  { %3684 = vmatpush1.bf16.msra.mxu0 %v6854_v19  ;;  %v6865_v19 = vld [vmem:[#allocation62_spill] sm:$0xff] }
 0x10e   :  { %3686 = vmatprep.subr.bf16.mxu0 %v6855_v6  ;;  %v6866_v6 = vld [vmem:[#allocation64_spill] sm:$0xff] }
 0x111   :  { %3688 = vmatpush1.bf16.msra.mxu0 %v6856_v38  ;;  %v6867_v38 = vld [vmem:[#allocation66_spill] sm:$0xff] }
 0x112   :  { %3690 = vmatprep.subr.bf16.mxu0 %v6857_v10  ;;  %v6871_v10 = vld [vmem:[#allocation22_spill] sm:$0xff] }
 0x115   :  { %3692 = vmatpush1.bf16.msra.mxu0 %v6858_v26 }
 0x116   :  { %3694 = vmatprep.subr.bf16.mxu0 %v6859_v8 }
 0x119   :  { %3696 = vmatpush1.bf16.msra.mxu0 %v6860_v55 }
 0x11a   :  { %3698 = vmatprep.subr.bf16.mxu0 %v6861_v53  ;;  %v6868_v53 = vld [vmem:[#allocation76_spill] sm:$0xff] }
 0x11d   :  { %3700 = vmatpush1.bf16.msra.mxu0 %v6862_v16  ;;  %v6869_v16 = vld [vmem:[#allocation23_spill] sm:$0xff] }
 0x11e   :  { %3702 = vmatprep.subr.bf16.mxu0 %v6863_v5  ;;  %v5729_v5 = vld [vmem:[#allocation10] sm:$0x3f] }
 0x121   :  { %3704 = vmatpush1.bf16.msra.mxu0 %v6864_v29  ;;  %v6870_v29 = vld [vmem:[#allocation21_spill] sm:$0xff] }
 0x122   :  { %3706 = vmatprep.subr.bf16.mxu0 %v6865_v19  ;;  %v5732_v19 = vsub.s32 0, %v6870_v29 }
 0x124   :  { %v5741_v49 = vrot.slane %v5729_v5, %v5732_v19 }
 0x125   :  { %3708 = vmatpush1.bf16.msra.mxu0 %v6866_v6  ;;  %v382_v6 = vrot.slane %v5729_v5, 2 }
 0x126   :  { %3710 = vmatprep.subr.bf16.mxu0 %v6867_v38 }
 0x127   :  { %v5744_v45 = vrot.slane %v382_v6, %v5732_v19 }
 0x129   :  { %3712 = vmatpush1.bf16.msra.mxu0 %v5533_v63 }
 0x12a   :  { %3714 = vmatprep.subr.bf16.mxu0 %v5539_v51  ;;  %v420_v51 = vrot.slane %v5729_v5, 4 }
 0x12c   :  { %v5749_v23 = vrot.slane %v420_v51, %v5732_v19 }
 0x12d   :  { %3716 = vmatpush1.bf16.msra.mxu0 %v5545_v39 }
 0x12e   :  { %3718 = vmatprep.subr.bf16.mxu0 %v5551_v21  ;;  %v723_v21 = vrot.slane %v5729_v5, 1 }
 0x131   :  { %3720 = vmatpush1.bf16.msra.mxu0 %v6868_v53 }
 0x132   :  { %3786 = vmatprep.subr.bf16.mxu0 %v6869_v16 }
 0x13f   :  { %v226_v38 = vpop.f32.mrb[0].mxu0  ;;  %v269_v55 = vpop.f32.mrb[0].mxu1 }
 0x140   :  { %v228_v63 = vpop.f32.mrb[1].mxu0  ;;  %v284_v8 = vcombine.high %v269_v55, %v269_v55  ;;  %v3393_v39 = vpop.f32.mrb[1].mxu1  ;;  %v305_v16 = vrot.slane %v269_v55, %v6871_v10 }
 0x141   :  { %v282_v26 = vcombine.low %v226_v38, %v228_v63  ;;  %v283_v53 = vcombine.high %v226_v38, %v228_v63  ;;  %v230_v11 = vpop.f32.mrb[2].mxu0  ;;  %v272_v61 = vpop.f32.mrb[2].mxu1 }
 0x142   :  { %v312_v57 = vrot.slane %v284_v8, %v6871_v10  ;;  %v232_v37 = vpop.f32.mrb[3].mxu0  ;;  %v319_v33 = vcombine.high %v272_v61, %v272_v61  ;;  %v3394_v39 = vpop.f32.mrb[3].mxu1  ;;  %v5752_v8 = vrot.slane %v723_v21, %v5732_v19 }
 0x143   :  { %v291_v3 = vrot.slane %v282_v26, %v6871_v10  ;;  %v298_v63 = vrot.slane %v283_v53, %v6871_v10  ;;  %v317_v38 = vcombine.low %v230_v11, %v232_v37  ;;  %v318_v55 = vcombine.high %v230_v11, %v232_v37 }
 0x144   :  { %v340_v37 = vrot.slane %v272_v61, %v6871_v10  ;;  %v347_v11 = vrot.slane %v319_v33, %v6871_v10 }
 0x145   :  { %v313_v12 = vcombine.low %v291_v3, %v305_v16  ;;  %v314_v9 = vcombine.high %v291_v3, %v305_v16  ;;  %v315_v41 = vcombine.low %v298_v63, %v312_v57  ;;  %v316_v39 = vcombine.high %v298_v63, %v312_v57 }
 0x146   :  { %v326_v26 = vrot.slane %v317_v38, %v6871_v10  ;;  %v333_v53 = vrot.slane %v318_v55, %v6871_v10 }
 0x147   :  { %v366_v51 = vadd.f32 %v5741_v49, %v313_v12  ;;  %v367_v21 = vadd.f32 %v5741_v49, %v314_v9  ;;  %v368_v59 = vadd.f32 %v5741_v49, %v315_v41  ;;  %v369_v6 = vadd.f32 %v5741_v49, %v316_v39  ;;  %v5764_v2 = vpop.f32.mrb[4].mxu0  ;;  %v5766_v3 = vpop.f32.mrb[4].mxu1 }
 0x148   :  { %v388_v57 = vrot.slane %v313_v12, 2  ;;  %v389_v16 = vrot.slane %v314_v9, 2  ;;  %v390_v63 = vrot.slane %v315_v41, 2  ;;  %v391_v38 = vrot.slane %v316_v39, 2  ;;  %v5768_v55 = vpop.f32.mrb[5].mxu0  ;;  %v3399_v61 = vpop.f32.mrb[5].mxu1 }
 0x149   :  { %374 = vst [vmem:[#allocation2] sm:$0x3] %v366_v51  ;;  %375 = vst [vmem:[#allocation2 + $0xc] sm:$0x3] %v367_v21  ;;  %v426_v33 = vrot.slane %v313_v12, 4  ;;  %v427_v35 = vrot.slane %v314_v9, 4  ;;  %v349_v21 = vcombine.high %v326_v26, %v340_v37 }
 0x14a   :  { %376 = vst [vmem:[#allocation2 + $0x18] sm:$0x3] %v368_v59  ;;  %377 = vst [vmem:[#allocation2 + $0x24] sm:$0x3] %v369_v6  ;;  %v428_v34 = vrot.slane %v315_v41, 4  ;;  %v429_v52 = vrot.slane %v316_v39, 4  ;;  %v404_v47 = vadd.f32 %v388_v57, %v5744_v45  ;;  %v405_v17 = vadd.f32 %v389_v16, %v5744_v45 }
 0x14b   :  { %v5770_v30 = vpop.f32.mrb[6].mxu0  ;;  %v5772_v62 = vpop.f32.mrb[6].mxu1  ;;  %v406_v4 = vadd.f32 %v390_v63, %v5744_v45  ;;  %v407_v61 = vadd.f32 %v391_v38, %v5744_v45  ;;  %v442_v12 = vadd.f32 %v426_v33, %v5749_v23  ;;  %v443_v9 = vadd.f32 %v427_v35, %v5749_v23 }
 0x14c   :  { %v5778_v51 = vpop.f32.mrb[7].mxu0  ;;  %v3400_v59 = vpop.f32.mrb[7].mxu1  ;;  %v444_v41 = vadd.f32 %v428_v34, %v5749_v23  ;;  %v445_v6 = vadd.f32 %v429_v52, %v5749_v23  ;;  %412 = vst [vmem:[#allocation2 + $0x4] sm:$0x3] %v404_v47  ;;  %413 = vst [vmem:[#allocation2 + $0x10] sm:$0x3] %v405_v17  ;;  %v348_v39 = vcombine.low %v326_v26, %v340_v37 }
 0x14d   :  { %414 = vst [vmem:[#allocation2 + $0x1c] sm:$0x3] %v406_v4  ;;  %415 = vst [vmem:[#allocation2 + $0x28] sm:$0x3] %v407_v61  ;;  %v350_v57 = vcombine.low %v333_v53, %v347_v11  ;;  %v351_v16 = vcombine.high %v333_v53, %v347_v11  ;;  %v645_v63 = vcombine.low %v5764_v2, %v5768_v55  ;;  %v393_v37 = vrot.slane %v349_v21, 2 }
 0x14e   :  { %450 = vst [vmem:[#allocation2 + $0x8] sm:$0x3] %v442_v12  ;;  %451 = vst [vmem:[#allocation2 + $0x14] sm:$0x3] %v443_v9  ;;  %v646_v35 = vcombine.high %v5764_v2, %v5768_v55  ;;  %v647_v52 = vcombine.high %v5766_v3, %v5766_v3  ;;  %v668_v17 = vrot.slane %v5766_v3, %v6871_v10  ;;  %v392_v53 = vrot.slane %v348_v39, 2 }
 0x14f   :  { %452 = vst [vmem:[#allocation2 + $0x20] sm:$0x3] %v444_v41  ;;  %453 = vst [vmem:[#allocation2 + $0x2c] sm:$0x3] %v445_v6  ;;  %v370_v4 = vadd.f32 %v5741_v49, %v348_v39  ;;  %v371_v47 = vadd.f32 %v5741_v49, %v349_v21  ;;  %v372_v34 = vadd.f32 %v5741_v49, %v350_v57  ;;  %v394_v11 = vrot.slane %v350_v57, 2 }
 0x150   :  { %v373_v26 = vadd.f32 %v5741_v49, %v351_v16  ;;  %v395_v38 = vrot.slane %v351_v16, 2  ;;  %v430_v2 = vrot.slane %v348_v39, 4  ;;  %v431_v55 = vrot.slane %v349_v21, 4 }
 0x151   :  { %378 = vst [vmem:[#allocation2 + $0x30] sm:$0x3] %v370_v4  ;;  %379 = vst [vmem:[#allocation2 + $0x3c] sm:$0x3] %v371_v47  ;;  %v432_v33 = vrot.slane %v350_v57, 4  ;;  %v433_v3 = vrot.slane %v351_v16, 4  ;;  %v408_v61 = vadd.f32 %v392_v53, %v5744_v45  ;;  %v409_v59 = vadd.f32 %v393_v37, %v5744_v45 }
 0x152   :  { %380 = vst [vmem:[#allocation2 + $0x48] sm:$0x3] %v372_v34  ;;  %381 = vst [vmem:[#allocation2 + $0x54] sm:$0x3] %v373_v26  ;;  %v410_v12 = vadd.f32 %v394_v11, %v5744_v45  ;;  %v411_v49 = vadd.f32 %v395_v38, %v5744_v45  ;;  %v446_v9 = vadd.f32 %v430_v2, %v5749_v23  ;;  %v6873_v47 = vrot.slane %v5729_v5, 5 }
 0x153   :  { %v447_v41 = vadd.f32 %v431_v55, %v5749_v23  ;;  %v448_v6 = vadd.f32 %v432_v33, %v5749_v23  ;;  %v449_v4 = vadd.f32 %v433_v3, %v5749_v23  ;;  %416 = vst [vmem:[#allocation2 + $0x34] sm:$0x3] %v408_v61  ;;  %417 = vst [vmem:[#allocation2 + $0x40] sm:$0x3] %v409_v59  ;;  %v6872_v23 = vrot.slane %v5729_v5, 3 }
 0x154   :  { %418 = vst [vmem:[#allocation2 + $0x4c] sm:$0x3] %v410_v12  ;;  %419 = vst [vmem:[#allocation2 + $0x58] sm:$0x3] %v411_v49  ;;  %v654_v39 = vrot.slane %v645_v63, %v6871_v10  ;;  %v661_v21 = vrot.slane %v646_v35, %v6871_v10  ;;  %v675_v57 = vrot.slane %v647_v52, %v6871_v10 }
 0x155   :  { %v680_v45 = vcombine.low %v5770_v30, %v5778_v51  ;;  %454 = vst [vmem:[#allocation2 + $0x38] sm:$0x3] %v446_v9  ;;  %455 = vst [vmem:[#allocation2 + $0x44] sm:$0x3] %v447_v41  ;;  %v5812_v16 = vrot.slane %v6872_v23, %v5732_v19  ;;  %v5817_v63 = vrot.slane %v6873_v47, %v5732_v19 }
 0x156   :  { %456 = vst [vmem:[#allocation2 + $0x50] sm:$0x3] %v448_v6  ;;  %457 = vst [vmem:[#allocation2 + $0x5c] sm:$0x3] %v449_v4  ;;  %v681_v35 = vcombine.high %v5770_v30, %v5778_v51  ;;  %v682_v52 = vcombine.high %v5772_v62, %v5772_v62  ;;  %v676_v34 = vcombine.low %v654_v39, %v668_v17 }
 0x157   :  { %v677_v26 = vcombine.high %v654_v39, %v668_v17  ;;  %v678_v53 = vcombine.low %v661_v21, %v675_v57  ;;  %v679_v37 = vcombine.high %v661_v21, %v675_v57  ;;  %v689_v11 = vrot.slane %v680_v45, %v6871_v10 }
 0x158   :  { %v696_v38 = vrot.slane %v681_v35, %v6871_v10  ;;  %v703_v2 = vrot.slane %v5772_v62, %v6871_v10  ;;  %v710_v5 = vrot.slane %v682_v52, %v6871_v10  ;;  %v729_v55 = vadd.f32 %v5752_v8, %v676_v34 }
 0x159   :  { %v730_v30 = vadd.f32 %v5752_v8, %v677_v26  ;;  %v731_v51 = vadd.f32 %v5752_v8, %v678_v53  ;;  %v732_v33 = vadd.f32 %v5752_v8, %v679_v37  ;;  %v751_v17 = vrot.slane %v676_v34, 2 }
 0x15a   :  { %v752_v3 = vrot.slane %v677_v26, 2  ;;  %v753_v61 = vrot.slane %v678_v53, 2  ;;  %v754_v59 = vrot.slane %v679_v37, 2  ;;  %737 = vst [vmem:[#allocation2 + $0x2] sm:$0x3] %v729_v55  ;;  %v789_v12 = vrot.slane %v676_v34, 4 }
 0x15b   :  { %738 = vst [vmem:[#allocation2 + $0xe] sm:$0x3] %v730_v30  ;;  %739 = vst [vmem:[#allocation2 + $0x1a] sm:$0x3] %v731_v51  ;;  %v790_v62 = vrot.slane %v677_v26, 4  ;;  %v791_v49 = vrot.slane %v678_v53, 4  ;;  %v767_v41 = vadd.f32 %v751_v17, %v5812_v16  ;;  %v711_v47 = vcombine.low %v689_v11, %v703_v2 }
 0x15c   :  { %740 = vst [vmem:[#allocation2 + $0x26] sm:$0x3] %v732_v33  ;;  %v792_v9 = vrot.slane %v679_v37, 4  ;;  %v768_v6 = vadd.f32 %v752_v3, %v5812_v16  ;;  %v769_v4 = vadd.f32 %v753_v61, %v5812_v16  ;;  %v770_v39 = vadd.f32 %v754_v59, %v5812_v16 }
 0x15d   :  { %v805_v21 = vadd.f32 %v789_v12, %v5817_v63  ;;  %v806_v57 = vadd.f32 %v790_v62, %v5817_v63  ;;  %v807_v45 = vadd.f32 %v791_v49, %v5817_v63  ;;  %775 = vst [vmem:[#allocation2 + $0x6] sm:$0x3] %v767_v41  ;;  %v712_v35 = vcombine.high %v689_v11, %v703_v2 }
 0x15e   :  { %v808_v23 = vadd.f32 %v792_v9, %v5817_v63  ;;  %776 = vst [vmem:[#allocation2 + $0x12] sm:$0x3] %v768_v6  ;;  %777 = vst [vmem:[#allocation2 + $0x1e] sm:$0x3] %v769_v4  ;;  %v713_v52 = vcombine.low %v696_v38, %v710_v5  ;;  %v714_v34 = vcombine.high %v696_v38, %v710_v5  ;;  %v755_v30 = vrot.slane %v711_v47, 2 }
 0x15f   :  { %778 = vst [vmem:[#allocation2 + $0x2a] sm:$0x3] %v770_v39  ;;  %813 = vst [vmem:[#allocation2 + $0xa] sm:$0x3] %v805_v21  ;;  %v733_v26 = vadd.f32 %v5752_v8, %v711_v47  ;;  %v734_v53 = vadd.f32 %v5752_v8, %v712_v35  ;;  %v756_v51 = vrot.slane %v712_v35, 2  ;;  %v793_v11 = vrot.slane %v711_v47, 4 }
 0x160   :  { %814 = vst [vmem:[#allocation2 + $0x16] sm:$0x3] %v806_v57  ;;  %815 = vst [vmem:[#allocation2 + $0x22] sm:$0x3] %v807_v45  ;;  %v735_v37 = vadd.f32 %v5752_v8, %v713_v52  ;;  %v736_v55 = vadd.f32 %v5752_v8, %v714_v34  ;;  %v757_v33 = vrot.slane %v713_v52, 2  ;;  %v758_v17 = vrot.slane %v714_v34, 2 }
 0x161   :  { %816 = vst [vmem:[#allocation2 + $0x2e] sm:$0x3] %v808_v23  ;;  %741 = vst [vmem:[#allocation2 + $0x32] sm:$0x3] %v733_v26  ;;  %v794_v38 = vrot.slane %v712_v35, 4  ;;  %v795_v2 = vrot.slane %v713_v52, 4  ;;  %v771_v3 = vadd.f32 %v755_v30, %v5812_v16  ;;  %v772_v61 = vadd.f32 %v756_v51, %v5812_v16 }
 0x162   :  { %742 = vst [vmem:[#allocation2 + $0x3e] sm:$0x3] %v734_v53  ;;  %743 = vst [vmem:[#allocation2 + $0x4a] sm:$0x3] %v735_v37  ;;  %v796_v5 = vrot.slane %v714_v34, 4  ;;  %v773_v59 = vadd.f32 %v757_v33, %v5812_v16  ;;  %v774_v8 = vadd.f32 %v758_v17, %v5812_v16  ;;  %v809_v12 = vadd.f32 %v793_v11, %v5817_v63 }
 0x163   :  { %744 = vst [vmem:[#allocation2 + $0x56] sm:$0x3] %v736_v55  ;;  %v810_v62 = vadd.f32 %v794_v38, %v5817_v63  ;;  %v811_v49 = vadd.f32 %v795_v2, %v5817_v63  ;;  %779 = vst [vmem:[#allocation2 + $0x36] sm:$0x3] %v771_v3  ;;  %v1013_v37 = vld [vmem:[#allocation12] sm:$0x3] }
 0x164   :  { %v812_v9 = vadd.f32 %v796_v5, %v5817_v63  ;;  %780 = vst [vmem:[#allocation2 + $0x42] sm:$0x3] %v772_v61  ;;  %781 = vst [vmem:[#allocation2 + $0x4e] sm:$0x3] %v773_v59  ;;  %v1015_v45 = vld [vmem:[#allocation2] sm:$0xff]  ;;  %v1287_v55 = vsub.s32 1, %v6870_v29  ;;  %v5856_v30 = vrot.slane %v1013_v37, %v5732_v19 }
 0x165   :  { %782 = vst [vmem:[#allocation2 + $0x5a] sm:$0x3] %v774_v8  ;;  %817 = vst [vmem:[#allocation2 + $0x3a] sm:$0x3] %v809_v12  ;;  %v1260_v35 = vrot.slane %v1015_v45, 4 }
 0x166   :  { %818 = vst [vmem:[#allocation2 + $0x46] sm:$0x3] %v810_v62  ;;  %819 = vst [vmem:[#allocation2 + $0x52] sm:$0x3] %v811_v49  ;;  %v5858_v51 = vrot.slane %v1013_v37, %v1287_v55  ;;  %v1016_v8 = vld [vmem:[#allocation2 + $0x8] sm:$0xf] }
 0x167   :  { %820 = vst [vmem:[#allocation2 + $0x5e] sm:$0x3] %v812_v9  ;;  %v6885_v37 = vld [vmem:[#allocation83_spill] sm:$0xff] }
 0x168   :  { %v6886_v55 = vld [vmem:[#allocation43_spill] sm:$0xff] }
 0x187   :  { %v1094_v41 = vpop.f32.mrb[8].mxu0  ;;  %v1165_v6 = vpop.f32.mrb[8].mxu1 }
 0x188   :  { %v1096_v4 = vpop.f32.mrb[9].mxu0  ;;  %v1167_v16 = vpop.f32.mrb[9].mxu1 }
 0x189   :  { %v1243_v39 = vcombine.low %v1094_v41, %v1096_v4  ;;  %v1264_v21 = vcombine.low %v1165_v6, %v1167_v16  ;;  %v5039_v41 = vld [vmem:[#allocation3] sm:$0xf] }
 0x18b   :  { %v1250_v57 = vrot.slane %v1243_v39, %v6871_v10  ;;  %v1271_v63 = vrot.slane %v1264_v21, %v6871_v10  ;;  %v6874_v21 = vld [vmem:[#allocation25_spill] sm:$0xff] }
 0x18d   :  { %v1252_v23 = vadd.f32 %v1250_v57, %v1015_v45  ;;  %v1273_v52 = vadd.f32 %v1271_v63, %v1260_v35  ;;  %v6875_v57 = vld [vmem:[#allocation78_spill] sm:$0xff]  ;;  %v6876_v45 = vld [vmem:[#allocation28_spill] sm:$0xff] }
 0x18e   :  { %v6879_v63 = vld [vmem:[#allocation80_spill] sm:$0xff]  ;;  %v6880_v35 = vld [vmem:[#allocation34_spill] sm:$0xff] }
 0x18f   :  { %v3369_v47 = vmul.f32 -1.442695, %v1252_v23  ;;  %v3370_v34 = vmul.f32 -1.442695, %v1273_v52  ;;  %v6877_v23 = vld [vmem:[#allocation79_spill] sm:$0xff]  ;;  %v6881_v52 = vld [vmem:[#allocation81_spill] sm:$0xff] }
 0x191   :  { %4959 = vpow2.f32 %v3369_v47  ;;  %v6878_v47 = vld [vmem:[#allocation31_spill] sm:$0xff] }
 0x192   :  { %4961 = vpow2.f32 %v3370_v34  ;;  %v6882_v34 = vld [vmem:[#allocation37_spill] sm:$0xff] }
 0x19b   :  { %v4960_v26 = vpop.eup %4959 }
 0x19c   :  { %v1256_v53 = vadd.f32 1.0, %v4960_v26  ;;  %v4962_v17 = vpop.eup %4961  ;;  %v6883_v26 = vld [vmem:[#allocation82_spill] sm:$0xff] }
 0x19d   :  { %v1277_v5 = vadd.f32 1.0, %v4962_v17  ;;  %v6888_v17 = vld [vmem:[#allocation46_spill] sm:$0xff] }
 0x19e   :  { %4963 = vrcp.f32 %v1256_v53  ;;  %v6884_v53 = vld [vmem:[#allocation40_spill] sm:$0xff] }
 0x19f   :  { %4965 = vrcp.f32 %v1277_v5  ;;  %v6892_v5 = vld [vmem:[#allocation52_spill] sm:$0xff] }
 0x1a8   :  { %v4964_v59 = vpop.eup %4963 }
 0x1a9   :  { %v4966_v19 = vpop.eup %4965 }
 0x1aa   :  { %v1307_v62 = vsub.f32 1.0, %v4966_v19  ;;  %v1309_v6 = vmul.f32 %v5039_v41, %v4966_v19  ;;  %v6899_v19 = vld [vmem:[#allocation92_spill] sm:$0xff]  ;;  %v6903_v41 = vld [vmem:[#allocation94_spill] sm:$0xff] }
 0x1c7   :  { %v1236_v33 = vpop.f32.mrb[10].mxu0 }
 0x1c8   :  { %v1291_v11 = vadd.f32 %v5856_v30, %v1236_v33  ;;  %v1238_v38 = vpop.f32.mrb[11].mxu0  ;;  %v6887_v33 = vld [vmem:[#allocation84_spill] sm:$0xff] }
 0x1c9   :  { %v1292_v2 = vadd.f32 %v5858_v51, %v1238_v38  ;;  %v6890_v38 = vld [vmem:[#allocation49_spill] sm:$0xff] }
 0x1cb   :  { %v1295_v3 = vcombine.low %v1291_v11, %v1292_v2  ;;  %v6889_v11 = vld [vmem:[#allocation85_spill] sm:$0xff]  ;;  %v6891_v2 = vld [vmem:[#allocation86_spill] sm:$0xff] }
 0x1cd   :  { %v1302_v61 = vrot.slane %v1295_v3, %v6871_v10  ;;  %v6893_v3 = vld [vmem:[#allocation87_spill] sm:$0xff] }
 0x1cf   :  { %v1304_v29 = vmul.f32 %v4964_v59, %v1302_v61  ;;  %v6894_v61 = vld [vmem:[#allocation55_spill] sm:$0xff]  ;;  %v6895_v59 = vld [vmem:[#allocation89_spill] sm:$0xff] }
 0x1d1   :  { %v1305_v12 = vadd.f32 %v1304_v29, %v1016_v8  ;;  %v6896_v29 = vld [vmem:[#allocation59_spill] sm:$0xff] }
 0x1d2   :  { %v6897_v8 = vld [vmem:[#allocation91_spill] sm:$0xff] }
 0x1d3   :  { %4967 = vtanh.f32 %v1305_v12  ;;  %v6898_v12 = vld [vmem:[#allocation65_spill] sm:$0xff] }
 0x1dd   :  { %v4968_v49 = vpop.eup %4967 }
 0x1de   :  { %v1308_v9 = vmul.f32 %v4968_v49, %v1307_v62  ;;  %v6900_v62 = vld [vmem:[#allocation93_spill] sm:$0xff]  ;;  %v6901_v49 = vld [vmem:[#allocation67_spill] sm:$0xff] }
 0x1e0   :  { %v5863_v4 = vadd.f32 %v1309_v6, %v1308_v9  ;;  %v6902_v9 = vld [vmem:[#allocation69_spill] sm:$0xff]  ;;  %v6904_v6 = vld [vmem:[#allocation95_spill] sm:$0xff] }
 0x1e2   :  { %1311 = vst [vmem:[#allocation13] sm:$0xf] %v5863_v4  ;;  %v5868_v16 = vrot.slane %v5863_v4, %v6871_v10 }
 0x1e4   :  { %v1323_v39 = vcombine.high %v5868_v16, %v5868_v16 }
 0x1e6   :  { %1390 = vmatprep.mubr.f32.mxu1 %v1323_v39  ;;  %1461 = vmatprep.mubr.f32.mxu0 %v1323_v39 }
 0x1e7   :  { %1391 = vmatmul.mubr.f32.vlgmr.msra.gmra.mrb[10].mxu1 %v5868_v16  ;;  %1462 = vmatmul.mubr.f32.vlgmr.msra.gmra.mrb[12].mxu0 %v5868_v16 }
 0x1e8   :  { %3724 = vmatpush1.bf16.msra.mxu1 %v5565_v18  ;;  %1532 = vmatprep.mubr.f32.mxu1 %v1323_v39  ;;  %v6905_v39 = vld [vmem:[#allocation71_spill] sm:$0xff] }
 0x1e9   :  { %3726 = vmatprep.subr.bf16.mxu1 %v5568_v42  ;;  %3788 = vmatpush1.bf16.msra.mxu0 %v6874_v21 }
 0x1ea   :  { %3790 = vmatprep.subr.bf16.mxu0 %v5371_v25 }
 0x1ec   :  { %3728 = vmatpush1.bf16.msra.mxu1 %v5574_v43 }
 0x1ed   :  { %3730 = vmatprep.subr.bf16.mxu1 %v6875_v57  ;;  %3792 = vmatpush1.bf16.msra.mxu0 %v6876_v45 }
 0x1ee   :  { %3794 = vmatprep.subr.bf16.mxu0 %v5385_v36 }
 0x1f0   :  { %3732 = vmatpush1.bf16.msra.mxu1 %v5583_v13 }
 0x1f1   :  { %3734 = vmatprep.subr.bf16.mxu1 %v6877_v23  ;;  %3796 = vmatpush1.bf16.msra.mxu0 %v6878_v47 }
 0x1f2   :  { %3798 = vmatprep.subr.bf16.mxu0 %v5397_v48 }
 0x1f4   :  { %3736 = vmatpush1.bf16.msra.mxu1 %v5591_v22 }
 0x1f5   :  { %3738 = vmatprep.subr.bf16.mxu1 %v6879_v63  ;;  %3800 = vmatpush1.bf16.msra.mxu0 %v6880_v35 }
 0x1f6   :  { %3802 = vmatprep.subr.bf16.mxu0 %v5409_v60 }
 0x1f8   :  { %3740 = vmatpush1.bf16.msra.mxu1 %v5599_v32 }
 0x1f9   :  { %3742 = vmatprep.subr.bf16.mxu1 %v6881_v52  ;;  %3804 = vmatpush1.bf16.msra.mxu0 %v6882_v34 }
 0x1fa   :  { %3806 = vmatprep.subr.bf16.mxu0 %v5421_v15 }
 0x1fc   :  { %3744 = vmatpush1.bf16.msra.mxu1 %v5607_v44 }
 0x1fd   :  { %3746 = vmatprep.subr.bf16.mxu1 %v6883_v26  ;;  %3808 = vmatpush1.bf16.msra.mxu0 %v6884_v53 }
 0x1fe   :  { %3810 = vmatprep.subr.bf16.mxu0 %v5433_v28 }
 0x200   :  { %3748 = vmatpush1.bf16.msra.mxu1 %v5615_v56 }
 0x201   :  { %3750 = vmatprep.subr.bf16.mxu1 %v6885_v37  ;;  %3812 = vmatpush1.bf16.msra.mxu0 %v6886_v55 }
 0x202   :  { %3814 = vmatprep.subr.bf16.mxu0 %v5445_v46 }
 0x204   :  { %3752 = vmatpush1.bf16.msra.mxu1 %v5623_v7 }
 0x205   :  { %3754 = vmatprep.subr.bf16.mxu1 %v6887_v33  ;;  %3816 = vmatpush1.bf16.msra.mxu0 %v6888_v17 }
 0x206   :  { %3818 = vmatprep.subr.bf16.mxu0 %v5457_v1 }
 0x208   :  { %3756 = vmatpush1.bf16.msra.mxu1 %v5631_v24 }
 0x209   :  { %3758 = vmatprep.subr.bf16.mxu1 %v6889_v11  ;;  %3820 = vmatpush1.bf16.msra.mxu0 %v6890_v38 }
 0x20a   :  { %3822 = vmatprep.subr.bf16.mxu0 %v5471_v27 }
 0x20c   :  { %3760 = vmatpush1.bf16.msra.mxu1 %v5639_v40 }
 0x20d   :  { %3762 = vmatprep.subr.bf16.mxu1 %v6891_v2  ;;  %3824 = vmatpush1.bf16.msra.mxu0 %v6892_v5 }
 0x20e   :  { %3826 = vmatprep.subr.bf16.mxu0 %v5489_v54 }
 0x210   :  { %3764 = vmatpush1.bf16.msra.mxu1 %v5647_v58 }
 0x211   :  { %3766 = vmatprep.subr.bf16.mxu1 %v6893_v3  ;;  %3828 = vmatpush1.bf16.msra.mxu0 %v6894_v61 }
 0x212   :  { %3830 = vmatprep.subr.bf16.mxu0 %v5501_v31 }
 0x214   :  { %3768 = vmatpush1.bf16.msra.mxu1 %v5655_v20 }
 0x215   :  { %3770 = vmatprep.subr.bf16.mxu1 %v6895_v59  ;;  %3832 = vmatpush1.bf16.msra.mxu0 %v6896_v29  ;;  %v1313_v29 = vld [vmem:[#allocation2 + $0xc] sm:$0xff] }
 0x216   :  { %3834 = vmatprep.subr.bf16.mxu0 %v5513_v0 }
 0x218   :  { %3772 = vmatpush1.bf16.msra.mxu1 %v5663_v50  ;;  %v6906_v50 = vld [vmem:[#allocation73_spill] sm:$0xff] }
 0x219   :  { %3774 = vmatprep.subr.bf16.mxu1 %v6897_v8  ;;  %3836 = vmatpush1.bf16.msra.mxu0 %v5519_v14  ;;  %v6907_v8 = vld [vmem:[#allocation96_spill] sm:$0xff] }
 0x21a   :  { %3838 = vmatprep.subr.bf16.mxu0 %v6898_v12  ;;  %v6908_v14 = vld [vmem:[#allocation24_spill] sm:$0xff]  ;;  %v6909_v12 = vld [vmem:[#allocation75_spill] sm:$0xff] }
 0x21c   :  { %3776 = vmatpush1.bf16.msra.mxu1 %v6899_v19  ;;  %v6910_v19 = vld [vmem:[#allocation77_spill] sm:$0xff] }
 0x21d   :  { %3778 = vmatprep.subr.bf16.mxu1 %v6900_v62  ;;  %3840 = vmatpush1.bf16.msra.mxu0 %v6901_v49  ;;  %v6911_v49 = vld [vmem:[#allocation26_spill] sm:$0xff] }
 0x21e   :  { %3842 = vmatprep.subr.bf16.mxu0 %v6902_v9  ;;  %v6912_v9 = vld [vmem:[#allocation27_spill] sm:$0xff] }
 0x220   :  { %3780 = vmatpush1.bf16.msra.mxu1 %v6903_v41  ;;  %v6913_v41 = vld [vmem:[#allocation29_spill] sm:$0xff] }
 0x221   :  { %3782 = vmatprep.subr.bf16.mxu1 %v6904_v6  ;;  %3844 = vmatpush1.bf16.msra.mxu0 %v6905_v39  ;;  %v6914_v6 = vld [vmem:[#allocation30_spill] sm:$0xff]  ;;  %v6915_v39 = vld [vmem:[#allocation32_spill] sm:$0xff] }
 0x222   :  { %3846 = vmatprep.subr.bf16.mxu0 %v6906_v50  ;;  %v6916_v50 = vld [vmem:[#allocation33_spill] sm:$0xff] }
 0x224   :  { %3784 = vmatpush1.bf16.msra.mxu1 %v6907_v8  ;;  %v6917_v8 = vld [vmem:[#allocation35_spill] sm:$0xff] }
 0x225   :  { %3850 = vmatprep.subr.bf16.mxu1 %v6908_v14  ;;  %3848 = vmatpush1.bf16.msra.mxu0 %v6909_v12  ;;  %v6918_v14 = vld [vmem:[#allocation36_spill] sm:$0xff]  ;;  %v6919_v12 = vld [vmem:[#allocation38_spill] sm:$0xff] }
 0x226   :  { %3914 = vmatprep.subr.bf16.mxu0 %v6910_v19  ;;  %v6920_v19 = vld [vmem:[#allocation39_spill] sm:$0xff] }
 0x227   :  { %1533 = vmatmul.mubr.f32.vlgmr.msra.gmra.mrb[12].mxu1 %v5868_v16  ;;  %v6921_v16 = vld [vmem:[#allocation41_spill] sm:$0xff] }
 0x228   :  { %3852 = vmatpush1.bf16.msra.mxu1 %v6911_v49  ;;  %v6922_v49 = vld [vmem:[#allocation42_spill] sm:$0xff] }
 0x229   :  { %3854 = vmatprep.subr.bf16.mxu1 %v6912_v9  ;;  %v6923_v9 = vld [vmem:[#allocation44_spill] sm:$0xff] }
 0x22c   :  { %3856 = vmatpush1.bf16.msra.mxu1 %v6913_v41  ;;  %v6924_v41 = vld [vmem:[#allocation45_spill] sm:$0xff] }
 0x22d   :  { %3858 = vmatprep.subr.bf16.mxu1 %v6914_v6  ;;  %v6925_v6 = vld [vmem:[#allocation47_spill] sm:$0xff] }
 0x230   :  { %3860 = vmatpush1.bf16.msra.mxu1 %v6915_v39  ;;  %v6926_v39 = vld [vmem:[#allocation48_spill] sm:$0xff] }
 0x231   :  { %3862 = vmatprep.subr.bf16.mxu1 %v6916_v50  ;;  %v6927_v50 = vld [vmem:[#allocation50_spill] sm:$0xff] }
 0x234   :  { %3864 = vmatpush1.bf16.msra.mxu1 %v6917_v8  ;;  %v6928_v8 = vld [vmem:[#allocation51_spill] sm:$0xff] }
 0x235   :  { %3866 = vmatprep.subr.bf16.mxu1 %v6918_v14  ;;  %v6929_v14 = vld [vmem:[#allocation53_spill] sm:$0xff] }
 0x238   :  { %3868 = vmatpush1.bf16.msra.mxu1 %v6919_v12  ;;  %v6930_v12 = vld [vmem:[#allocation54_spill] sm:$0xff] }
 0x239   :  { %3870 = vmatprep.subr.bf16.mxu1 %v6920_v19  ;;  %v6931_v19 = vld [vmem:[#allocation56_spill] sm:$0xff] }
 0x23c   :  { %3872 = vmatpush1.bf16.msra.mxu1 %v6921_v16  ;;  %v6932_v16 = vld [vmem:[#allocation58_spill] sm:$0xff] }
 0x23d   :  { %3874 = vmatprep.subr.bf16.mxu1 %v6922_v49  ;;  %v6933_v49 = vld [vmem:[#allocation60_spill] sm:$0xff] }
 0x240   :  { %3876 = vmatpush1.bf16.msra.mxu1 %v6923_v9  ;;  %v6934_v9 = vld [vmem:[#allocation62_spill] sm:$0xff] }
 0x241   :  { %3878 = vmatprep.subr.bf16.mxu1 %v6924_v41  ;;  %v6935_v41 = vld [vmem:[#allocation64_spill] sm:$0xff] }
 0x244   :  { %3880 = vmatpush1.bf16.msra.mxu1 %v6925_v6  ;;  %v6936_v6 = vld [vmem:[#allocation66_spill] sm:$0xff] }
 0x245   :  { %3882 = vmatprep.subr.bf16.mxu1 %v6926_v39  ;;  %v6937_v39 = vld [vmem:[#allocation68_spill] sm:$0xff] }
 0x248   :  { %3884 = vmatpush1.bf16.msra.mxu1 %v6927_v50  ;;  %v6938_v50 = vld [vmem:[#allocation70_spill] sm:$0xff] }
 0x249   :  { %3886 = vmatprep.subr.bf16.mxu1 %v6928_v8  ;;  %v6939_v8 = vld [vmem:[#allocation72_spill] sm:$0xff] }
 0x24c   :  { %3888 = vmatpush1.bf16.msra.mxu1 %v6929_v14  ;;  %v6940_v14 = vld [vmem:[#allocation74_spill] sm:$0xff] }
 0x24d   :  { %3890 = vmatprep.subr.bf16.mxu1 %v6930_v12  ;;  %v6941_v12 = vld [vmem:[#allocation76_spill] sm:$0xff] }
 0x250   :  { %3892 = vmatpush1.bf16.msra.mxu1 %v6931_v19  ;;  %v6942_v19 = vld [vmem:[#allocation23_spill] sm:$0xff] }
 0x251   :  { %3894 = vmatprep.subr.bf16.mxu1 %v6932_v16 }
 0x254   :  { %3896 = vmatpush1.bf16.msra.mxu1 %v6933_v49 }
 0x255   :  { %3898 = vmatprep.subr.bf16.mxu1 %v6934_v9 }
 0x258   :  { %3900 = vmatpush1.bf16.msra.mxu1 %v6935_v41 }
 0x259   :  { %3902 = vmatprep.subr.bf16.mxu1 %v6936_v6 }
 0x25c   :  { %3904 = vmatpush1.bf16.msra.mxu1 %v6937_v39 }
 0x25d   :  { %3906 = vmatprep.subr.bf16.mxu1 %v6938_v50 }
 0x260   :  { %3908 = vmatpush1.bf16.msra.mxu1 %v6939_v8  ;;  %v1558_v8 = vrot.slane %v1313_v29, 4 }
 0x261   :  { %3910 = vmatprep.subr.bf16.mxu1 %v6940_v14 }
 0x264   :  { %3912 = vmatpush1.bf16.msra.mxu1 %v6941_v12 }
 0x265   :  { %3978 = vmatprep.subr.bf16.mxu1 %v6942_v19 }
 0x2ba   :  { %v1392_v16 = vpop.f32.mrb[10].mxu1  ;;  %v1463_v49 = vpop.f32.mrb[12].mxu0 }
 0x2bb   :  { %v1394_v62 = vpop.f32.mrb[11].mxu1  ;;  %v1465_v9 = vpop.f32.mrb[13].mxu0 }
 0x2bc   :  { %v1541_v0 = vcombine.low %v1392_v16, %v1394_v62  ;;  %v1562_v41 = vcombine.low %v1463_v49, %v1465_v9 }
 0x2be   :  { %v1548_v6 = vrot.slane %v1541_v0, %v6871_v10  ;;  %v1569_v50 = vrot.slane %v1562_v41, %v6871_v10 }
 0x2c0   :  { %v1550_v39 = vadd.f32 %v1548_v6, %v1313_v29  ;;  %v1571_v14 = vadd.f32 %v1569_v50, %v1558_v8  ;;  %v1314_v50 = vld [vmem:[#allocation2 + $0x14] sm:$0xf] }
 0x2c2   :  { %v3371_v59 = vmul.f32 -1.442695, %v1550_v39  ;;  %v3372_v20 = vmul.f32 -1.442695, %v1571_v14 }
 0x2c4   :  { %4969 = vpow2.f32 %v3371_v59 }
 0x2c5   :  { %4971 = vpow2.f32 %v3372_v20 }
 0x2ce   :  { %v4970_v12 = vpop.eup %4969 }
 0x2cf   :  { %v1554_v19 = vadd.f32 1.0, %v4970_v12  ;;  %v4972_v61 = vpop.eup %4971 }
 0x2d0   :  { %v1575_v9 = vadd.f32 1.0, %v4972_v61 }
 0x2d1   :  { %4973 = vrcp.f32 %v1554_v19 }
 0x2d2   :  { %4975 = vrcp.f32 %v1575_v9  ;;  %v6947_v9 = vld [vmem:[#allocation59_spill] sm:$0xff] }
 0x2db   :  { %v4974_v41 = vpop.eup %4973 }
 0x2dc   :  { %v4976_v20 = vpop.eup %4975 }
 0x2dd   :  { %v1594_v29 = vsub.f32 1.0, %v4976_v20  ;;  %v1596_v19 = vmul.f32 %v4976_v20, %v5863_v4  ;;  %v6943_v4 = vld [vmem:[#allocation55_spill] sm:$0xff]  ;;  %v6954_v20 = vld [vmem:[#allocation93_spill] sm:$0xff] }
 0x2fa   :  { %v1534_v31 = vpop.f32.mrb[12].mxu1 }
 0x2fb   :  { %v1578_v62 = vadd.f32 %v1534_v31, %v5856_v30  ;;  %v1536_v49 = vpop.f32.mrb[13].mxu1 }
 0x2fc   :  { %v1579_v0 = vadd.f32 %v1536_v49, %v5858_v51  ;;  %v6945_v49 = vld [vmem:[#allocation88_spill] sm:$0xff] }
 0x2fe   :  { %v1582_v6 = vcombine.low %v1578_v62, %v1579_v0  ;;  %v6944_v62 = vld [vmem:[#allocation57_spill] sm:$0xff] }
 0x2ff   :  { %v6946_v0 = vld [vmem:[#allocation89_spill] sm:$0xff] }
 0x300   :  { %v1589_v39 = vrot.slane %v1582_v6, %v6871_v10  ;;  %v6948_v6 = vld [vmem:[#allocation61_spill] sm:$0xff] }
 0x302   :  { %v1591_v59 = vmul.f32 %v4974_v41, %v1589_v39  ;;  %v6949_v39 = vld [vmem:[#allocation90_spill] sm:$0xff]  ;;  %v6950_v41 = vld [vmem:[#allocation91_spill] sm:$0xff] }
 0x304   :  { %v1592_v14 = vadd.f32 %v1591_v59, %v1314_v50  ;;  %v6951_v59 = vld [vmem:[#allocation63_spill] sm:$0xff]  ;;  %v6952_v50 = vld [vmem:[#allocation65_spill] sm:$0xff] }
 0x306   :  { %4977 = vtanh.f32 %v1592_v14  ;;  %v6953_v14 = vld [vmem:[#allocation92_spill] sm:$0xff] }
 0x310   :  { %v4978_v8 = vpop.eup %4977 }
 0x311   :  { %v1595_v12 = vmul.f32 %v4978_v8, %v1594_v29  ;;  %v6955_v29 = vld [vmem:[#allocation67_spill] sm:$0xff]  ;;  %v6956_v8 = vld [vmem:[#allocation69_spill] sm:$0xff] }
 0x313   :  { %v5977_v31 = vadd.f32 %v1596_v19, %v1595_v12  ;;  %v6957_v12 = vld [vmem:[#allocation94_spill] sm:$0xff]  ;;  %v6958_v19 = vld [vmem:[#allocation95_spill] sm:$0xff] }
 0x315   :  { %1599 = vst [vmem:[#allocation13 + $0x4] sm:$0xf] %v5977_v31  ;;  %v5982_v61 = vrot.slane %v5977_v31, %v6871_v10 }
 0x317   :  { %v1611_v16 = vcombine.high %v5982_v61, %v5982_v61 }
 0x319   :  { %1678 = vmatprep.mubr.f32.mxu0 %v1611_v16  ;;  %1749 = vmatprep.mubr.f32.mxu1 %v1611_v16 }
 0x31a   :  { %1679 = vmatmul.mubr.f32.vlgmr.msra.gmra.mrb[14].mxu0 %v5982_v61  ;;  %1750 = vmatmul.mubr.f32.vlgmr.msra.gmra.mrb[14].mxu1 %v5982_v61 }
 0x31b   :  { %3916 = vmatpush1.bf16.msra.mxu0 %v5565_v18  ;;  %1820 = vmatprep.mubr.f32.mxu0 %v1611_v16  ;;  %v6959_v16 = vld [vmem:[#allocation71_spill] sm:$0xff] }
 0x31c   :  { %3918 = vmatprep.subr.bf16.mxu0 %v5568_v42  ;;  %3980 = vmatpush1.bf16.msra.mxu1 %v6874_v21 }
 0x31d   :  { %3982 = vmatprep.subr.bf16.mxu1 %v5371_v25 }
 0x31f   :  { %3920 = vmatpush1.bf16.msra.mxu0 %v5574_v43 }
 0x320   :  { %3922 = vmatprep.subr.bf16.mxu0 %v6875_v57  ;;  %3984 = vmatpush1.bf16.msra.mxu1 %v6876_v45 }
 0x321   :  { %3986 = vmatprep.subr.bf16.mxu1 %v5385_v36 }
 0x323   :  { %3924 = vmatpush1.bf16.msra.mxu0 %v5583_v13 }
 0x324   :  { %3926 = vmatprep.subr.bf16.mxu0 %v6877_v23  ;;  %3988 = vmatpush1.bf16.msra.mxu1 %v6878_v47 }
 0x325   :  { %3990 = vmatprep.subr.bf16.mxu1 %v5397_v48 }
 0x327   :  { %3928 = vmatpush1.bf16.msra.mxu0 %v5591_v22 }
 0x328   :  { %3930 = vmatprep.subr.bf16.mxu0 %v6879_v63  ;;  %3992 = vmatpush1.bf16.msra.mxu1 %v6880_v35 }
 0x329   :  { %3994 = vmatprep.subr.bf16.mxu1 %v5409_v60 }
 0x32b   :  { %3932 = vmatpush1.bf16.msra.mxu0 %v5599_v32 }
 0x32c   :  { %3934 = vmatprep.subr.bf16.mxu0 %v6881_v52  ;;  %3996 = vmatpush1.bf16.msra.mxu1 %v6882_v34 }
 0x32d   :  { %3998 = vmatprep.subr.bf16.mxu1 %v5421_v15 }
 0x32f   :  { %3936 = vmatpush1.bf16.msra.mxu0 %v5607_v44 }
 0x330   :  { %3938 = vmatprep.subr.bf16.mxu0 %v6883_v26  ;;  %4000 = vmatpush1.bf16.msra.mxu1 %v6884_v53 }
 0x331   :  { %4002 = vmatprep.subr.bf16.mxu1 %v5433_v28 }
 0x333   :  { %3940 = vmatpush1.bf16.msra.mxu0 %v5615_v56 }
 0x334   :  { %3942 = vmatprep.subr.bf16.mxu0 %v6885_v37  ;;  %4004 = vmatpush1.bf16.msra.mxu1 %v6886_v55 }
 0x335   :  { %4006 = vmatprep.subr.bf16.mxu1 %v5445_v46 }
 0x337   :  { %3944 = vmatpush1.bf16.msra.mxu0 %v5623_v7 }
 0x338   :  { %3946 = vmatprep.subr.bf16.mxu0 %v6887_v33  ;;  %4008 = vmatpush1.bf16.msra.mxu1 %v6888_v17 }
 0x339   :  { %4010 = vmatprep.subr.bf16.mxu1 %v5457_v1 }
 0x33b   :  { %3948 = vmatpush1.bf16.msra.mxu0 %v5631_v24 }
 0x33c   :  { %3950 = vmatprep.subr.bf16.mxu0 %v6889_v11  ;;  %4012 = vmatpush1.bf16.msra.mxu1 %v6890_v38 }
 0x33d   :  { %4014 = vmatprep.subr.bf16.mxu1 %v5471_v27 }
 0x33f   :  { %3952 = vmatpush1.bf16.msra.mxu0 %v5639_v40 }
 0x340   :  { %3954 = vmatprep.subr.bf16.mxu0 %v6891_v2  ;;  %4016 = vmatpush1.bf16.msra.mxu1 %v6892_v5 }
 0x341   :  { %4018 = vmatprep.subr.bf16.mxu1 %v5489_v54 }
 0x343   :  { %3956 = vmatpush1.bf16.msra.mxu0 %v5647_v58 }
 0x344   :  { %3958 = vmatprep.subr.bf16.mxu0 %v6893_v3  ;;  %4020 = vmatpush1.bf16.msra.mxu1 %v6943_v4 }
 0x345   :  { %4022 = vmatprep.subr.bf16.mxu1 %v6944_v62 }
 0x347   :  { %3960 = vmatpush1.bf16.msra.mxu0 %v6945_v49 }
 0x348   :  { %3962 = vmatprep.subr.bf16.mxu0 %v6946_v0  ;;  %4024 = vmatpush1.bf16.msra.mxu1 %v6947_v9  ;;  %v1601_v9 = vld [vmem:[#allocation2 + $0x18] sm:$0xff] }
 0x349   :  { %4026 = vmatprep.subr.bf16.mxu1 %v6948_v6 }
 0x34b   :  { %3964 = vmatpush1.bf16.msra.mxu0 %v6949_v39  ;;  %v6960_v39 = vld [vmem:[#allocation73_spill] sm:$0xff] }
 0x34c   :  { %3966 = vmatprep.subr.bf16.mxu0 %v6950_v41  ;;  %4028 = vmatpush1.bf16.msra.mxu1 %v6951_v59  ;;  %v6961_v41 = vld [vmem:[#allocation96_spill] sm:$0xff] }
 0x34d   :  { %4030 = vmatprep.subr.bf16.mxu1 %v6952_v50  ;;  %v6962_v59 = vld [vmem:[#allocation24_spill] sm:$0xff]  ;;  %v6963_v50 = vld [vmem:[#allocation75_spill] sm:$0xff] }
 0x34f   :  { %3968 = vmatpush1.bf16.msra.mxu0 %v6953_v14  ;;  %v6964_v14 = vld [vmem:[#allocation77_spill] sm:$0xff] }
 0x350   :  { %3970 = vmatprep.subr.bf16.mxu0 %v6954_v20  ;;  %4032 = vmatpush1.bf16.msra.mxu1 %v6955_v29  ;;  %v6965_v29 = vld [vmem:[#allocation26_spill] sm:$0xff] }
 0x351   :  { %4034 = vmatprep.subr.bf16.mxu1 %v6956_v8  ;;  %v6966_v8 = vld [vmem:[#allocation27_spill] sm:$0xff] }
 0x353   :  { %3972 = vmatpush1.bf16.msra.mxu0 %v6957_v12  ;;  %v6967_v12 = vld [vmem:[#allocation29_spill] sm:$0xff] }
 0x354   :  { %3974 = vmatprep.subr.bf16.mxu0 %v6958_v19  ;;  %4036 = vmatpush1.bf16.msra.mxu1 %v6959_v16  ;;  %v6968_v19 = vld [vmem:[#allocation30_spill] sm:$0xff]  ;;  %v6969_v16 = vld [vmem:[#allocation32_spill] sm:$0xff] }
 0x355   :  { %4038 = vmatprep.subr.bf16.mxu1 %v6960_v39  ;;  %v6970_v39 = vld [vmem:[#allocation33_spill] sm:$0xff] }
 0x357   :  { %3976 = vmatpush1.bf16.msra.mxu0 %v6961_v41  ;;  %v6971_v41 = vld [vmem:[#allocation35_spill] sm:$0xff] }
 0x358   :  { %4042 = vmatprep.subr.bf16.mxu0 %v6962_v59  ;;  %4040 = vmatpush1.bf16.msra.mxu1 %v6963_v50  ;;  %v6972_v59 = vld [vmem:[#allocation36_spill] sm:$0xff]  ;;  %v6973_v50 = vld [vmem:[#allocation38_spill] sm:$0xff] }
 0x359   :  { %4106 = vmatprep.subr.bf16.mxu1 %v6964_v14  ;;  %v6974_v14 = vld [vmem:[#allocation39_spill] sm:$0xff] }
 0x35a   :  { %1821 = vmatmul.mubr.f32.vlgmr.msra.gmra.mrb[16].mxu0 %v5982_v61  ;;  %v6975_v61 = vld [vmem:[#allocation41_spill] sm:$0xff] }
 0x35b   :  { %4044 = vmatpush1.bf16.msra.mxu0 %v6965_v29  ;;  %v6976_v29 = vld [vmem:[#allocation42_spill] sm:$0xff] }
 0x35c   :  { %4046 = vmatprep.subr.bf16.mxu0 %v6966_v8  ;;  %v6977_v8 = vld [vmem:[#allocation44_spill] sm:$0xff] }
 0x35f   :  { %4048 = vmatpush1.bf16.msra.mxu0 %v6967_v12  ;;  %v6978_v12 = vld [vmem:[#allocation45_spill] sm:$0xff] }
 0x360   :  { %4050 = vmatprep.subr.bf16.mxu0 %v6968_v19  ;;  %v6979_v19 = vld [vmem:[#allocation47_spill] sm:$0xff] }
 0x363   :  { %4052 = vmatpush1.bf16.msra.mxu0 %v6969_v16  ;;  %v6980_v16 = vld [vmem:[#allocation48_spill] sm:$0xff] }
 0x364   :  { %4054 = vmatprep.subr.bf16.mxu0 %v6970_v39  ;;  %v6981_v39 = vld [vmem:[#allocation50_spill] sm:$0xff] }
 0x367   :  { %4056 = vmatpush1.bf16.msra.mxu0 %v6971_v41  ;;  %v6982_v41 = vld [vmem:[#allocation51_spill] sm:$0xff] }
 0x368   :  { %4058 = vmatprep.subr.bf16.mxu0 %v6972_v59  ;;  %v6983_v59 = vld [vmem:[#allocation53_spill] sm:$0xff] }
 0x36b   :  { %4060 = vmatpush1.bf16.msra.mxu0 %v6973_v50  ;;  %v6984_v50 = vld [vmem:[#allocation54_spill] sm:$0xff] }
 0x36c   :  { %4062 = vmatprep.subr.bf16.mxu0 %v6974_v14  ;;  %v6985_v14 = vld [vmem:[#allocation56_spill] sm:$0xff] }
 0x36f   :  { %4064 = vmatpush1.bf16.msra.mxu0 %v6975_v61  ;;  %v6986_v61 = vld [vmem:[#allocation58_spill] sm:$0xff] }
 0x370   :  { %4066 = vmatprep.subr.bf16.mxu0 %v6976_v29  ;;  %v6987_v29 = vld [vmem:[#allocation60_spill] sm:$0xff] }
 0x373   :  { %4068 = vmatpush1.bf16.msra.mxu0 %v6977_v8  ;;  %v6988_v8 = vld [vmem:[#allocation62_spill] sm:$0xff] }
 0x374   :  { %4070 = vmatprep.subr.bf16.mxu0 %v6978_v12  ;;  %v6989_v12 = vld [vmem:[#allocation64_spill] sm:$0xff] }
 0x377   :  { %4072 = vmatpush1.bf16.msra.mxu0 %v6979_v19  ;;  %v6990_v19 = vld [vmem:[#allocation66_spill] sm:$0xff] }
 0x378   :  { %4074 = vmatprep.subr.bf16.mxu0 %v6980_v16  ;;  %v6991_v16 = vld [vmem:[#allocation68_spill] sm:$0xff] }
 0x37b   :  { %4076 = vmatpush1.bf16.msra.mxu0 %v6981_v39  ;;  %v6992_v39 = vld [vmem:[#allocation70_spill] sm:$0xff] }
 0x37c   :  { %4078 = vmatprep.subr.bf16.mxu0 %v6982_v41  ;;  %v6993_v41 = vld [vmem:[#allocation72_spill] sm:$0xff] }
 0x37f   :  { %4080 = vmatpush1.bf16.msra.mxu0 %v6983_v59  ;;  %v6994_v59 = vld [vmem:[#allocation74_spill] sm:$0xff] }
 0x380   :  { %4082 = vmatprep.subr.bf16.mxu0 %v6984_v50  ;;  %v6995_v50 = vld [vmem:[#allocation76_spill] sm:$0xff] }
 0x383   :  { %4084 = vmatpush1.bf16.msra.mxu0 %v6985_v14  ;;  %v6996_v14 = vld [vmem:[#allocation23_spill] sm:$0xff] }
 0x384   :  { %4086 = vmatprep.subr.bf16.mxu0 %v6986_v61 }
 0x387   :  { %4088 = vmatpush1.bf16.msra.mxu0 %v6987_v29 }
 0x388   :  { %4090 = vmatprep.subr.bf16.mxu0 %v6988_v8 }
 0x38b   :  { %4092 = vmatpush1.bf16.msra.mxu0 %v6989_v12 }
 0x38c   :  { %4094 = vmatprep.subr.bf16.mxu0 %v6990_v19 }
 0x38f   :  { %4096 = vmatpush1.bf16.msra.mxu0 %v6991_v16 }
 0x390   :  { %4098 = vmatprep.subr.bf16.mxu0 %v6992_v39 }
 0x393   :  { %4100 = vmatpush1.bf16.msra.mxu0 %v6993_v41  ;;  %v1846_v41 = vrot.slane %v1601_v9, 4 }
 0x394   :  { %4102 = vmatprep.subr.bf16.mxu0 %v6994_v59 }
 0x397   :  { %4104 = vmatpush1.bf16.msra.mxu0 %v6995_v50 }
 0x398   :  { %4170 = vmatprep.subr.bf16.mxu0 %v6996_v14 }
 0x3ed   :  { %v1680_v61 = vpop.f32.mrb[14].mxu0  ;;  %v1751_v29 = vpop.f32.mrb[14].mxu1 }
 0x3ee   :  { %v1682_v20 = vpop.f32.mrb[15].mxu0  ;;  %v1753_v8 = vpop.f32.mrb[15].mxu1 }
 0x3ef   :  { %v1829_v6 = vcombine.low %v1680_v61, %v1682_v20  ;;  %v1850_v12 = vcombine.low %v1751_v29, %v1753_v8 }
 0x3f1   :  { %v1836_v19 = vrot.slane %v1829_v6, %v6871_v10  ;;  %v1857_v39 = vrot.slane %v1850_v12, %v6871_v10 }
 0x3f3   :  { %v1838_v16 = vadd.f32 %v1836_v19, %v1601_v9  ;;  %v1859_v59 = vadd.f32 %v1857_v39, %v1846_v41  ;;  %v1602_v9 = vld [vmem:[#allocation2 + $0x20] sm:$0xf] }
 0x3f5   :  { %v3373_v0 = vmul.f32 -1.442695, %v1838_v16  ;;  %v3374_v49 = vmul.f32 -1.442695, %v1859_v59 }
 0x3f7   :  { %4979 = vpow2.f32 %v3373_v0 }
 0x3f8   :  { %4981 = vpow2.f32 %v3374_v49 }
 0x401   :  { %v4980_v50 = vpop.eup %4979 }
 0x402   :  { %v1842_v14 = vadd.f32 1.0, %v4980_v50  ;;  %v4982_v4 = vpop.eup %4981 }
 0x403   :  { %v1863_v8 = vadd.f32 1.0, %v4982_v4 }
 0x404   :  { %4983 = vrcp.f32 %v1842_v14 }
 0x405   :  { %4985 = vrcp.f32 %v1863_v8  ;;  %v7001_v8 = vld [vmem:[#allocation59_spill] sm:$0xff] }
 0x40e   :  { %v4984_v12 = vpop.eup %4983 }
 0x40f   :  { %v4986_v49 = vpop.eup %4985 }
 0x410   :  { %v1882_v41 = vsub.f32 1.0, %v4986_v49  ;;  %v1884_v14 = vmul.f32 %v4986_v49, %v5977_v31  ;;  %v6997_v31 = vld [vmem:[#allocation55_spill] sm:$0xff]  ;;  %v7008_v49 = vld [vmem:[#allocation93_spill] sm:$0xff] }
 0x42d   :  { %v1822_v62 = vpop.f32.mrb[16].mxu0 }
 0x42e   :  { %v1866_v20 = vadd.f32 %v1822_v62, %v5856_v30  ;;  %v1824_v29 = vpop.f32.mrb[17].mxu0 }
 0x42f   :  { %v1867_v6 = vadd.f32 %v1824_v29, %v5858_v51  ;;  %v6999_v29 = vld [vmem:[#allocation88_spill] sm:$0xff] }
 0x431   :  { %v1870_v19 = vcombine.low %v1866_v20, %v1867_v6  ;;  %v6998_v20 = vld [vmem:[#allocation57_spill] sm:$0xff] }
 0x432   :  { %v7000_v6 = vld [vmem:[#allocation89_spill] sm:$0xff] }
 0x433   :  { %v1877_v16 = vrot.slane %v1870_v19, %v6871_v10  ;;  %v7002_v19 = vld [vmem:[#allocation61_spill] sm:$0xff] }
 0x435   :  { %v1879_v0 = vmul.f32 %v4984_v12, %v1877_v16  ;;  %v7003_v16 = vld [vmem:[#allocation90_spill] sm:$0xff]  ;;  %v7004_v12 = vld [vmem:[#allocation91_spill] sm:$0xff] }
 0x437   :  { %v1880_v39 = vadd.f32 %v1879_v0, %v1602_v9  ;;  %v7005_v0 = vld [vmem:[#allocation63_spill] sm:$0xff]  ;;  %v7006_v9 = vld [vmem:[#allocation65_spill] sm:$0xff] }
 0x439   :  { %4987 = vtanh.f32 %v1880_v39  ;;  %v7007_v39 = vld [vmem:[#allocation92_spill] sm:$0xff] }
 0x443   :  { %v4988_v59 = vpop.eup %4987 }
 0x444   :  { %v1883_v50 = vmul.f32 %v4988_v59, %v1882_v41  ;;  %v7009_v41 = vld [vmem:[#allocation67_spill] sm:$0xff]  ;;  %v7010_v59 = vld [vmem:[#allocation69_spill] sm:$0xff] }
 0x446   :  { %v6091_v62 = vadd.f32 %v1884_v14, %v1883_v50  ;;  %v7011_v50 = vld [vmem:[#allocation94_spill] sm:$0xff]  ;;  %v7012_v14 = vld [vmem:[#allocation95_spill] sm:$0xff] }
 0x448   :  { %1887 = vst [vmem:[#allocation13 + $0x8] sm:$0xf] %v6091_v62  ;;  %v6096_v4 = vrot.slane %v6091_v62, %v6871_v10 }
 0x44a   :  { %v1899_v61 = vcombine.high %v6096_v4, %v6096_v4 }
 0x44c   :  { %1966 = vmatprep.mubr.f32.mxu1 %v1899_v61  ;;  %2037 = vmatprep.mubr.f32.mxu0 %v1899_v61 }
 0x44d   :  { %1967 = vmatmul.mubr.f32.vlgmr.msra.gmra.mrb[16].mxu1 %v6096_v4  ;;  %2038 = vmatmul.mubr.f32.vlgmr.msra.gmra.mrb[18].mxu0 %v6096_v4 }
 0x44e   :  { %4108 = vmatpush1.bf16.msra.mxu1 %v5565_v18  ;;  %2108 = vmatprep.mubr.f32.mxu1 %v1899_v61  ;;  %v7013_v61 = vld [vmem:[#allocation71_spill] sm:$0xff] }
 0x44f   :  { %4110 = vmatprep.subr.bf16.mxu1 %v5568_v42  ;;  %4172 = vmatpush1.bf16.msra.mxu0 %v6874_v21 }
 0x450   :  { %4174 = vmatprep.subr.bf16.mxu0 %v5371_v25 }
 0x452   :  { %4112 = vmatpush1.bf16.msra.mxu1 %v5574_v43 }
 0x453   :  { %4114 = vmatprep.subr.bf16.mxu1 %v6875_v57  ;;  %4176 = vmatpush1.bf16.msra.mxu0 %v6876_v45 }
 0x454   :  { %4178 = vmatprep.subr.bf16.mxu0 %v5385_v36 }
 0x456   :  { %4116 = vmatpush1.bf16.msra.mxu1 %v5583_v13 }
 0x457   :  { %4118 = vmatprep.subr.bf16.mxu1 %v6877_v23  ;;  %4180 = vmatpush1.bf16.msra.mxu0 %v6878_v47 }
 0x458   :  { %4182 = vmatprep.subr.bf16.mxu0 %v5397_v48 }
 0x45a   :  { %4120 = vmatpush1.bf16.msra.mxu1 %v5591_v22 }
 0x45b   :  { %4122 = vmatprep.subr.bf16.mxu1 %v6879_v63  ;;  %4184 = vmatpush1.bf16.msra.mxu0 %v6880_v35 }
 0x45c   :  { %4186 = vmatprep.subr.bf16.mxu0 %v5409_v60 }
 0x45e   :  { %4124 = vmatpush1.bf16.msra.mxu1 %v5599_v32 }
 0x45f   :  { %4126 = vmatprep.subr.bf16.mxu1 %v6881_v52  ;;  %4188 = vmatpush1.bf16.msra.mxu0 %v6882_v34 }
 0x460   :  { %4190 = vmatprep.subr.bf16.mxu0 %v5421_v15 }
 0x462   :  { %4128 = vmatpush1.bf16.msra.mxu1 %v5607_v44 }
 0x463   :  { %4130 = vmatprep.subr.bf16.mxu1 %v6883_v26  ;;  %4192 = vmatpush1.bf16.msra.mxu0 %v6884_v53 }
 0x464   :  { %4194 = vmatprep.subr.bf16.mxu0 %v5433_v28 }
 0x466   :  { %4132 = vmatpush1.bf16.msra.mxu1 %v5615_v56 }
 0x467   :  { %4134 = vmatprep.subr.bf16.mxu1 %v6885_v37  ;;  %4196 = vmatpush1.bf16.msra.mxu0 %v6886_v55 }
 0x468   :  { %4198 = vmatprep.subr.bf16.mxu0 %v5445_v46 }
 0x46a   :  { %4136 = vmatpush1.bf16.msra.mxu1 %v5623_v7 }
 0x46b   :  { %4138 = vmatprep.subr.bf16.mxu1 %v6887_v33  ;;  %4200 = vmatpush1.bf16.msra.mxu0 %v6888_v17 }
 0x46c   :  { %4202 = vmatprep.subr.bf16.mxu0 %v5457_v1 }
 0x46e   :  { %4140 = vmatpush1.bf16.msra.mxu1 %v5631_v24 }
 0x46f   :  { %4142 = vmatprep.subr.bf16.mxu1 %v6889_v11  ;;  %4204 = vmatpush1.bf16.msra.mxu0 %v6890_v38 }
 0x470   :  { %4206 = vmatprep.subr.bf16.mxu0 %v5471_v27 }
 0x472   :  { %4144 = vmatpush1.bf16.msra.mxu1 %v5639_v40 }
 0x473   :  { %4146 = vmatprep.subr.bf16.mxu1 %v6891_v2  ;;  %4208 = vmatpush1.bf16.msra.mxu0 %v6892_v5 }
 0x474   :  { %4210 = vmatprep.subr.bf16.mxu0 %v5489_v54 }
 0x476   :  { %4148 = vmatpush1.bf16.msra.mxu1 %v5647_v58 }
 0x477   :  { %4150 = vmatprep.subr.bf16.mxu1 %v6893_v3  ;;  %4212 = vmatpush1.bf16.msra.mxu0 %v6997_v31 }
 0x478   :  { %4214 = vmatprep.subr.bf16.mxu0 %v6998_v20 }
 0x47a   :  { %4152 = vmatpush1.bf16.msra.mxu1 %v6999_v29 }
 0x47b   :  { %4154 = vmatprep.subr.bf16.mxu1 %v7000_v6  ;;  %4216 = vmatpush1.bf16.msra.mxu0 %v7001_v8  ;;  %v1889_v8 = vld [vmem:[#allocation2 + $0x24] sm:$0xff] }
 0x47c   :  { %4218 = vmatprep.subr.bf16.mxu0 %v7002_v19 }
 0x47e   :  { %4156 = vmatpush1.bf16.msra.mxu1 %v7003_v16  ;;  %v7014_v16 = vld [vmem:[#allocation73_spill] sm:$0xff] }
 0x47f   :  { %4158 = vmatprep.subr.bf16.mxu1 %v7004_v12  ;;  %4220 = vmatpush1.bf16.msra.mxu0 %v7005_v0  ;;  %v7015_v12 = vld [vmem:[#allocation96_spill] sm:$0xff] }
 0x480   :  { %4222 = vmatprep.subr.bf16.mxu0 %v7006_v9  ;;  %v7016_v0 = vld [vmem:[#allocation24_spill] sm:$0xff]  ;;  %v7017_v9 = vld [vmem:[#allocation75_spill] sm:$0xff] }
 0x482   :  { %4160 = vmatpush1.bf16.msra.mxu1 %v7007_v39  ;;  %v7018_v39 = vld [vmem:[#allocation77_spill] sm:$0xff] }
 0x483   :  { %4162 = vmatprep.subr.bf16.mxu1 %v7008_v49  ;;  %4224 = vmatpush1.bf16.msra.mxu0 %v7009_v41  ;;  %v7019_v41 = vld [vmem:[#allocation26_spill] sm:$0xff] }
 0x484   :  { %4226 = vmatprep.subr.bf16.mxu0 %v7010_v59  ;;  %v7020_v59 = vld [vmem:[#allocation27_spill] sm:$0xff] }
 0x486   :  { %4164 = vmatpush1.bf16.msra.mxu1 %v7011_v50  ;;  %v7021_v50 = vld [vmem:[#allocation29_spill] sm:$0xff] }
 0x487   :  { %4166 = vmatprep.subr.bf16.mxu1 %v7012_v14  ;;  %4228 = vmatpush1.bf16.msra.mxu0 %v7013_v61  ;;  %v7022_v14 = vld [vmem:[#allocation30_spill] sm:$0xff]  ;;  %v7023_v61 = vld [vmem:[#allocation32_spill] sm:$0xff] }
 0x488   :  { %4230 = vmatprep.subr.bf16.mxu0 %v7014_v16  ;;  %v7024_v16 = vld [vmem:[#allocation33_spill] sm:$0xff] }
 0x48a   :  { %4168 = vmatpush1.bf16.msra.mxu1 %v7015_v12  ;;  %v7025_v12 = vld [vmem:[#allocation35_spill] sm:$0xff] }
 0x48b   :  { %4234 = vmatprep.subr.bf16.mxu1 %v7016_v0  ;;  %4232 = vmatpush1.bf16.msra.mxu0 %v7017_v9  ;;  %v7026_v0 = vld [vmem:[#allocation36_spill] sm:$0xff]  ;;  %v7027_v9 = vld [vmem:[#allocation38_spill] sm:$0xff] }
 0x48c   :  { %4298 = vmatprep.subr.bf16.mxu0 %v7018_v39  ;;  %v7028_v39 = vld [vmem:[#allocation39_spill] sm:$0xff] }
 0x48d   :  { %2109 = vmatmul.mubr.f32.vlgmr.msra.gmra.mrb[18].mxu1 %v6096_v4  ;;  %v7029_v4 = vld [vmem:[#allocation41_spill] sm:$0xff] }
 0x48e   :  { %4236 = vmatpush1.bf16.msra.mxu1 %v7019_v41  ;;  %v7030_v41 = vld [vmem:[#allocation42_spill] sm:$0xff] }
 0x48f   :  { %4238 = vmatprep.subr.bf16.mxu1 %v7020_v59  ;;  %v7031_v59 = vld [vmem:[#allocation44_spill] sm:$0xff] }
 0x492   :  { %4240 = vmatpush1.bf16.msra.mxu1 %v7021_v50  ;;  %v7032_v50 = vld [vmem:[#allocation45_spill] sm:$0xff] }
 0x493   :  { %4242 = vmatprep.subr.bf16.mxu1 %v7022_v14  ;;  %v7033_v14 = vld [vmem:[#allocation47_spill] sm:$0xff] }
 0x496   :  { %4244 = vmatpush1.bf16.msra.mxu1 %v7023_v61  ;;  %v7034_v61 = vld [vmem:[#allocation48_spill] sm:$0xff] }
 0x497   :  { %4246 = vmatprep.subr.bf16.mxu1 %v7024_v16  ;;  %v7035_v16 = vld [vmem:[#allocation50_spill] sm:$0xff] }
 0x49a   :  { %4248 = vmatpush1.bf16.msra.mxu1 %v7025_v12  ;;  %v7036_v12 = vld [vmem:[#allocation51_spill] sm:$0xff] }
 0x49b   :  { %4250 = vmatprep.subr.bf16.mxu1 %v7026_v0  ;;  %v7037_v0 = vld [vmem:[#allocation53_spill] sm:$0xff] }
 0x49e   :  { %4252 = vmatpush1.bf16.msra.mxu1 %v7027_v9  ;;  %v7038_v9 = vld [vmem:[#allocation54_spill] sm:$0xff] }
 0x49f   :  { %4254 = vmatprep.subr.bf16.mxu1 %v7028_v39  ;;  %v7039_v39 = vld [vmem:[#allocation56_spill] sm:$0xff] }
 0x4a2   :  { %4256 = vmatpush1.bf16.msra.mxu1 %v7029_v4  ;;  %v7040_v4 = vld [vmem:[#allocation58_spill] sm:$0xff] }
 0x4a3   :  { %4258 = vmatprep.subr.bf16.mxu1 %v7030_v41  ;;  %v7041_v41 = vld [vmem:[#allocation60_spill] sm:$0xff] }
 0x4a6   :  { %4260 = vmatpush1.bf16.msra.mxu1 %v7031_v59  ;;  %v7042_v59 = vld [vmem:[#allocation62_spill] sm:$0xff] }
 0x4a7   :  { %4262 = vmatprep.subr.bf16.mxu1 %v7032_v50  ;;  %v7043_v50 = vld [vmem:[#allocation64_spill] sm:$0xff] }
 0x4aa   :  { %4264 = vmatpush1.bf16.msra.mxu1 %v7033_v14  ;;  %v7044_v14 = vld [vmem:[#allocation66_spill] sm:$0xff] }
 0x4ab   :  { %4266 = vmatprep.subr.bf16.mxu1 %v7034_v61  ;;  %v7045_v61 = vld [vmem:[#allocation68_spill] sm:$0xff] }
 0x4ae   :  { %4268 = vmatpush1.bf16.msra.mxu1 %v7035_v16  ;;  %v7046_v16 = vld [vmem:[#allocation70_spill] sm:$0xff] }
 0x4af   :  { %4270 = vmatprep.subr.bf16.mxu1 %v7036_v12  ;;  %v7047_v12 = vld [vmem:[#allocation72_spill] sm:$0xff] }
 0x4b2   :  { %4272 = vmatpush1.bf16.msra.mxu1 %v7037_v0  ;;  %v7048_v0 = vld [vmem:[#allocation74_spill] sm:$0xff] }
 0x4b3   :  { %4274 = vmatprep.subr.bf16.mxu1 %v7038_v9  ;;  %v7049_v9 = vld [vmem:[#allocation76_spill] sm:$0xff] }
 0x4b6   :  { %4276 = vmatpush1.bf16.msra.mxu1 %v7039_v39  ;;  %v7050_v39 = vld [vmem:[#allocation23_spill] sm:$0xff] }
 0x4b7   :  { %4278 = vmatprep.subr.bf16.mxu1 %v7040_v4 }
 0x4ba   :  { %4280 = vmatpush1.bf16.msra.mxu1 %v7041_v41 }
 0x4bb   :  { %4282 = vmatprep.subr.bf16.mxu1 %v7042_v59 }
 0x4be   :  { %4284 = vmatpush1.bf16.msra.mxu1 %v7043_v50 }
 0x4bf   :  { %4286 = vmatprep.subr.bf16.mxu1 %v7044_v14 }
 0x4c2   :  { %4288 = vmatpush1.bf16.msra.mxu1 %v7045_v61 }
 0x4c3   :  { %4290 = vmatprep.subr.bf16.mxu1 %v7046_v16 }
 0x4c6   :  { %4292 = vmatpush1.bf16.msra.mxu1 %v7047_v12  ;;  %v2134_v12 = vrot.slane %v1889_v8, 4 }
 0x4c7   :  { %4294 = vmatprep.subr.bf16.mxu1 %v7048_v0 }
 0x4ca   :  { %4296 = vmatpush1.bf16.msra.mxu1 %v7049_v9 }
 0x4cb   :  { %4362 = vmatprep.subr.bf16.mxu1 %v7050_v39 }
 0x520   :  { %v1968_v4 = vpop.f32.mrb[16].mxu1  ;;  %v2039_v41 = vpop.f32.mrb[18].mxu0 }
 0x521   :  { %v1970_v49 = vpop.f32.mrb[17].mxu1  ;;  %v2041_v59 = vpop.f32.mrb[19].mxu0 }
 0x522   :  { %v2117_v19 = vcombine.low %v1968_v4, %v1970_v49  ;;  %v2138_v50 = vcombine.low %v2039_v41, %v2041_v59 }
 0x524   :  { %v2124_v14 = vrot.slane %v2117_v19, %v6871_v10  ;;  %v2145_v16 = vrot.slane %v2138_v50, %v6871_v10 }
 0x526   :  { %v2126_v61 = vadd.f32 %v2124_v14, %v1889_v8  ;;  %v2147_v0 = vadd.f32 %v2145_v16, %v2134_v12  ;;  %v1890_v8 = vld [vmem:[#allocation2 + $0x2c] sm:$0xf] }
 0x528   :  { %v3375_v6 = vmul.f32 -1.442695, %v2126_v61  ;;  %v3376_v29 = vmul.f32 -1.442695, %v2147_v0 }
 0x52a   :  { %4989 = vpow2.f32 %v3375_v6 }
 0x52b   :  { %4991 = vpow2.f32 %v3376_v29 }
 0x534   :  { %v4990_v9 = vpop.eup %4989 }
 0x535   :  { %v2130_v39 = vadd.f32 1.0, %v4990_v9  ;;  %v4992_v31 = vpop.eup %4991 }
 0x536   :  { %v2151_v59 = vadd.f32 1.0, %v4992_v31 }
 0x537   :  { %4993 = vrcp.f32 %v2130_v39 }
 0x538   :  { %4995 = vrcp.f32 %v2151_v59  ;;  %v7055_v59 = vld [vmem:[#allocation59_spill] sm:$0xff] }
 0x541   :  { %v4994_v50 = vpop.eup %4993 }
 0x542   :  { %v4996_v29 = vpop.eup %4995 }
 0x543   :  { %v2170_v12 = vsub.f32 1.0, %v4996_v29  ;;  %v2172_v39 = vmul.f32 %v4996_v29, %v6091_v62  ;;  %v7051_v62 = vld [vmem:[#allocation55_spill] sm:$0xff]  ;;  %v7062_v29 = vld [vmem:[#allocation93_spill] sm:$0xff] }
 0x560   :  { %v2110_v20 = vpop.f32.mrb[18].mxu1 }
 0x561   :  { %v2154_v49 = vadd.f32 %v2110_v20, %v5856_v30  ;;  %v2112_v41 = vpop.f32.mrb[19].mxu1 }
 0x562   :  { %v2155_v19 = vadd.f32 %v2112_v41, %v5858_v51  ;;  %v7053_v41 = vld [vmem:[#allocation88_spill] sm:$0xff] }
 0x564   :  { %v2158_v14 = vcombine.low %v2154_v49, %v2155_v19  ;;  %v7052_v49 = vld [vmem:[#allocation57_spill] sm:$0xff] }
 0x565   :  { %v7054_v19 = vld [vmem:[#allocation89_spill] sm:$0xff] }
 0x566   :  { %v2165_v61 = vrot.slane %v2158_v14, %v6871_v10  ;;  %v7056_v14 = vld [vmem:[#allocation61_spill] sm:$0xff] }
 0x568   :  { %v2167_v6 = vmul.f32 %v4994_v50, %v2165_v61  ;;  %v7057_v61 = vld [vmem:[#allocation90_spill] sm:$0xff]  ;;  %v7058_v50 = vld [vmem:[#allocation91_spill] sm:$0xff] }
 0x56a   :  { %v2168_v16 = vadd.f32 %v2167_v6, %v1890_v8  ;;  %v7059_v6 = vld [vmem:[#allocation63_spill] sm:$0xff]  ;;  %v7060_v8 = vld [vmem:[#allocation65_spill] sm:$0xff] }
 0x56c   :  { %4997 = vtanh.f32 %v2168_v16  ;;  %v7061_v16 = vld [vmem:[#allocation92_spill] sm:$0xff] }
 0x576   :  { %v4998_v0 = vpop.eup %4997 }
 0x577   :  { %v2171_v9 = vmul.f32 %v4998_v0, %v2170_v12  ;;  %v7063_v12 = vld [vmem:[#allocation67_spill] sm:$0xff]  ;;  %v7064_v0 = vld [vmem:[#allocation69_spill] sm:$0xff] }
 0x579   :  { %v6205_v20 = vadd.f32 %v2172_v39, %v2171_v9  ;;  %v7065_v9 = vld [vmem:[#allocation94_spill] sm:$0xff]  ;;  %v7066_v39 = vld [vmem:[#allocation95_spill] sm:$0xff] }
 0x57b   :  { %2175 = vst [vmem:[#allocation13 + $0xc] sm:$0xf] %v6205_v20  ;;  %v6210_v31 = vrot.slane %v6205_v20, %v6871_v10 }
 0x57d   :  { %v2187_v4 = vcombine.high %v6210_v31, %v6210_v31 }
 0x57f   :  { %2254 = vmatprep.mubr.f32.mxu0 %v2187_v4  ;;  %2325 = vmatprep.mubr.f32.mxu1 %v2187_v4 }
 0x580   :  { %2255 = vmatmul.mubr.f32.vlgmr.msra.gmra.mrb[20].mxu0 %v6210_v31  ;;  %2326 = vmatmul.mubr.f32.vlgmr.msra.gmra.mrb[20].mxu1 %v6210_v31 }
 0x581   :  { %4300 = vmatpush1.bf16.msra.mxu0 %v5565_v18  ;;  %2396 = vmatprep.mubr.f32.mxu0 %v2187_v4  ;;  %v7067_v4 = vld [vmem:[#allocation71_spill] sm:$0xff] }
 0x582   :  { %4302 = vmatprep.subr.bf16.mxu0 %v5568_v42  ;;  %4364 = vmatpush1.bf16.msra.mxu1 %v6874_v21 }
 0x583   :  { %4366 = vmatprep.subr.bf16.mxu1 %v5371_v25 }
 0x585   :  { %4304 = vmatpush1.bf16.msra.mxu0 %v5574_v43 }
 0x586   :  { %4306 = vmatprep.subr.bf16.mxu0 %v6875_v57  ;;  %4368 = vmatpush1.bf16.msra.mxu1 %v6876_v45 }
 0x587   :  { %4370 = vmatprep.subr.bf16.mxu1 %v5385_v36 }
 0x589   :  { %4308 = vmatpush1.bf16.msra.mxu0 %v5583_v13 }
 0x58a   :  { %4310 = vmatprep.subr.bf16.mxu0 %v6877_v23  ;;  %4372 = vmatpush1.bf16.msra.mxu1 %v6878_v47 }
 0x58b   :  { %4374 = vmatprep.subr.bf16.mxu1 %v5397_v48 }
 0x58d   :  { %4312 = vmatpush1.bf16.msra.mxu0 %v5591_v22 }
 0x58e   :  { %4314 = vmatprep.subr.bf16.mxu0 %v6879_v63  ;;  %4376 = vmatpush1.bf16.msra.mxu1 %v6880_v35 }
 0x58f   :  { %4378 = vmatprep.subr.bf16.mxu1 %v5409_v60 }
 0x591   :  { %4316 = vmatpush1.bf16.msra.mxu0 %v5599_v32 }
 0x592   :  { %4318 = vmatprep.subr.bf16.mxu0 %v6881_v52  ;;  %4380 = vmatpush1.bf16.msra.mxu1 %v6882_v34 }
 0x593   :  { %4382 = vmatprep.subr.bf16.mxu1 %v5421_v15 }
 0x595   :  { %4320 = vmatpush1.bf16.msra.mxu0 %v5607_v44 }
 0x596   :  { %4322 = vmatprep.subr.bf16.mxu0 %v6883_v26  ;;  %4384 = vmatpush1.bf16.msra.mxu1 %v6884_v53 }
 0x597   :  { %4386 = vmatprep.subr.bf16.mxu1 %v5433_v28 }
 0x599   :  { %4324 = vmatpush1.bf16.msra.mxu0 %v5615_v56 }
 0x59a   :  { %4326 = vmatprep.subr.bf16.mxu0 %v6885_v37  ;;  %4388 = vmatpush1.bf16.msra.mxu1 %v6886_v55 }
 0x59b   :  { %4390 = vmatprep.subr.bf16.mxu1 %v5445_v46 }
 0x59d   :  { %4328 = vmatpush1.bf16.msra.mxu0 %v5623_v7 }
 0x59e   :  { %4330 = vmatprep.subr.bf16.mxu0 %v6887_v33  ;;  %4392 = vmatpush1.bf16.msra.mxu1 %v6888_v17 }
 0x59f   :  { %4394 = vmatprep.subr.bf16.mxu1 %v5457_v1 }
 0x5a1   :  { %4332 = vmatpush1.bf16.msra.mxu0 %v5631_v24 }
 0x5a2   :  { %4334 = vmatprep.subr.bf16.mxu0 %v6889_v11  ;;  %4396 = vmatpush1.bf16.msra.mxu1 %v6890_v38 }
 0x5a3   :  { %4398 = vmatprep.subr.bf16.mxu1 %v5471_v27 }
 0x5a5   :  { %4336 = vmatpush1.bf16.msra.mxu0 %v5639_v40 }
 0x5a6   :  { %4338 = vmatprep.subr.bf16.mxu0 %v6891_v2  ;;  %4400 = vmatpush1.bf16.msra.mxu1 %v6892_v5 }
 0x5a7   :  { %4402 = vmatprep.subr.bf16.mxu1 %v5489_v54 }
 0x5a9   :  { %4340 = vmatpush1.bf16.msra.mxu0 %v5647_v58 }
 0x5aa   :  { %4342 = vmatprep.subr.bf16.mxu0 %v6893_v3  ;;  %4404 = vmatpush1.bf16.msra.mxu1 %v7051_v62 }
 0x5ab   :  { %4406 = vmatprep.subr.bf16.mxu1 %v7052_v49 }
 0x5ad   :  { %4344 = vmatpush1.bf16.msra.mxu0 %v7053_v41 }
 0x5ae   :  { %4346 = vmatprep.subr.bf16.mxu0 %v7054_v19  ;;  %4408 = vmatpush1.bf16.msra.mxu1 %v7055_v59  ;;  %v2177_v59 = vld [vmem:[#allocation2 + $0x30] sm:$0xff] }
 0x5af   :  { %4410 = vmatprep.subr.bf16.mxu1 %v7056_v14 }
 0x5b1   :  { %4348 = vmatpush1.bf16.msra.mxu0 %v7057_v61  ;;  %v7068_v61 = vld [vmem:[#allocation73_spill] sm:$0xff] }
 0x5b2   :  { %4350 = vmatprep.subr.bf16.mxu0 %v7058_v50  ;;  %4412 = vmatpush1.bf16.msra.mxu1 %v7059_v6  ;;  %v7069_v50 = vld [vmem:[#allocation96_spill] sm:$0xff] }
 0x5b3   :  { %4414 = vmatprep.subr.bf16.mxu1 %v7060_v8  ;;  %v7070_v6 = vld [vmem:[#allocation24_spill] sm:$0xff]  ;;  %v7071_v8 = vld [vmem:[#allocation75_spill] sm:$0xff] }
 0x5b5   :  { %4352 = vmatpush1.bf16.msra.mxu0 %v7061_v16  ;;  %v7072_v16 = vld [vmem:[#allocation77_spill] sm:$0xff] }
 0x5b6   :  { %4354 = vmatprep.subr.bf16.mxu0 %v7062_v29  ;;  %4416 = vmatpush1.bf16.msra.mxu1 %v7063_v12  ;;  %v7073_v12 = vld [vmem:[#allocation26_spill] sm:$0xff] }
 0x5b7   :  { %4418 = vmatprep.subr.bf16.mxu1 %v7064_v0  ;;  %v7074_v0 = vld [vmem:[#allocation27_spill] sm:$0xff] }
 0x5b9   :  { %4356 = vmatpush1.bf16.msra.mxu0 %v7065_v9  ;;  %v7075_v9 = vld [vmem:[#allocation29_spill] sm:$0xff] }
 0x5ba   :  { %4358 = vmatprep.subr.bf16.mxu0 %v7066_v39  ;;  %4420 = vmatpush1.bf16.msra.mxu1 %v7067_v4  ;;  %v7076_v39 = vld [vmem:[#allocation30_spill] sm:$0xff]  ;;  %v7077_v4 = vld [vmem:[#allocation32_spill] sm:$0xff] }
 0x5bb   :  { %4422 = vmatprep.subr.bf16.mxu1 %v7068_v61  ;;  %v7078_v61 = vld [vmem:[#allocation33_spill] sm:$0xff] }
 0x5bd   :  { %4360 = vmatpush1.bf16.msra.mxu0 %v7069_v50  ;;  %v7079_v50 = vld [vmem:[#allocation35_spill] sm:$0xff] }
 0x5be   :  { %4426 = vmatprep.subr.bf16.mxu0 %v7070_v6  ;;  %4424 = vmatpush1.bf16.msra.mxu1 %v7071_v8  ;;  %v7080_v6 = vld [vmem:[#allocation36_spill] sm:$0xff]  ;;  %v7081_v8 = vld [vmem:[#allocation38_spill] sm:$0xff] }
 0x5bf   :  { %4490 = vmatprep.subr.bf16.mxu1 %v7072_v16  ;;  %v7082_v16 = vld [vmem:[#allocation39_spill] sm:$0xff] }
 0x5c0   :  { %2397 = vmatmul.mubr.f32.vlgmr.msra.gmra.mrb[22].mxu0 %v6210_v31  ;;  %v7083_v31 = vld [vmem:[#allocation41_spill] sm:$0xff] }
 0x5c1   :  { %4428 = vmatpush1.bf16.msra.mxu0 %v7073_v12  ;;  %v7084_v12 = vld [vmem:[#allocation42_spill] sm:$0xff] }
 0x5c2   :  { %4430 = vmatprep.subr.bf16.mxu0 %v7074_v0  ;;  %v7085_v0 = vld [vmem:[#allocation44_spill] sm:$0xff] }
 0x5c5   :  { %4432 = vmatpush1.bf16.msra.mxu0 %v7075_v9  ;;  %v7086_v9 = vld [vmem:[#allocation45_spill] sm:$0xff] }
 0x5c6   :  { %4434 = vmatprep.subr.bf16.mxu0 %v7076_v39  ;;  %v7087_v39 = vld [vmem:[#allocation47_spill] sm:$0xff] }
 0x5c9   :  { %4436 = vmatpush1.bf16.msra.mxu0 %v7077_v4  ;;  %v7088_v4 = vld [vmem:[#allocation48_spill] sm:$0xff] }
 0x5ca   :  { %4438 = vmatprep.subr.bf16.mxu0 %v7078_v61  ;;  %v7089_v61 = vld [vmem:[#allocation50_spill] sm:$0xff] }
 0x5cd   :  { %4440 = vmatpush1.bf16.msra.mxu0 %v7079_v50  ;;  %v7090_v50 = vld [vmem:[#allocation51_spill] sm:$0xff] }
 0x5ce   :  { %4442 = vmatprep.subr.bf16.mxu0 %v7080_v6  ;;  %v7091_v6 = vld [vmem:[#allocation53_spill] sm:$0xff] }
 0x5d1   :  { %4444 = vmatpush1.bf16.msra.mxu0 %v7081_v8  ;;  %v7092_v8 = vld [vmem:[#allocation54_spill] sm:$0xff] }
 0x5d2   :  { %4446 = vmatprep.subr.bf16.mxu0 %v7082_v16  ;;  %v7093_v16 = vld [vmem:[#allocation56_spill] sm:$0xff] }
 0x5d5   :  { %4448 = vmatpush1.bf16.msra.mxu0 %v7083_v31  ;;  %v7094_v31 = vld [vmem:[#allocation58_spill] sm:$0xff] }
 0x5d6   :  { %4450 = vmatprep.subr.bf16.mxu0 %v7084_v12  ;;  %v7095_v12 = vld [vmem:[#allocation60_spill] sm:$0xff] }
 0x5d9   :  { %4452 = vmatpush1.bf16.msra.mxu0 %v7085_v0  ;;  %v7096_v0 = vld [vmem:[#allocation62_spill] sm:$0xff] }
 0x5da   :  { %4454 = vmatprep.subr.bf16.mxu0 %v7086_v9  ;;  %v7097_v9 = vld [vmem:[#allocation64_spill] sm:$0xff] }
 0x5dd   :  { %4456 = vmatpush1.bf16.msra.mxu0 %v7087_v39  ;;  %v7098_v39 = vld [vmem:[#allocation66_spill] sm:$0xff] }
 0x5de   :  { %4458 = vmatprep.subr.bf16.mxu0 %v7088_v4  ;;  %v7099_v4 = vld [vmem:[#allocation68_spill] sm:$0xff] }
 0x5e1   :  { %4460 = vmatpush1.bf16.msra.mxu0 %v7089_v61  ;;  %v7100_v61 = vld [vmem:[#allocation70_spill] sm:$0xff] }
 0x5e2   :  { %4462 = vmatprep.subr.bf16.mxu0 %v7090_v50  ;;  %v7101_v50 = vld [vmem:[#allocation72_spill] sm:$0xff] }
 0x5e5   :  { %4464 = vmatpush1.bf16.msra.mxu0 %v7091_v6  ;;  %v7102_v6 = vld [vmem:[#allocation74_spill] sm:$0xff] }
 0x5e6   :  { %4466 = vmatprep.subr.bf16.mxu0 %v7092_v8  ;;  %v7103_v8 = vld [vmem:[#allocation76_spill] sm:$0xff] }
 0x5e9   :  { %4468 = vmatpush1.bf16.msra.mxu0 %v7093_v16  ;;  %v7104_v16 = vld [vmem:[#allocation23_spill] sm:$0xff] }
 0x5ea   :  { %4470 = vmatprep.subr.bf16.mxu0 %v7094_v31 }
 0x5ed   :  { %4472 = vmatpush1.bf16.msra.mxu0 %v7095_v12 }
 0x5ee   :  { %4474 = vmatprep.subr.bf16.mxu0 %v7096_v0 }
 0x5f1   :  { %4476 = vmatpush1.bf16.msra.mxu0 %v7097_v9 }
 0x5f2   :  { %4478 = vmatprep.subr.bf16.mxu0 %v7098_v39 }
 0x5f5   :  { %4480 = vmatpush1.bf16.msra.mxu0 %v7099_v4 }
 0x5f6   :  { %4482 = vmatprep.subr.bf16.mxu0 %v7100_v61 }
 0x5f9   :  { %4484 = vmatpush1.bf16.msra.mxu0 %v7101_v50  ;;  %v2422_v50 = vrot.slane %v2177_v59, 4 }
 0x5fa   :  { %4486 = vmatprep.subr.bf16.mxu0 %v7102_v6 }
 0x5fd   :  { %4488 = vmatpush1.bf16.msra.mxu0 %v7103_v8 }
 0x5fe   :  { %4554 = vmatprep.subr.bf16.mxu0 %v7104_v16 }
 0x653   :  { %v2256_v31 = vpop.f32.mrb[20].mxu0  ;;  %v2327_v12 = vpop.f32.mrb[20].mxu1 }
 0x654   :  { %v2258_v29 = vpop.f32.mrb[21].mxu0  ;;  %v2329_v0 = vpop.f32.mrb[21].mxu1 }
 0x655   :  { %v2405_v14 = vcombine.low %v2256_v31, %v2258_v29  ;;  %v2426_v9 = vcombine.low %v2327_v12, %v2329_v0 }
 0x657   :  { %v2412_v39 = vrot.slane %v2405_v14, %v6871_v10  ;;  %v2433_v61 = vrot.slane %v2426_v9, %v6871_v10 }
 0x659   :  { %v2414_v4 = vadd.f32 %v2412_v39, %v2177_v59  ;;  %v2435_v6 = vadd.f32 %v2433_v61, %v2422_v50  ;;  %v2178_v59 = vld [vmem:[#allocation2 + $0x38] sm:$0xf] }
 0x65b   :  { %v3377_v19 = vmul.f32 -1.442695, %v2414_v4  ;;  %v3378_v41 = vmul.f32 -1.442695, %v2435_v6 }
 0x65d   :  { %4999 = vpow2.f32 %v3377_v19 }
 0x65e   :  { %5001 = vpow2.f32 %v3378_v41 }
 0x667   :  { %v5000_v8 = vpop.eup %4999 }
 0x668   :  { %v2418_v16 = vadd.f32 1.0, %v5000_v8  ;;  %v5002_v62 = vpop.eup %5001 }
 0x669   :  { %v2439_v0 = vadd.f32 1.0, %v5002_v62 }
 0x66a   :  { %5003 = vrcp.f32 %v2418_v16 }
 0x66b   :  { %5005 = vrcp.f32 %v2439_v0  ;;  %v7109_v0 = vld [vmem:[#allocation59_spill] sm:$0xff] }
 0x674   :  { %v5004_v9 = vpop.eup %5003 }
 0x675   :  { %v5006_v41 = vpop.eup %5005 }
 0x676   :  { %v2458_v50 = vsub.f32 1.0, %v5006_v41  ;;  %v2460_v16 = vmul.f32 %v5006_v41, %v6205_v20  ;;  %v7105_v20 = vld [vmem:[#allocation55_spill] sm:$0xff]  ;;  %v7116_v41 = vld [vmem:[#allocation93_spill] sm:$0xff] }
 0x693   :  { %v2398_v49 = vpop.f32.mrb[22].mxu0 }
 0x694   :  { %v2442_v29 = vadd.f32 %v2398_v49, %v5856_v30  ;;  %v2400_v12 = vpop.f32.mrb[23].mxu0 }
 0x695   :  { %v2443_v14 = vadd.f32 %v2400_v12, %v5858_v51  ;;  %v7107_v12 = vld [vmem:[#allocation88_spill] sm:$0xff] }
 0x697   :  { %v2446_v39 = vcombine.low %v2442_v29, %v2443_v14  ;;  %v7106_v29 = vld [vmem:[#allocation57_spill] sm:$0xff] }
 0x698   :  { %v7108_v14 = vld [vmem:[#allocation89_spill] sm:$0xff] }
 0x699   :  { %v2453_v4 = vrot.slane %v2446_v39, %v6871_v10  ;;  %v7110_v39 = vld [vmem:[#allocation61_spill] sm:$0xff] }
 0x69b   :  { %v2455_v19 = vmul.f32 %v5004_v9, %v2453_v4  ;;  %v7111_v4 = vld [vmem:[#allocation90_spill] sm:$0xff]  ;;  %v7112_v9 = vld [vmem:[#allocation91_spill] sm:$0xff] }
 0x69d   :  { %v2456_v61 = vadd.f32 %v2455_v19, %v2178_v59  ;;  %v7113_v19 = vld [vmem:[#allocation63_spill] sm:$0xff]  ;;  %v7114_v59 = vld [vmem:[#allocation65_spill] sm:$0xff] }
 0x69f   :  { %5007 = vtanh.f32 %v2456_v61  ;;  %v7115_v61 = vld [vmem:[#allocation92_spill] sm:$0xff] }
 0x6a9   :  { %v5008_v6 = vpop.eup %5007 }
 0x6aa   :  { %v2459_v8 = vmul.f32 %v5008_v6, %v2458_v50  ;;  %v7117_v50 = vld [vmem:[#allocation67_spill] sm:$0xff]  ;;  %v7118_v6 = vld [vmem:[#allocation69_spill] sm:$0xff] }
 0x6ac   :  { %v6319_v49 = vadd.f32 %v2460_v16, %v2459_v8  ;;  %v7119_v8 = vld [vmem:[#allocation94_spill] sm:$0xff]  ;;  %v7120_v16 = vld [vmem:[#allocation95_spill] sm:$0xff] }
 0x6ae   :  { %2463 = vst [vmem:[#allocation13 + $0x10] sm:$0xf] %v6319_v49  ;;  %v6324_v62 = vrot.slane %v6319_v49, %v6871_v10 }
 0x6b0   :  { %v2475_v31 = vcombine.high %v6324_v62, %v6324_v62 }
 0x6b2   :  { %2542 = vmatprep.mubr.f32.mxu1 %v2475_v31  ;;  %2613 = vmatprep.mubr.f32.mxu0 %v2475_v31 }
 0x6b3   :  { %2543 = vmatmul.mubr.f32.vlgmr.msra.gmra.mrb[22].mxu1 %v6324_v62  ;;  %2614 = vmatmul.mubr.f32.vlgmr.msra.gmra.mrb[24].mxu0 %v6324_v62 }
 0x6b4   :  { %4492 = vmatpush1.bf16.msra.mxu1 %v5565_v18  ;;  %2684 = vmatprep.mubr.f32.mxu1 %v2475_v31  ;;  %v7121_v31 = vld [vmem:[#allocation71_spill] sm:$0xff] }
 0x6b5   :  { %4494 = vmatprep.subr.bf16.mxu1 %v5568_v42  ;;  %4556 = vmatpush1.bf16.msra.mxu0 %v6874_v21 }
 0x6b6   :  { %4558 = vmatprep.subr.bf16.mxu0 %v5371_v25 }
 0x6b8   :  { %4496 = vmatpush1.bf16.msra.mxu1 %v5574_v43 }
 0x6b9   :  { %4498 = vmatprep.subr.bf16.mxu1 %v6875_v57  ;;  %4560 = vmatpush1.bf16.msra.mxu0 %v6876_v45 }
 0x6ba   :  { %4562 = vmatprep.subr.bf16.mxu0 %v5385_v36 }
 0x6bc   :  { %4500 = vmatpush1.bf16.msra.mxu1 %v5583_v13 }
 0x6bd   :  { %4502 = vmatprep.subr.bf16.mxu1 %v6877_v23  ;;  %4564 = vmatpush1.bf16.msra.mxu0 %v6878_v47 }
 0x6be   :  { %4566 = vmatprep.subr.bf16.mxu0 %v5397_v48 }
 0x6c0   :  { %4504 = vmatpush1.bf16.msra.mxu1 %v5591_v22 }
 0x6c1   :  { %4506 = vmatprep.subr.bf16.mxu1 %v6879_v63  ;;  %4568 = vmatpush1.bf16.msra.mxu0 %v6880_v35 }
 0x6c2   :  { %4570 = vmatprep.subr.bf16.mxu0 %v5409_v60 }
 0x6c4   :  { %4508 = vmatpush1.bf16.msra.mxu1 %v5599_v32 }
 0x6c5   :  { %4510 = vmatprep.subr.bf16.mxu1 %v6881_v52  ;;  %4572 = vmatpush1.bf16.msra.mxu0 %v6882_v34 }
 0x6c6   :  { %4574 = vmatprep.subr.bf16.mxu0 %v5421_v15 }
 0x6c8   :  { %4512 = vmatpush1.bf16.msra.mxu1 %v5607_v44 }
 0x6c9   :  { %4514 = vmatprep.subr.bf16.mxu1 %v6883_v26  ;;  %4576 = vmatpush1.bf16.msra.mxu0 %v6884_v53 }
 0x6ca   :  { %4578 = vmatprep.subr.bf16.mxu0 %v5433_v28 }
 0x6cc   :  { %4516 = vmatpush1.bf16.msra.mxu1 %v5615_v56 }
 0x6cd   :  { %4518 = vmatprep.subr.bf16.mxu1 %v6885_v37  ;;  %4580 = vmatpush1.bf16.msra.mxu0 %v6886_v55 }
 0x6ce   :  { %4582 = vmatprep.subr.bf16.mxu0 %v5445_v46 }
 0x6d0   :  { %4520 = vmatpush1.bf16.msra.mxu1 %v5623_v7 }
 0x6d1   :  { %4522 = vmatprep.subr.bf16.mxu1 %v6887_v33  ;;  %4584 = vmatpush1.bf16.msra.mxu0 %v6888_v17 }
 0x6d2   :  { %4586 = vmatprep.subr.bf16.mxu0 %v5457_v1 }
 0x6d4   :  { %4524 = vmatpush1.bf16.msra.mxu1 %v5631_v24 }
 0x6d5   :  { %4526 = vmatprep.subr.bf16.mxu1 %v6889_v11  ;;  %4588 = vmatpush1.bf16.msra.mxu0 %v6890_v38 }
 0x6d6   :  { %4590 = vmatprep.subr.bf16.mxu0 %v5471_v27 }
 0x6d8   :  { %4528 = vmatpush1.bf16.msra.mxu1 %v5639_v40 }
 0x6d9   :  { %4530 = vmatprep.subr.bf16.mxu1 %v6891_v2  ;;  %4592 = vmatpush1.bf16.msra.mxu0 %v6892_v5 }
 0x6da   :  { %4594 = vmatprep.subr.bf16.mxu0 %v5489_v54 }
 0x6dc   :  { %4532 = vmatpush1.bf16.msra.mxu1 %v5647_v58 }
 0x6dd   :  { %4534 = vmatprep.subr.bf16.mxu1 %v6893_v3  ;;  %4596 = vmatpush1.bf16.msra.mxu0 %v7105_v20 }
 0x6de   :  { %4598 = vmatprep.subr.bf16.mxu0 %v7106_v29 }
 0x6e0   :  { %4536 = vmatpush1.bf16.msra.mxu1 %v7107_v12 }
 0x6e1   :  { %4538 = vmatprep.subr.bf16.mxu1 %v7108_v14  ;;  %4600 = vmatpush1.bf16.msra.mxu0 %v7109_v0  ;;  %v2465_v0 = vld [vmem:[#allocation2 + $0x3c] sm:$0xff] }
 0x6e2   :  { %4602 = vmatprep.subr.bf16.mxu0 %v7110_v39 }
 0x6e4   :  { %4540 = vmatpush1.bf16.msra.mxu1 %v7111_v4  ;;  %v7122_v4 = vld [vmem:[#allocation73_spill] sm:$0xff] }
 0x6e5   :  { %4542 = vmatprep.subr.bf16.mxu1 %v7112_v9  ;;  %4604 = vmatpush1.bf16.msra.mxu0 %v7113_v19  ;;  %v7123_v9 = vld [vmem:[#allocation96_spill] sm:$0xff] }
 0x6e6   :  { %4606 = vmatprep.subr.bf16.mxu0 %v7114_v59  ;;  %v7124_v19 = vld [vmem:[#allocation24_spill] sm:$0xff]  ;;  %v7125_v59 = vld [vmem:[#allocation75_spill] sm:$0xff] }
 0x6e8   :  { %4544 = vmatpush1.bf16.msra.mxu1 %v7115_v61  ;;  %v7126_v61 = vld [vmem:[#allocation77_spill] sm:$0xff] }
 0x6e9   :  { %4546 = vmatprep.subr.bf16.mxu1 %v7116_v41  ;;  %4608 = vmatpush1.bf16.msra.mxu0 %v7117_v50  ;;  %v7127_v50 = vld [vmem:[#allocation26_spill] sm:$0xff] }
 0x6ea   :  { %4610 = vmatprep.subr.bf16.mxu0 %v7118_v6  ;;  %v7128_v6 = vld [vmem:[#allocation27_spill] sm:$0xff] }
 0x6ec   :  { %4548 = vmatpush1.bf16.msra.mxu1 %v7119_v8  ;;  %v7129_v8 = vld [vmem:[#allocation29_spill] sm:$0xff] }
 0x6ed   :  { %4550 = vmatprep.subr.bf16.mxu1 %v7120_v16  ;;  %4612 = vmatpush1.bf16.msra.mxu0 %v7121_v31  ;;  %v7130_v16 = vld [vmem:[#allocation30_spill] sm:$0xff]  ;;  %v7131_v31 = vld [vmem:[#allocation32_spill] sm:$0xff] }
 0x6ee   :  { %4614 = vmatprep.subr.bf16.mxu0 %v7122_v4  ;;  %v7132_v4 = vld [vmem:[#allocation33_spill] sm:$0xff] }
 0x6f0   :  { %4552 = vmatpush1.bf16.msra.mxu1 %v7123_v9  ;;  %v7133_v9 = vld [vmem:[#allocation35_spill] sm:$0xff] }
 0x6f1   :  { %4618 = vmatprep.subr.bf16.mxu1 %v7124_v19  ;;  %4616 = vmatpush1.bf16.msra.mxu0 %v7125_v59  ;;  %v7134_v19 = vld [vmem:[#allocation36_spill] sm:$0xff]  ;;  %v7135_v59 = vld [vmem:[#allocation38_spill] sm:$0xff] }
 0x6f2   :  { %4682 = vmatprep.subr.bf16.mxu0 %v7126_v61  ;;  %v7136_v61 = vld [vmem:[#allocation39_spill] sm:$0xff] }
 0x6f3   :  { %2685 = vmatmul.mubr.f32.vlgmr.msra.gmra.mrb[24].mxu1 %v6324_v62  ;;  %v7137_v62 = vld [vmem:[#allocation41_spill] sm:$0xff] }
 0x6f4   :  { %4620 = vmatpush1.bf16.msra.mxu1 %v7127_v50  ;;  %v7138_v50 = vld [vmem:[#allocation42_spill] sm:$0xff] }
 0x6f5   :  { %4622 = vmatprep.subr.bf16.mxu1 %v7128_v6  ;;  %v7139_v6 = vld [vmem:[#allocation44_spill] sm:$0xff] }
 0x6f8   :  { %4624 = vmatpush1.bf16.msra.mxu1 %v7129_v8  ;;  %v7140_v8 = vld [vmem:[#allocation45_spill] sm:$0xff] }
 0x6f9   :  { %4626 = vmatprep.subr.bf16.mxu1 %v7130_v16  ;;  %v7141_v16 = vld [vmem:[#allocation47_spill] sm:$0xff] }
 0x6fc   :  { %4628 = vmatpush1.bf16.msra.mxu1 %v7131_v31  ;;  %v7142_v31 = vld [vmem:[#allocation48_spill] sm:$0xff] }
 0x6fd   :  { %4630 = vmatprep.subr.bf16.mxu1 %v7132_v4  ;;  %v7143_v4 = vld [vmem:[#allocation50_spill] sm:$0xff] }
 0x700   :  { %4632 = vmatpush1.bf16.msra.mxu1 %v7133_v9  ;;  %v7144_v9 = vld [vmem:[#allocation51_spill] sm:$0xff] }
 0x701   :  { %4634 = vmatprep.subr.bf16.mxu1 %v7134_v19  ;;  %v7145_v19 = vld [vmem:[#allocation53_spill] sm:$0xff] }
 0x704   :  { %4636 = vmatpush1.bf16.msra.mxu1 %v7135_v59  ;;  %v7146_v59 = vld [vmem:[#allocation54_spill] sm:$0xff] }
 0x705   :  { %4638 = vmatprep.subr.bf16.mxu1 %v7136_v61  ;;  %v7147_v61 = vld [vmem:[#allocation56_spill] sm:$0xff] }
 0x708   :  { %4640 = vmatpush1.bf16.msra.mxu1 %v7137_v62  ;;  %v7148_v62 = vld [vmem:[#allocation58_spill] sm:$0xff] }
 0x709   :  { %4642 = vmatprep.subr.bf16.mxu1 %v7138_v50  ;;  %v7149_v50 = vld [vmem:[#allocation60_spill] sm:$0xff] }
 0x70c   :  { %4644 = vmatpush1.bf16.msra.mxu1 %v7139_v6  ;;  %v7150_v6 = vld [vmem:[#allocation62_spill] sm:$0xff] }
 0x70d   :  { %4646 = vmatprep.subr.bf16.mxu1 %v7140_v8  ;;  %v7151_v8 = vld [vmem:[#allocation64_spill] sm:$0xff] }
 0x710   :  { %4648 = vmatpush1.bf16.msra.mxu1 %v7141_v16  ;;  %v7152_v16 = vld [vmem:[#allocation66_spill] sm:$0xff] }
 0x711   :  { %4650 = vmatprep.subr.bf16.mxu1 %v7142_v31  ;;  %v7153_v31 = vld [vmem:[#allocation68_spill] sm:$0xff] }
 0x714   :  { %4652 = vmatpush1.bf16.msra.mxu1 %v7143_v4  ;;  %v7154_v4 = vld [vmem:[#allocation70_spill] sm:$0xff] }
 0x715   :  { %4654 = vmatprep.subr.bf16.mxu1 %v7144_v9  ;;  %v7155_v9 = vld [vmem:[#allocation72_spill] sm:$0xff] }
 0x718   :  { %4656 = vmatpush1.bf16.msra.mxu1 %v7145_v19  ;;  %v7156_v19 = vld [vmem:[#allocation74_spill] sm:$0xff] }
 0x719   :  { %4658 = vmatprep.subr.bf16.mxu1 %v7146_v59  ;;  %v7157_v59 = vld [vmem:[#allocation76_spill] sm:$0xff] }
 0x71c   :  { %4660 = vmatpush1.bf16.msra.mxu1 %v7147_v61  ;;  %v7158_v61 = vld [vmem:[#allocation23_spill] sm:$0xff] }
 0x71d   :  { %4662 = vmatprep.subr.bf16.mxu1 %v7148_v62 }
 0x720   :  { %4664 = vmatpush1.bf16.msra.mxu1 %v7149_v50 }
 0x721   :  { %4666 = vmatprep.subr.bf16.mxu1 %v7150_v6 }
 0x724   :  { %4668 = vmatpush1.bf16.msra.mxu1 %v7151_v8 }
 0x725   :  { %4670 = vmatprep.subr.bf16.mxu1 %v7152_v16 }
 0x728   :  { %4672 = vmatpush1.bf16.msra.mxu1 %v7153_v31 }
 0x729   :  { %4674 = vmatprep.subr.bf16.mxu1 %v7154_v4 }
 0x72c   :  { %4676 = vmatpush1.bf16.msra.mxu1 %v7155_v9  ;;  %v2710_v9 = vrot.slane %v2465_v0, 4 }
 0x72d   :  { %4678 = vmatprep.subr.bf16.mxu1 %v7156_v19 }
 0x730   :  { %4680 = vmatpush1.bf16.msra.mxu1 %v7157_v59 }
 0x731   :  { %4746 = vmatprep.subr.bf16.mxu1 %v7158_v61 }
 0x786   :  { %v2544_v62 = vpop.f32.mrb[22].mxu1  ;;  %v2615_v50 = vpop.f32.mrb[24].mxu0 }
 0x787   :  { %v2546_v41 = vpop.f32.mrb[23].mxu1  ;;  %v2617_v6 = vpop.f32.mrb[25].mxu0 }
 0x788   :  { %v2693_v39 = vcombine.low %v2544_v62, %v2546_v41  ;;  %v2714_v8 = vcombine.low %v2615_v50, %v2617_v6 }
 0x78a   :  { %v2700_v16 = vrot.slane %v2693_v39, %v6871_v10  ;;  %v2721_v4 = vrot.slane %v2714_v8, %v6871_v10 }
 0x78c   :  { %v2702_v31 = vadd.f32 %v2700_v16, %v2465_v0  ;;  %v2723_v19 = vadd.f32 %v2721_v4, %v2710_v9  ;;  %v2466_v0 = vld [vmem:[#allocation2 + $0x44] sm:$0xf] }
 0x78e   :  { %v3379_v14 = vmul.f32 -1.442695, %v2702_v31  ;;  %v3380_v12 = vmul.f32 -1.442695, %v2723_v19 }
 0x790   :  { %5009 = vpow2.f32 %v3379_v14 }
 0x791   :  { %5011 = vpow2.f32 %v3380_v12 }
 0x79a   :  { %v5010_v59 = vpop.eup %5009 }
 0x79b   :  { %v2706_v61 = vadd.f32 1.0, %v5010_v59  ;;  %v5012_v20 = vpop.eup %5011 }
 0x79c   :  { %v2727_v6 = vadd.f32 1.0, %v5012_v20 }
 0x79d   :  { %5013 = vrcp.f32 %v2706_v61 }
 0x79e   :  { %5015 = vrcp.f32 %v2727_v6  ;;  %v7183_v6 = vld [vmem:[#allocation29_spill] sm:$0xff] }
 0x7a7   :  { %v5014_v8 = vpop.eup %5013 }
 0x7a8   :  { %v5016_v12 = vpop.eup %5015 }
 0x7a9   :  { %v2746_v9 = vsub.f32 1.0, %v5016_v12  ;;  %v2748_v62 = vmul.f32 %v5016_v12, %v6319_v49  ;;  %v7179_v49 = vld [vmem:[#allocation75_spill] sm:$0xff] }
 0x7aa   :  { %v7190_v12 = vld [vmem:[#allocation39_spill] sm:$0xff] }
 0x7c6   :  { %v2686_v29 = vpop.f32.mrb[24].mxu1 }
 0x7c7   :  { %v2730_v41 = vadd.f32 %v2686_v29, %v5856_v30  ;;  %v2688_v50 = vpop.f32.mrb[25].mxu1 }
 0x7c8   :  { %v2731_v39 = vadd.f32 %v2688_v50, %v5858_v51  ;;  %v7181_v50 = vld [vmem:[#allocation26_spill] sm:$0xff] }
 0x7ca   :  { %v2734_v16 = vcombine.low %v2730_v41, %v2731_v39  ;;  %v7180_v41 = vld [vmem:[#allocation77_spill] sm:$0xff]  ;;  %v7182_v39 = vld [vmem:[#allocation27_spill] sm:$0xff] }
 0x7cc   :  { %v2741_v31 = vrot.slane %v2734_v16, %v6871_v10  ;;  %v7184_v16 = vld [vmem:[#allocation30_spill] sm:$0xff] }
 0x7ce   :  { %v2743_v14 = vmul.f32 %v5014_v8, %v2741_v31  ;;  %v7185_v31 = vld [vmem:[#allocation32_spill] sm:$0xff]  ;;  %v7186_v8 = vld [vmem:[#allocation33_spill] sm:$0xff] }
 0x7d0   :  { %v2744_v4 = vadd.f32 %v2743_v14, %v2466_v0  ;;  %v7187_v14 = vld [vmem:[#allocation35_spill] sm:$0xff]  ;;  %v7188_v0 = vld [vmem:[#allocation36_spill] sm:$0xff] }
 0x7d2   :  { %5017 = vtanh.f32 %v2744_v4  ;;  %v7189_v4 = vld [vmem:[#allocation38_spill] sm:$0xff] }
 0x7dc   :  { %v5018_v19 = vpop.eup %5017 }
 0x7dd   :  { %v2747_v59 = vmul.f32 %v5018_v19, %v2746_v9  ;;  %v7191_v9 = vld [vmem:[#allocation41_spill] sm:$0xff]  ;;  %v7192_v19 = vld [vmem:[#allocation42_spill] sm:$0xff] }
 0x7df   :  { %v6433_v29 = vadd.f32 %v2748_v62, %v2747_v59  ;;  %v7193_v59 = vld [vmem:[#allocation44_spill] sm:$0xff]  ;;  %v7194_v62 = vld [vmem:[#allocation45_spill] sm:$0xff] }
 0x7e1   :  { %2751 = vst [vmem:[#allocation13 + $0x14] sm:$0xf] %v6433_v29  ;;  %v6438_v20 = vrot.slane %v6433_v29, %v6871_v10 }
 0x7e3   :  { %v2763_v61 = vcombine.high %v6438_v20, %v6438_v20 }
 0x7e5   :  { %2830 = vmatprep.mubr.f32.mxu0 %v2763_v61  ;;  %2901 = vmatprep.mubr.f32.mxu1 %v2763_v61 }
 0x7e6   :  { %2831 = vmatmul.mubr.f32.vlgmr.msra.gmra.mrb[26].mxu0 %v6438_v20  ;;  %2902 = vmatmul.mubr.f32.vlgmr.msra.gmra.mrb[26].mxu1 %v6438_v20 }
 0x7e7   :  { %4684 = vmatpush1.bf16.msra.mxu0 %v5565_v18  ;;  %2972 = vmatprep.mubr.f32.mxu0 %v2763_v61  ;;  %v7196_v61 = vld [vmem:[#allocation48_spill] sm:$0xff] }
 0x7e8   :  { %4686 = vmatprep.subr.bf16.mxu0 %v5568_v42  ;;  %4748 = vmatpush1.bf16.msra.mxu1 %v6874_v21  ;;  %v7169_v21 = vld [vmem:[#allocation92_spill] sm:$0xff] }
 0x7e9   :  { %4750 = vmatprep.subr.bf16.mxu1 %v5371_v25  ;;  %v7159_v25 = vld [vmem:[#allocation55_spill] sm:$0xff] }
 0x7eb   :  { %4688 = vmatpush1.bf16.msra.mxu0 %v5574_v43 }
 0x7ec   :  { %4690 = vmatprep.subr.bf16.mxu0 %v6875_v57  ;;  %4752 = vmatpush1.bf16.msra.mxu1 %v6876_v45  ;;  %v7170_v45 = vld [vmem:[#allocation93_spill] sm:$0xff] }
 0x7ed   :  { %4754 = vmatprep.subr.bf16.mxu1 %v5385_v36  ;;  %v7160_v36 = vld [vmem:[#allocation57_spill] sm:$0xff] }
 0x7ef   :  { %4692 = vmatpush1.bf16.msra.mxu0 %v5583_v13 }
 0x7f0   :  { %4694 = vmatprep.subr.bf16.mxu0 %v6877_v23  ;;  %4756 = vmatpush1.bf16.msra.mxu1 %v6878_v47  ;;  %v7171_v47 = vld [vmem:[#allocation67_spill] sm:$0xff] }
 0x7f1   :  { %4758 = vmatprep.subr.bf16.mxu1 %v5397_v48  ;;  %v7161_v48 = vld [vmem:[#allocation88_spill] sm:$0xff] }
 0x7f3   :  { %4696 = vmatpush1.bf16.msra.mxu0 %v5591_v22 }
 0x7f4   :  { %4698 = vmatprep.subr.bf16.mxu0 %v6879_v63  ;;  %4760 = vmatpush1.bf16.msra.mxu1 %v6880_v35  ;;  %v7172_v35 = vld [vmem:[#allocation69_spill] sm:$0xff] }
 0x7f5   :  { %4762 = vmatprep.subr.bf16.mxu1 %v5409_v60  ;;  %v7162_v60 = vld [vmem:[#allocation89_spill] sm:$0xff] }
 0x7f7   :  { %4700 = vmatpush1.bf16.msra.mxu0 %v5599_v32 }
 0x7f8   :  { %4702 = vmatprep.subr.bf16.mxu0 %v6881_v52  ;;  %4764 = vmatpush1.bf16.msra.mxu1 %v6882_v34  ;;  %v7173_v34 = vld [vmem:[#allocation94_spill] sm:$0xff] }
 0x7f9   :  { %4766 = vmatprep.subr.bf16.mxu1 %v5421_v15  ;;  %v7163_v15 = vld [vmem:[#allocation59_spill] sm:$0xff] }
 0x7fb   :  { %4704 = vmatpush1.bf16.msra.mxu0 %v5607_v44 }
 0x7fc   :  { %4706 = vmatprep.subr.bf16.mxu0 %v6883_v26  ;;  %4768 = vmatpush1.bf16.msra.mxu1 %v6884_v53  ;;  %v7174_v53 = vld [vmem:[#allocation95_spill] sm:$0xff] }
 0x7fd   :  { %4770 = vmatprep.subr.bf16.mxu1 %v5433_v28  ;;  %v7164_v28 = vld [vmem:[#allocation61_spill] sm:$0xff] }
 0x7ff   :  { %4708 = vmatpush1.bf16.msra.mxu0 %v5615_v56 }
 0x800   :  { %4710 = vmatprep.subr.bf16.mxu0 %v6885_v37  ;;  %4772 = vmatpush1.bf16.msra.mxu1 %v6886_v55  ;;  %v7175_v55 = vld [vmem:[#allocation71_spill] sm:$0xff] }
 0x801   :  { %4774 = vmatprep.subr.bf16.mxu1 %v5445_v46  ;;  %v7165_v46 = vld [vmem:[#allocation90_spill] sm:$0xff] }
 0x803   :  { %4712 = vmatpush1.bf16.msra.mxu0 %v5623_v7 }
 0x804   :  { %4714 = vmatprep.subr.bf16.mxu0 %v6887_v33  ;;  %4776 = vmatpush1.bf16.msra.mxu1 %v6888_v17  ;;  %v7176_v17 = vld [vmem:[#allocation73_spill] sm:$0xff] }
 0x805   :  { %4778 = vmatprep.subr.bf16.mxu1 %v5457_v1  ;;  %v7166_v1 = vld [vmem:[#allocation91_spill] sm:$0xff] }
 0x807   :  { %4716 = vmatpush1.bf16.msra.mxu0 %v5631_v24 }
 0x808   :  { %4718 = vmatprep.subr.bf16.mxu0 %v6889_v11  ;;  %4780 = vmatpush1.bf16.msra.mxu1 %v6890_v38  ;;  %v7177_v38 = vld [vmem:[#allocation96_spill] sm:$0xff] }
 0x809   :  { %4782 = vmatprep.subr.bf16.mxu1 %v5471_v27  ;;  %v7167_v27 = vld [vmem:[#allocation63_spill] sm:$0xff] }
 0x80b   :  { %4720 = vmatpush1.bf16.msra.mxu0 %v5639_v40 }
 0x80c   :  { %4722 = vmatprep.subr.bf16.mxu0 %v6891_v2  ;;  %4784 = vmatpush1.bf16.msra.mxu1 %v6892_v5  ;;  %v7178_v5 = vld [vmem:[#allocation24_spill] sm:$0xff] }
 0x80d   :  { %4786 = vmatprep.subr.bf16.mxu1 %v5489_v54  ;;  %v7168_v54 = vld [vmem:[#allocation65_spill] sm:$0xff] }
 0x80f   :  { %4724 = vmatpush1.bf16.msra.mxu0 %v5647_v58 }
 0x810   :  { %4726 = vmatprep.subr.bf16.mxu0 %v6893_v3  ;;  %4788 = vmatpush1.bf16.msra.mxu1 %v7159_v25  ;;  %v7197_v25 = vld [vmem:[#allocation50_spill] sm:$0xff] }
 0x811   :  { %4790 = vmatprep.subr.bf16.mxu1 %v7160_v36  ;;  %v7198_v36 = vld [vmem:[#allocation51_spill] sm:$0xff] }
 0x813   :  { %4728 = vmatpush1.bf16.msra.mxu0 %v7161_v48 }
 0x814   :  { %4730 = vmatprep.subr.bf16.mxu0 %v7162_v60  ;;  %4792 = vmatpush1.bf16.msra.mxu1 %v7163_v15  ;;  %v7199_v15 = vld [vmem:[#allocation53_spill] sm:$0xff] }
 0x815   :  { %4794 = vmatprep.subr.bf16.mxu1 %v7164_v28  ;;  %v7200_v28 = vld [vmem:[#allocation54_spill] sm:$0xff] }
 0x817   :  { %4732 = vmatpush1.bf16.msra.mxu0 %v7165_v46 }
 0x818   :  { %4734 = vmatprep.subr.bf16.mxu0 %v7166_v1  ;;  %4796 = vmatpush1.bf16.msra.mxu1 %v7167_v27  ;;  %v7201_v27 = vld [vmem:[#allocation56_spill] sm:$0xff] }
 0x819   :  { %4798 = vmatprep.subr.bf16.mxu1 %v7168_v54  ;;  %v7202_v54 = vld [vmem:[#allocation58_spill] sm:$0xff] }
 0x81b   :  { %4736 = vmatpush1.bf16.msra.mxu0 %v7169_v21 }
 0x81c   :  { %4738 = vmatprep.subr.bf16.mxu0 %v7170_v45  ;;  %4800 = vmatpush1.bf16.msra.mxu1 %v7171_v47  ;;  %v7203_v47 = vld [vmem:[#allocation60_spill] sm:$0xff] }
 0x81d   :  { %4802 = vmatprep.subr.bf16.mxu1 %v7172_v35  ;;  %v7204_v35 = vld [vmem:[#allocation62_spill] sm:$0xff] }
 0x81f   :  { %4740 = vmatpush1.bf16.msra.mxu0 %v7173_v34 }
 0x820   :  { %4742 = vmatprep.subr.bf16.mxu0 %v7174_v53  ;;  %4804 = vmatpush1.bf16.msra.mxu1 %v7175_v55  ;;  %v7205_v55 = vld [vmem:[#allocation64_spill] sm:$0xff] }
 0x821   :  { %4806 = vmatprep.subr.bf16.mxu1 %v7176_v17  ;;  %v7206_v17 = vld [vmem:[#allocation66_spill] sm:$0xff] }
 0x823   :  { %4744 = vmatpush1.bf16.msra.mxu0 %v7177_v38 }
 0x824   :  { %4810 = vmatprep.subr.bf16.mxu0 %v7178_v5  ;;  %4808 = vmatpush1.bf16.msra.mxu1 %v7179_v49  ;;  %v7207_v5 = vld [vmem:[#allocation68_spill] sm:$0xff]  ;;  %v7208_v49 = vld [vmem:[#allocation70_spill] sm:$0xff] }
 0x825   :  { %4874 = vmatprep.subr.bf16.mxu1 %v7180_v41  ;;  %v7209_v41 = vld [vmem:[#allocation72_spill] sm:$0xff] }
 0x826   :  { %2973 = vmatmul.mubr.f32.vlgmr.msra.gmra.mrb[28].mxu0 %v6438_v20  ;;  %v7195_v20 = vld [vmem:[#allocation47_spill] sm:$0xff] }
 0x827   :  { %4812 = vmatpush1.bf16.msra.mxu0 %v7181_v50  ;;  %v7210_v50 = vld [vmem:[#allocation74_spill] sm:$0xff] }
 0x828   :  { %4814 = vmatprep.subr.bf16.mxu0 %v7182_v39  ;;  %v7211_v39 = vld [vmem:[#allocation76_spill] sm:$0xff] }
 0x82b   :  { %4816 = vmatpush1.bf16.msra.mxu0 %v7183_v6 }
 0x82c   :  { %4818 = vmatprep.subr.bf16.mxu0 %v7184_v16 }
 0x82f   :  { %4820 = vmatpush1.bf16.msra.mxu0 %v7185_v31 }
 0x830   :  { %4822 = vmatprep.subr.bf16.mxu0 %v7186_v8 }
 0x833   :  { %4824 = vmatpush1.bf16.msra.mxu0 %v7187_v14 }
 0x834   :  { %4826 = vmatprep.subr.bf16.mxu0 %v7188_v0 }
 0x837   :  { %4828 = vmatpush1.bf16.msra.mxu0 %v7189_v4 }
 0x838   :  { %4830 = vmatprep.subr.bf16.mxu0 %v7190_v12  ;;  %v2753_v12 = vld [vmem:[#allocation2 + $0x48] sm:$0xff] }
 0x83b   :  { %4832 = vmatpush1.bf16.msra.mxu0 %v7191_v9 }
 0x83c   :  { %4834 = vmatprep.subr.bf16.mxu0 %v7192_v19 }
 0x83f   :  { %4836 = vmatpush1.bf16.msra.mxu0 %v7193_v59 }
 0x840   :  { %4838 = vmatprep.subr.bf16.mxu0 %v7194_v62  ;;  %v2998_v62 = vrot.slane %v2753_v12, 4 }
 0x843   :  { %4840 = vmatpush1.bf16.msra.mxu0 %v7195_v20 }
 0x844   :  { %4842 = vmatprep.subr.bf16.mxu0 %v7196_v61 }
 0x847   :  { %4844 = vmatpush1.bf16.msra.mxu0 %v7197_v25 }
 0x848   :  { %4846 = vmatprep.subr.bf16.mxu0 %v7198_v36 }
 0x84b   :  { %4848 = vmatpush1.bf16.msra.mxu0 %v7199_v15 }
 0x84c   :  { %4850 = vmatprep.subr.bf16.mxu0 %v7200_v28 }
 0x84f   :  { %4852 = vmatpush1.bf16.msra.mxu0 %v7201_v27 }
 0x850   :  { %4854 = vmatprep.subr.bf16.mxu0 %v7202_v54 }
 0x853   :  { %4856 = vmatpush1.bf16.msra.mxu0 %v7203_v47 }
 0x854   :  { %4858 = vmatprep.subr.bf16.mxu0 %v7204_v35 }
 0x857   :  { %4860 = vmatpush1.bf16.msra.mxu0 %v7205_v55 }
 0x858   :  { %4862 = vmatprep.subr.bf16.mxu0 %v7206_v17 }
 0x85b   :  { %4864 = vmatpush1.bf16.msra.mxu0 %v7207_v5 }
 0x85c   :  { %4866 = vmatprep.subr.bf16.mxu0 %v7208_v49 }
 0x85f   :  { %4868 = vmatpush1.bf16.msra.mxu0 %v7209_v41  ;;  %v2754_v41 = vld [vmem:[#allocation2 + $0x50] sm:$0xf] }
 0x860   :  { %4870 = vmatprep.subr.bf16.mxu0 %v7210_v50 }
 0x863   :  { %4872 = vmatpush1.bf16.msra.mxu0 %v7211_v39 }
 0x8b9   :  { %v2832_v6 = vpop.f32.mrb[26].mxu0  ;;  %v2903_v16 = vpop.f32.mrb[26].mxu1 }
 0x8ba   :  { %v2834_v31 = vpop.f32.mrb[27].mxu0  ;;  %v2905_v8 = vpop.f32.mrb[27].mxu1 }
 0x8bb   :  { %v2981_v14 = vcombine.low %v2832_v6, %v2834_v31  ;;  %v3002_v0 = vcombine.low %v2903_v16, %v2905_v8 }
 0x8bd   :  { %v2988_v4 = vrot.slane %v2981_v14, %v6871_v10  ;;  %v3009_v59 = vrot.slane %v3002_v0, %v6871_v10 }
 0x8bf   :  { %v2990_v9 = vadd.f32 %v2988_v4, %v2753_v12  ;;  %v3011_v20 = vadd.f32 %v3009_v59, %v2998_v62 }
 0x8c1   :  { %v3381_v19 = vmul.f32 -1.442695, %v2990_v9  ;;  %v3382_v61 = vmul.f32 -1.442695, %v3011_v20 }
 0x8c3   :  { %5019 = vpow2.f32 %v3381_v19 }
 0x8c4   :  { %5021 = vpow2.f32 %v3382_v61 }
 0x8cd   :  { %v5020_v25 = vpop.eup %5019 }
 0x8ce   :  { %v2994_v36 = vadd.f32 1.0, %v5020_v25  ;;  %v5022_v28 = vpop.eup %5021 }
 0x8cf   :  { %v3015_v35 = vadd.f32 1.0, %v5022_v28 }
 0x8d0   :  { %5023 = vrcp.f32 %v2994_v36 }
 0x8d1   :  { %5025 = vrcp.f32 %v3015_v35 }
 0x8da   :  { %v5024_v5 = vpop.eup %5023 }
 0x8db   :  { %v5026_v39 = vpop.eup %5025 }
 0x8dc   :  { %v3034_v6 = vsub.f32 1.0, %v5026_v39  ;;  %v3036_v8 = vmul.f32 %v5026_v39, %v6433_v29 }
 0x8f9   :  { %v2974_v15 = vpop.f32.mrb[28].mxu0 }
 0x8fa   :  { %v3018_v27 = vadd.f32 %v2974_v15, %v5856_v30  ;;  %v2976_v54 = vpop.f32.mrb[29].mxu0 }
 0x8fb   :  { %v3019_v47 = vadd.f32 %v2976_v54, %v5858_v51 }
 0x8fd   :  { %v3022_v55 = vcombine.low %v3018_v27, %v3019_v47 }
 0x8ff   :  { %v3029_v17 = vrot.slane %v3022_v55, %v6871_v10 }
 0x901   :  { %v3031_v49 = vmul.f32 %v5024_v5, %v3029_v17 }
 0x903   :  { %v3032_v50 = vadd.f32 %v3031_v49, %v2754_v41 }
 0x905   :  { %5027 = vtanh.f32 %v3032_v50 }
 0x90f   :  { %v5028_v16 = vpop.eup %5027 }
 0x910   :  { %v3035_v31 = vmul.f32 %v5028_v16, %v3034_v6 }
 0x912   :  { %v6546_v14 = vadd.f32 %v3036_v8, %v3035_v31 }
 0x914   :  { %3039 = vst [vmem:[#allocation13 + $0x18] sm:$0xf] %v6546_v14  ;;  %v3050_v0 = vrot.slane %v6546_v14, %v6871_v10 }
 0x916   :  { %v3051_v4 = vcombine.high %v3050_v0, %v3050_v0 }
 0x918   :  { %3118 = vmatprep.mubr.f32.mxu1 %v3051_v4  ;;  %3189 = vmatprep.mubr.f32.mxu0 %v3051_v4 }
 0x919   :  { %3119 = vmatmul.mubr.f32.vlgmr.msra.gmra.mrb[28].mxu1 %v3050_v0  ;;  %3190 = vmatmul.mubr.f32.vlgmr.msra.gmra.mrb[30].mxu0 %v3050_v0 }
 0x91a   :  { %4876 = vmatpush1.bf16.msra.mxu1 %v5565_v18  ;;  %3260 = vmatprep.mubr.f32.mxu1 %v3051_v4 }
 0x91b   :  { %4878 = vmatprep.subr.bf16.mxu1 %v5568_v42 }
 0x91e   :  { %4880 = vmatpush1.bf16.msra.mxu1 %v5574_v43 }
 0x91f   :  { %4882 = vmatprep.subr.bf16.mxu1 %v6875_v57 }
 0x922   :  { %4884 = vmatpush1.bf16.msra.mxu1 %v5583_v13 }
 0x923   :  { %4886 = vmatprep.subr.bf16.mxu1 %v6877_v23 }
 0x926   :  { %4888 = vmatpush1.bf16.msra.mxu1 %v5591_v22 }
 0x927   :  { %4890 = vmatprep.subr.bf16.mxu1 %v6879_v63 }
 0x92a   :  { %4892 = vmatpush1.bf16.msra.mxu1 %v5599_v32 }
 0x92b   :  { %4894 = vmatprep.subr.bf16.mxu1 %v6881_v52 }
 0x92e   :  { %4896 = vmatpush1.bf16.msra.mxu1 %v5607_v44 }
 0x92f   :  { %4898 = vmatprep.subr.bf16.mxu1 %v6883_v26 }
 0x932   :  { %4900 = vmatpush1.bf16.msra.mxu1 %v5615_v56 }
 0x933   :  { %4902 = vmatprep.subr.bf16.mxu1 %v6885_v37 }
 0x936   :  { %4904 = vmatpush1.bf16.msra.mxu1 %v5623_v7 }
 0x937   :  { %4906 = vmatprep.subr.bf16.mxu1 %v6887_v33 }
 0x93a   :  { %4908 = vmatpush1.bf16.msra.mxu1 %v5631_v24 }
 0x93b   :  { %4910 = vmatprep.subr.bf16.mxu1 %v6889_v11 }
 0x93e   :  { %4912 = vmatpush1.bf16.msra.mxu1 %v5639_v40 }
 0x93f   :  { %4914 = vmatprep.subr.bf16.mxu1 %v6891_v2 }
 0x942   :  { %4916 = vmatpush1.bf16.msra.mxu1 %v5647_v58  ;;  %v3041_v58 = vld [vmem:[#allocation2 + $0x54] sm:$0xff] }
 0x943   :  { %4918 = vmatprep.subr.bf16.mxu1 %v6893_v3  ;;  %v3286_v43 = vrot.slane %v3041_v58, 4 }
 0x946   :  { %4920 = vmatpush1.bf16.msra.mxu1 %v7161_v48 }
 0x947   :  { %4922 = vmatprep.subr.bf16.mxu1 %v7162_v60 }
 0x94a   :  { %4924 = vmatpush1.bf16.msra.mxu1 %v7165_v46 }
 0x94b   :  { %4926 = vmatprep.subr.bf16.mxu1 %v7166_v1  ;;  %v3042_v1 = vld [vmem:[#allocation2 + $0x5c] sm:$0xf] }
 0x94e   :  { %4928 = vmatpush1.bf16.msra.mxu1 %v7169_v21 }
 0x94f   :  { %4930 = vmatprep.subr.bf16.mxu1 %v7170_v45 }
 0x952   :  { %4932 = vmatpush1.bf16.msra.mxu1 %v7173_v34 }
 0x953   :  { %4934 = vmatprep.subr.bf16.mxu1 %v7174_v53 }
 0x956   :  { %4936 = vmatpush1.bf16.msra.mxu1 %v7177_v38 }
 0x959   :  { %3261 = vmatmul.mubr.f32.vlgmr.msra.gmra.mrb[30].mxu1 %v3050_v0 }
 0x9ec   :  { %v3120_v22 = vpop.f32.mrb[28].mxu1  ;;  %v3191_v32 = vpop.f32.mrb[30].mxu0 }
 0x9ed   :  { %v3122_v44 = vpop.f32.mrb[29].mxu1  ;;  %v3193_v56 = vpop.f32.mrb[31].mxu0 }
 0x9ee   :  { %v3269_v7 = vcombine.low %v3120_v22, %v3122_v44  ;;  %v3290_v24 = vcombine.low %v3191_v32, %v3193_v56 }
 0x9f0   :  { %v3276_v40 = vrot.slane %v3269_v7, %v6871_v10  ;;  %v3297_v42 = vrot.slane %v3290_v24, %v6871_v10 }
 0x9f2   :  { %v3278_v13 = vadd.f32 %v3276_v40, %v3041_v58  ;;  %v3299_v57 = vadd.f32 %v3297_v42, %v3286_v43 }
 0x9f4   :  { %v3383_v18 = vmul.f32 -1.442695, %v3278_v13  ;;  %v3384_v23 = vmul.f32 -1.442695, %v3299_v57 }
 0x9f6   :  { %5029 = vpow2.f32 %v3383_v18 }
 0x9f7   :  { %5031 = vpow2.f32 %v3384_v23 }
 0xa00   :  { %v5030_v63 = vpop.eup %5029 }
 0xa01   :  { %v3282_v52 = vadd.f32 1.0, %v5030_v63  ;;  %v5032_v37 = vpop.eup %5031 }
 0xa02   :  { %v3303_v3 = vadd.f32 1.0, %v5032_v37 }
 0xa03   :  { %5033 = vrcp.f32 %v3282_v52 }
 0xa04   :  { %5035 = vrcp.f32 %v3303_v3 }
 0xa0d   :  { %v5034_v60 = vpop.eup %5033 }
 0xa0e   :  { %v5036_v45 = vpop.eup %5035 }
 0xa0f   :  { %v3322_v34 = vsub.f32 1.0, %v5036_v45 }
 0xa2c   :  { %v3262_v26 = vpop.f32.mrb[30].mxu1 }
 0xa2d   :  { %v3306_v33 = vadd.f32 %v3262_v26, %v5856_v30  ;;  %v3264_v11 = vpop.f32.mrb[31].mxu1  ;;  %v3324_v30 = vmul.f32 %v5036_v45, %v6546_v14 }
 0xa2e   :  { %v3307_v2 = vadd.f32 %v3264_v11, %v5858_v51 }
 0xa30   :  { %v3310_v29 = vcombine.low %v3306_v33, %v3307_v2 }
 0xa32   :  { %v3317_v48 = vrot.slane %v3310_v29, %v6871_v10 }
 0xa34   :  { %v3319_v46 = vmul.f32 %v5034_v60, %v3317_v48 }
 0xa36   :  { %v3320_v21 = vadd.f32 %v3319_v46, %v3042_v1 }
 0xa38   :  { %5037 = vtanh.f32 %v3320_v21 }
 0xa42   :  { %v5038_v53 = vpop.eup %5037 }
 0xa43   :  { %v3323_v38 = vmul.f32 %v5038_v53, %v3322_v34 }
 0xa45   :  { %v3325_v51 = vadd.f32 %v3324_v30, %v3323_v38 }
 0xa47   :  { %3327 = vst [vmem:[#allocation13 + $0x1c] sm:$0xf] %v3325_v51  ;;  %3328 = vst [vmem:[#allocation3] sm:$0xf] %v3325_v51 }
 0xa48   :  { %3329 = vst [vmem:[#allocation14] sm:$0xf] %v3325_v51 }
 0xa49   :  { %5162 = shalt.err (!%p5159_p2)
}
 0xa4a   :  { %s5163_s16 = scalar_lea.hbm %s6624_s5, 512 }
 0xa4b   :  { %p5164_p3 = scmp.ne.s32.totalorder %s6624_s5, %s5163_s16  ;;  %p5167_p4 = scmp.lt.u32.totalorder %s5163_s16, %s6624_s5 }
 0xa4d   :  { %p5169_p5 = pnand %p5167_p4, %p5164_p3 }
 0xa4f   :  { %5172 = shalt.err (!%p5169_p5)
}
 0xa50   :  { %s5223_s21 = smov 64   ;;  %s5224_s0 = smov 4  }
 0xa51   :  { %3341 = dma.vmem_to_hbm [thread:$0]  %s3336_s9, 512, %s6624_s5, [#allocation6], %s5223_s21, %s5223_s21, %s5224_s0  }
 0xa52   :  { %s5173_s22 = scalar_lea.vmem %s6588_s11, 64  ;;  %p5178_p7 = scmp.lt.s32.totalorder %s6588_s11, %s6588_s11 }
 0xa53   :  { %p5174_p6 = scmp.ne.s32.totalorder %s6588_s11, %s5173_s22  ;;  %p5179_p8 = scmp.lt.s32.totalorder %s5173_s22, %s5173_s22 }
 0xa55   :  { %p5180_p9 = por %p5179_p8, %p5178_p7 }
 0xa57   :  { %p5181_p10 = pnand %p5180_p9, %p5174_p6 }
 0xa59   :  { %5184 = shalt.err (!%p5181_p10)
}
 0xa5a   :  { %s5185_s25 = scalar_lea.hbm %s6625_s6, 64 }
 0xa5b   :  { %p5186_p11 = scmp.ne.s32.totalorder %s6625_s6, %s5185_s25  ;;  %p5189_p12 = scmp.lt.u32.totalorder %s5185_s25, %s6625_s6 }
 0xa5d   :  { %p5191_p13 = pnand %p5189_p12, %p5186_p11 }
 0xa5f   :  { %5194 = shalt.err (!%p5191_p13)
}
 0xa60   :  { %3351 = dma.vmem_to_hbm [thread:$0]  %s6588_s11, 64, %s6625_s6, [#allocation15]  }
 0xa61   :  { %5201 = dma.done.wait [#allocation6], 512  }
 0xa62   :  { %5202 = vsyncadd [#allocation6], 4294966784 }
 0xa63   :  { %5203 = dma.done.wait [#allocation15], 64  }
 0xa64   :  { %5204 = vsyncadd [#allocation15], 4294967232 }
 0xa65   :  { %3358 = vsyncpa [#allocation5], 1 }
 0xa66   :  { %3359 = vsyncpa [#allocation8], 1 }
 0xa67   :  { %3360 = vsyncpa [#allocation11], 1 }
 0xa68   :  { %3361 = vsyncpa [#allocation6], 1 }
 0xa69   :  { %3362 = vsyncpa [#allocation15], 1 }

</bundles_post_ra>
